<compile_context>
chip_gen: v7x
topology: tpu7x:2x2x1
jax: 0.10.0
libtpu: 0.0.40
codegen_flags: <defaults>
</compile_context>

<pallas_src>
import jax
import jax.numpy as jnp
from jax.experimental import pallas as pl
from jax.experimental.pallas import tpu as pltpu

NEG_SLOPE = 0.2          # PyG GATConv default negative_slope
MASK_NEG = 1e30          # additive mask magnitude (f32-safe; exp underflows to 0)


def _leaky_relu(x):
    return jnp.where(x > 0, x, NEG_SLOPE * x)


def _gat_layer(h_in_bf, mask_bias, w_bf, a_bf, b):
    """Dense single-head GATConv over a packed (block-diagonal) batch of graphs.

    h_in_bf: [BN, Din] bf16, w_bf: [Din, H] bf16, a_bf: [H, 2] bf16, b: [1, H] f32,
    mask_bias: [BN, BN] f32 additive (0 on intra-graph edges/self-loops, -1e30 else).
    """
    h = jnp.dot(h_in_bf, w_bf, preferred_element_type=jnp.float32)        # [BN, H] f32
    h_bf = h.astype(jnp.bfloat16)
    # Fused attention projections on the MXU: col 0 = a_src, col 1 = a_dst.
    alphas = jnp.dot(h_bf, a_bf, preferred_element_type=jnp.float32)      # [BN, 2]
    alpha_src = alphas[:, 0:1]                                            # [BN, 1]
    alpha_dst = alphas[:, 1:2]                                            # [BN, 1]
    # e[i, j] = LeakyReLU(alpha_dst[i] + alpha_src[j]); i = target, j = source.
    e = _leaky_relu(alpha_dst + alpha_src.T) + mask_bias                  # [BN, BN]
    m = jnp.max(e, axis=-1, keepdims=True)
    p = jnp.exp(e - m)                       # masked entries underflow to exact 0
    l = jnp.sum(p, axis=-1, keepdims=True)   # >= 1: forced self-loop per row
    out = jnp.dot(p.astype(jnp.bfloat16), h_bf,
                  preferred_element_type=jnp.float32)                     # [BN, H]
    # Scale the [BN,H] aggregate (not the [BN,BN] attn matrix); EUP approx recip.
    return out * pl.reciprocal(l, approx=True) + b


def actor_kernel(x_ref, mask_ref,
                 w1_ref, a1_ref, b1_ref,
                 w2_ref, a2_ref, b2_ref,
                 wm1_ref, bm1_ref, wm2_ref, bm2_ref,
                 out_ref):
    x = x_ref[...].astype(jnp.bfloat16)                 # [BN, obs_dim]
    # Widen the bf16 additive mask once; reused by both GAT layers.
    mask_bias = mask_ref[...].astype(jnp.float32)       # [BN, BN]
    # GAT layer 1 + ReLU
    h = jnp.maximum(
        _gat_layer(x, mask_bias, w1_ref[...], a1_ref[...], b1_ref[...]), 0.0)
    # GAT layer 2 + ReLU
    h = jnp.maximum(
        _gat_layer(h.astype(jnp.bfloat16), mask_bias,
                   w2_ref[...], a2_ref[...], b2_ref[...]), 0.0)
    # MLP: Linear -> ReLU -> Linear (lane-padded) -> Tanh
    m = jnp.maximum(
        jnp.dot(h.astype(jnp.bfloat16), wm1_ref[...],
                preferred_element_type=jnp.float32) + bm1_ref[...], 0.0)
    a = jnp.tanh(
        jnp.dot(m.astype(jnp.bfloat16), wm2_ref[...],
                preferred_element_type=jnp.float32) + bm2_ref[...])
    out_ref[...] = a.astype(out_ref.dtype)
    # TODO(synk): for N large enough that the packed mask no longer fits VMEM,
    # switch to a dst-row-block grid with an online (flash-style) softmax.


def init_params(key, obs_dim, hidden_dim, action_dim):
    ks = jax.random.split(key, 8)

    def glorot(k, shape):
        fan_in, fan_out = shape[0], shape[-1]
        scale = jnp.sqrt(6.0 / (fan_in + fan_out))
        return jax.random.uniform(k, shape, jnp.float32, -scale, scale)

    # GAT layer 1
    w1 = glorot(ks[0], (obs_dim, hidden_dim))
    as1 = glorot(ks[1], (1, hidden_dim))
    ad1 = glorot(ks[2], (1, hidden_dim))
    b1 = jnp.zeros((1, hidden_dim), jnp.float32)
    # GAT layer 2
    w2 = glorot(ks[3], (hidden_dim, hidden_dim))
    as2 = glorot(ks[4], (1, hidden_dim))
    ad2 = glorot(ks[5], (1, hidden_dim))
    b2 = jnp.zeros((1, hidden_dim), jnp.float32)
    # MLP
    wm1 = glorot(ks[6], (hidden_dim, hidden_dim))
    bm1 = jnp.zeros((1, hidden_dim), jnp.float32)
    wm2 = glorot(ks[7], (hidden_dim, action_dim))
    bm2 = jnp.zeros((1, action_dim), jnp.float32)
    return (w1, as1, ad1, b1, w2, as2, ad2, b2, wm1, bm1, wm2, bm2)


def prepare_actor(params, edge_index, num_nodes, graphs_per_step=None):
    """One-time preprocessing (per topology / params), hoisted out of the hot path."""
    (w1, as1, ad1, b1, w2, as2, ad2, b2, wm1, bm1, wm2, bm2) = params
    N = int(num_nodes)
    obs_dim, hidden_dim = int(w1.shape[0]), int(w1.shape[1])
    action_dim = int(wm2.shape[-1])
    a_pad = ((action_dim + 127) // 128) * 128            # lane-dense output width

    if graphs_per_step is None:
        # BN ~= 256 fills a native MXU pass on v6e/v7x (use 128//N for v5e).
        graphs_per_step = max(1, 256 // N)
    BG = int(graphs_per_step)
    BN = BG * N

    # Fused attention vectors: [H, 2] with col 0 = a_src, col 1 = a_dst.
    a1 = jnp.concatenate([as1.T, ad1.T], axis=1)
    a2 = jnp.concatenate([as2.T, ad2.T], axis=1)

    # Zero-pad the final Linear so the output store is an unmasked lane-dense vst
    # (tanh(0) = 0 in pad lanes; wrapper slices them off).
    wm2p = jnp.zeros((hidden_dim, a_pad), jnp.float32).at[:, :action_dim].set(wm2)
    bm2p = jnp.zeros((1, a_pad), jnp.float32).at[:, :action_dim].set(bm2)

    # Per-graph dense adjacency with self-loops (GATConv adds self-loops by
    # default), replicated block-diagonally for the packed batch, stored as an
    # additive bf16 bias: 0 on intra-graph edges/self-loops, -1e30 elsewhere
    # (including all cross-graph blocks).
    # TODO(synk): duplicate (non-self-loop) edges collapse in the dense mask,
    # which differs from PyG semantics on multigraphs.
    src, dst = edge_index[0], edge_index[1]
    adj = jnp.zeros((N, N), jnp.float32).at[dst, src].set(1.0)
    adj = jnp.maximum(adj, jnp.eye(N, dtype=jnp.float32))
    block_adj = jnp.kron(jnp.eye(BG, dtype=jnp.float32), adj)             # [BN, BN]
    mask_bias = ((block_adj - 1.0) * MASK_NEG).astype(jnp.bfloat16)

    bf = jnp.bfloat16
    residents = (mask_bias,
                 w1.astype(bf), a1.astype(bf), b1.astype(jnp.float32),
                 w2.astype(bf), a2.astype(bf), b2.astype(jnp.float32),
                 wm1.astype(bf), bm1.astype(jnp.float32),
                 wm2p.astype(bf), bm2p.astype(jnp.float32))
    meta = dict(N=N, BG=BG, BN=BN, obs_dim=obs_dim,
                action_dim=action_dim, a_pad=a_pad)
    return residents, meta


def _resident_spec(arr):
    """Full-array block with a constant index map -> DMA'd once, VMEM-resident."""
    nd = arr.ndim
    return pl.BlockSpec(arr.shape, lambda s, _nd=nd: (0,) * _nd)


def actor_h2g_maac_forward(obs, residents, meta):
    """obs: [N, obs_dim] or [B, N, obs_dim] f32; returns same leading shape with action_dim."""
    N, BG, BN = meta["N"], meta["BG"], meta["BN"]
    obs_dim, action_dim, a_pad = meta["obs_dim"], meta["action_dim"], meta["a_pad"]

    squeeze = obs.ndim == 2
    if squeeze:
        obs = obs[None]
    obs = obs.astype(jnp.float32)
    B = obs.shape[0]

    # Pack BG graphs per grid step; pad a ragged tail with zero (dummy) graphs.
    # Their mask blocks keep self-loops, so no softmax row is ever fully masked.
    num_steps = -(-B // BG)
    b_pad = num_steps * BG
    if b_pad != B:
        obs = jnp.pad(obs, ((0, b_pad - B), (0, 0), (0, 0)))
    obs_packed = obs.reshape(num_steps, BN, obs_dim)

    out = pl.pallas_call(
        actor_kernel,
        out_shape=jax.ShapeDtypeStruct((num_steps, BN, a_pad), jnp.bfloat16),
        grid=(num_steps,),
        in_specs=[pl.BlockSpec((None, BN, obs_dim), lambda s: (s, 0, 0))]
                 + [_resident_spec(x) for x in residents],
        out_specs=pl.BlockSpec((None, BN, a_pad), lambda s: (s, 0, 0)),
        compiler_params=pltpu.CompilerParams(
            dimension_semantics=("parallel",),      # shard packed steps over v7x's 2 TCs
            vmem_limit_bytes=32 * 1024 * 1024),
    )(obs_packed, *residents)

    out = out.reshape(b_pad, N, a_pad)[:B, :, :action_dim].astype(jnp.float32)
    return out[0] if squeeze else out


if __name__ == "__main__":
    # 64 graphs of 8 nodes (agents), obs_dim=16, hidden_dim=32, action_dim=4,
    # bidirectional ring topology. BG = 32 graphs per step -> packed node dim
    # BN = 256 (one native MXU pass), grid = 2 steps (>= 1 per TC on v7x).
    B, N, OBS_DIM, HIDDEN_DIM, ACTION_DIM = 64, 8, 16, 32, 4

    key = jax.random.PRNGKey(0)
    k_obs, k_par = jax.random.split(key)

    obs = jax.random.normal(k_obs, (B, N, OBS_DIM), jnp.float32)
    idx = jnp.arange(N, dtype=jnp.int32)
    src = jnp.concatenate([idx, (idx + 1) % N])
    dst = jnp.concatenate([(idx + 1) % N, idx])
    edge_index = jnp.stack([src, dst], axis=0)          # [2, 2N]

    params = init_params(k_par, OBS_DIM, HIDDEN_DIM, ACTION_DIM)
    # One-time preprocessing (mask / weight packing) hoisted out of the hot path.
    residents, meta = prepare_actor(params, edge_index, num_nodes=N)

    # Batched path: 32 graphs packed per grid step, 2 grid steps.
    action = actor_h2g_maac_forward(obs, residents, meta)
    jax.block_until_ready(action)
    assert action.shape == (B, N, ACTION_DIM)
    assert bool(jnp.all(jnp.isfinite(action)))

    # Unbatched path matching the original module's forward(obs, edge_index);
    # the single graph is padded to a full packed step (dummy graphs discarded).
    single = actor_h2g_maac_forward(obs[0], residents, meta)
    jax.block_until_ready(single)
    assert single.shape == (N, ACTION_DIM)
    assert bool(jnp.all(jnp.isfinite(single)))
    # Graphs are independent under the block-diagonal mask, so packing must not
    # change per-graph results (up to bf16 rounding).
    assert bool(jnp.allclose(single, action[0], atol=3e-2, rtol=3e-2))

    print("KERNEL_OK")
</pallas_src>

<mosaic_0001>
module attributes {stable_mosaic.version = 11 : i64} {
  func.func @actor_kernel(%arg0: i32, %arg1: memref<1x256x16xf32, #tpu.memory_space<vmem>>, %arg2: memref<256x256xbf16, #tpu.memory_space<vmem>>, %arg3: memref<16x32xbf16, #tpu.memory_space<vmem>>, %arg4: memref<32x2xbf16, #tpu.memory_space<vmem>>, %arg5: memref<1x32xf32, #tpu.memory_space<vmem>>, %arg6: memref<32x32xbf16, #tpu.memory_space<vmem>>, %arg7: memref<32x2xbf16, #tpu.memory_space<vmem>>, %arg8: memref<1x32xf32, #tpu.memory_space<vmem>>, %arg9: memref<32x32xbf16, #tpu.memory_space<vmem>>, %arg10: memref<1x32xf32, #tpu.memory_space<vmem>>, %arg11: memref<32x128xbf16, #tpu.memory_space<vmem>>, %arg12: memref<1x128xf32, #tpu.memory_space<vmem>>, %arg13: memref<1x256x128xbf16, #tpu.memory_space<vmem>>) attributes {dimension_semantics = [#tpu.dimension_semantics<parallel>], iteration_bounds = array<i64: 2>, scalar_prefetch = 0 : i64, scratch_operands = 0 : i64, tpu.core_type = #tpu.core_type<tc>, window_params = [{transform_indices = @transform_0, window_bounds = array<i64: 1, 256, 16>}, {pipeline_mode = #tpu.pipeline_mode<synchronous>, transform_indices = @transform_1, window_bounds = array<i64: 256, 256>}, {pipeline_mode = #tpu.pipeline_mode<synchronous>, transform_indices = @transform_2, window_bounds = array<i64: 16, 32>}, {pipeline_mode = #tpu.pipeline_mode<synchronous>, transform_indices = @transform_3, window_bounds = array<i64: 32, 2>}, {pipeline_mode = #tpu.pipeline_mode<synchronous>, transform_indices = @transform_4, window_bounds = array<i64: 1, 32>}, {pipeline_mode = #tpu.pipeline_mode<synchronous>, transform_indices = @transform_5, window_bounds = array<i64: 32, 32>}, {pipeline_mode = #tpu.pipeline_mode<synchronous>, transform_indices = @transform_6, window_bounds = array<i64: 32, 2>}, {pipeline_mode = #tpu.pipeline_mode<synchronous>, transform_indices = @transform_7, window_bounds = array<i64: 1, 32>}, {pipeline_mode = #tpu.pipeline_mode<synchronous>, transform_indices = @transform_8, window_bounds = array<i64: 32, 32>}, {pipeline_mode = #tpu.pipeline_mode<synchronous>, transform_indices = @transform_9, window_bounds = array<i64: 1, 32>}, {pipeline_mode = #tpu.pipeline_mode<synchronous>, transform_indices = @transform_10, window_bounds = array<i64: 32, 128>}, {pipeline_mode = #tpu.pipeline_mode<synchronous>, transform_indices = @transform_11, window_bounds = array<i64: 1, 128>}, {transform_indices = @transform_12, window_bounds = array<i64: 1, 256, 128>}]} {
    %c0 = arith.constant 0 : index
    %c0_0 = arith.constant 0 : index
    %c0_1 = arith.constant 0 : index
    %0 = vector.load %arg1[%c0, %c0_0, %c0_1] : memref<1x256x16xf32, #tpu.memory_space<vmem>>, vector<1x256x16xf32>
    %1 = vector.shape_cast %0 : vector<1x256x16xf32> to vector<256x16xf32>
    %2 = arith.truncf %1 : vector<256x16xf32> to vector<256x16xbf16>
    %c0_2 = arith.constant 0 : index
    %c0_3 = arith.constant 0 : index
    %3 = vector.load %arg2[%c0_2, %c0_3] : memref<256x256xbf16, #tpu.memory_space<vmem>>, vector<256x256xbf16>
    %4 = arith.extf %3 : vector<256x256xbf16> to vector<256x256xf32>
    %c0_4 = arith.constant 0 : index
    %c0_5 = arith.constant 0 : index
    %5 = vector.load %arg3[%c0_4, %c0_5] : memref<16x32xbf16, #tpu.memory_space<vmem>>, vector<16x32xbf16>
    %c0_6 = arith.constant 0 : index
    %c0_7 = arith.constant 0 : index
    %6 = vector.load %arg4[%c0_6, %c0_7] : memref<32x2xbf16, #tpu.memory_space<vmem>>, vector<32x2xbf16>
    %c0_8 = arith.constant 0 : index
    %c0_9 = arith.constant 0 : index
    %7 = vector.load %arg5[%c0_8, %c0_9] : memref<1x32xf32, #tpu.memory_space<vmem>>, vector<1x32xf32>
    %cst = arith.constant dense<0.000000e+00> : vector<256x32xf32>
    %8 = tpu.matmul %2, %5, %cst {dimension_numbers = #tpu.dot_dimension_numbers<[1], [0], [0], [1], [0, 0, 1, 1], [], []>} : vector<256x16xbf16>, vector<16x32xbf16>, vector<256x32xf32> -> vector<256x32xf32>
    %9 = arith.truncf %8 : vector<256x32xf32> to vector<256x32xbf16>
    %cst_10 = arith.constant dense<0.000000e+00> : vector<256x2xf32>
    %10 = tpu.matmul %9, %6, %cst_10 {dimension_numbers = #tpu.dot_dimension_numbers<[1], [0], [0], [1], [0, 0, 1, 1], [], []>} : vector<256x32xbf16>, vector<32x2xbf16>, vector<256x2xf32> -> vector<256x2xf32>
    %11 = vector.extract_strided_slice %10 {offsets = [0, 0], sizes = [256, 1], strides = [1, 1]} : vector<256x2xf32> to vector<256x1xf32>
    %12 = vector.extract_strided_slice %10 {offsets = [0, 1], sizes = [256, 1], strides = [1, 1]} : vector<256x2xf32> to vector<256x1xf32>
    %13 = tpu.transpose %11, [1, 0] : vector<256x1xf32> -> vector<1x256xf32>
    %14 = vector.broadcast %12 : vector<256x1xf32> to vector<256x256xf32>
    %15 = vector.broadcast %13 : vector<1x256xf32> to vector<256x256xf32>
    %16 = arith.addf %14, %15 : vector<256x256xf32>
    %cst_11 = arith.constant 0.000000e+00 : f32
    %17 = vector.broadcast %cst_11 : f32 to vector<256x256xf32>
    %18 = arith.cmpf ogt, %16, %17 : vector<256x256xf32>
    %cst_12 = arith.constant 2.000000e-01 : f32
    %19 = vector.broadcast %cst_12 : f32 to vector<256x256xf32>
    %20 = arith.mulf %19, %16 : vector<256x256xf32>
    %21 = arith.select %18, %16, %20 : vector<256x256xi1>, vector<256x256xf32>
    %22 = arith.addf %21, %4 : vector<256x256xf32>
    %cst_13 = arith.constant dense<0xFF800000> : vector<256xf32>
    %23 = vector.multi_reduction <maximumf>, %22, %cst_13 [1] : vector<256x256xf32> to vector<256xf32>
    %24 = vector.shape_cast %23 : vector<256xf32> to vector<256x1xf32>
    %25 = vector.broadcast %24 : vector<256x1xf32> to vector<256x256xf32>
    %26 = arith.subf %22, %25 : vector<256x256xf32>
    %27 = math.exp %26 : vector<256x256xf32>
    %cst_14 = arith.constant dense<0.000000e+00> : vector<256xf32>
    %28 = vector.multi_reduction <add>, %27, %cst_14 [1] : vector<256x256xf32> to vector<256xf32>
    %29 = vector.shape_cast %28 : vector<256xf32> to vector<256x1xf32>
    %30 = arith.truncf %27 : vector<256x256xf32> to vector<256x256xbf16>
    %cst_15 = arith.constant dense<0.000000e+00> : vector<256x32xf32>
    %31 = tpu.matmul %30, %9, %cst_15 {dimension_numbers = #tpu.dot_dimension_numbers<[1], [0], [0], [1], [0, 0, 1, 1], [], []>} : vector<256x256xbf16>, vector<256x32xbf16>, vector<256x32xf32> -> vector<256x32xf32>
    %32 = tpu.reciprocal %29 {approx = true} : vector<256x1xf32> -> vector<256x1xf32>
    %33 = vector.broadcast %32 : vector<256x1xf32> to vector<256x32xf32>
    %34 = arith.mulf %31, %33 : vector<256x32xf32>
    %35 = vector.broadcast %7 : vector<1x32xf32> to vector<256x32xf32>
    %36 = arith.addf %34, %35 : vector<256x32xf32>
    %cst_16 = arith.constant 0.000000e+00 : f32
    %37 = vector.broadcast %cst_16 : f32 to vector<256x32xf32>
    %38 = arith.maximumf %36, %37 : vector<256x32xf32>
    %39 = arith.truncf %38 : vector<256x32xf32> to vector<256x32xbf16>
    %c0_17 = arith.constant 0 : index
    %c0_18 = arith.constant 0 : index
    %40 = vector.load %arg6[%c0_17, %c0_18] : memref<32x32xbf16, #tpu.memory_space<vmem>>, vector<32x32xbf16>
    %c0_19 = arith.constant 0 : index
    %c0_20 = arith.constant 0 : index
    %41 = vector.load %arg7[%c0_19, %c0_20] : memref<32x2xbf16, #tpu.memory_space<vmem>>, vector<32x2xbf16>
    %c0_21 = arith.constant 0 : index
    %c0_22 = arith.constant 0 : index
    %42 = vector.load %arg8[%c0_21, %c0_22] : memref<1x32xf32, #tpu.memory_space<vmem>>, vector<1x32xf32>
    %cst_23 = arith.constant dense<0.000000e+00> : vector<256x32xf32>
    %43 = tpu.matmul %39, %40, %cst_23 {dimension_numbers = #tpu.dot_dimension_numbers<[1], [0], [0], [1], [0, 0, 1, 1], [], []>} : vector<256x32xbf16>, vector<32x32xbf16>, vector<256x32xf32> -> vector<256x32xf32>
    %44 = arith.truncf %43 : vector<256x32xf32> to vector<256x32xbf16>
    %cst_24 = arith.constant dense<0.000000e+00> : vector<256x2xf32>
    %45 = tpu.matmul %44, %41, %cst_24 {dimension_numbers = #tpu.dot_dimension_numbers<[1], [0], [0], [1], [0, 0, 1, 1], [], []>} : vector<256x32xbf16>, vector<32x2xbf16>, vector<256x2xf32> -> vector<256x2xf32>
    %46 = vector.extract_strided_slice %45 {offsets = [0, 0], sizes = [256, 1], strides = [1, 1]} : vector<256x2xf32> to vector<256x1xf32>
    %47 = vector.extract_strided_slice %45 {offsets = [0, 1], sizes = [256, 1], strides = [1, 1]} : vector<256x2xf32> to vector<256x1xf32>
    %48 = tpu.transpose %46, [1, 0] : vector<256x1xf32> -> vector<1x256xf32>
    %49 = vector.broadcast %47 : vector<256x1xf32> to vector<256x256xf32>
    %50 = vector.broadcast %48 : vector<1x256xf32> to vector<256x256xf32>
    %51 = arith.addf %49, %50 : vector<256x256xf32>
    %cst_25 = arith.constant 0.000000e+00 : f32
    %52 = vector.broadcast %cst_25 : f32 to vector<256x256xf32>
    %53 = arith.cmpf ogt, %51, %52 : vector<256x256xf32>
    %cst_26 = arith.constant 2.000000e-01 : f32
    %54 = vector.broadcast %cst_26 : f32 to vector<256x256xf32>
    %55 = arith.mulf %54, %51 : vector<256x256xf32>
    %56 = arith.select %53, %51, %55 : vector<256x256xi1>, vector<256x256xf32>
    %57 = arith.addf %56, %4 : vector<256x256xf32>
    %cst_27 = arith.constant dense<0xFF800000> : vector<256xf32>
    %58 = vector.multi_reduction <maximumf>, %57, %cst_27 [1] : vector<256x256xf32> to vector<256xf32>
    %59 = vector.shape_cast %58 : vector<256xf32> to vector<256x1xf32>
    %60 = vector.broadcast %59 : vector<256x1xf32> to vector<256x256xf32>
    %61 = arith.subf %57, %60 : vector<256x256xf32>
    %62 = math.exp %61 : vector<256x256xf32>
    %cst_28 = arith.constant dense<0.000000e+00> : vector<256xf32>
    %63 = vector.multi_reduction <add>, %62, %cst_28 [1] : vector<256x256xf32> to vector<256xf32>
    %64 = vector.shape_cast %63 : vector<256xf32> to vector<256x1xf32>
    %65 = arith.truncf %62 : vector<256x256xf32> to vector<256x256xbf16>
    %cst_29 = arith.constant dense<0.000000e+00> : vector<256x32xf32>
    %66 = tpu.matmul %65, %44, %cst_29 {dimension_numbers = #tpu.dot_dimension_numbers<[1], [0], [0], [1], [0, 0, 1, 1], [], []>} : vector<256x256xbf16>, vector<256x32xbf16>, vector<256x32xf32> -> vector<256x32xf32>
    %67 = tpu.reciprocal %64 {approx = true} : vector<256x1xf32> -> vector<256x1xf32>
    %68 = vector.broadcast %67 : vector<256x1xf32> to vector<256x32xf32>
    %69 = arith.mulf %66, %68 : vector<256x32xf32>
    %70 = vector.broadcast %42 : vector<1x32xf32> to vector<256x32xf32>
    %71 = arith.addf %69, %70 : vector<256x32xf32>
    %cst_30 = arith.constant 0.000000e+00 : f32
    %72 = vector.broadcast %cst_30 : f32 to vector<256x32xf32>
    %73 = arith.maximumf %71, %72 : vector<256x32xf32>
    %74 = arith.truncf %73 : vector<256x32xf32> to vector<256x32xbf16>
    %c0_31 = arith.constant 0 : index
    %c0_32 = arith.constant 0 : index
    %75 = vector.load %arg9[%c0_31, %c0_32] : memref<32x32xbf16, #tpu.memory_space<vmem>>, vector<32x32xbf16>
    %cst_33 = arith.constant dense<0.000000e+00> : vector<256x32xf32>
    %76 = tpu.matmul %74, %75, %cst_33 {dimension_numbers = #tpu.dot_dimension_numbers<[1], [0], [0], [1], [0, 0, 1, 1], [], []>} : vector<256x32xbf16>, vector<32x32xbf16>, vector<256x32xf32> -> vector<256x32xf32>
    %c0_34 = arith.constant 0 : index
    %c0_35 = arith.constant 0 : index
    %77 = vector.load %arg10[%c0_34, %c0_35] : memref<1x32xf32, #tpu.memory_space<vmem>>, vector<1x32xf32>
    %78 = vector.broadcast %77 : vector<1x32xf32> to vector<256x32xf32>
    %79 = arith.addf %76, %78 : vector<256x32xf32>
    %cst_36 = arith.constant 0.000000e+00 : f32
    %80 = vector.broadcast %cst_36 : f32 to vector<256x32xf32>
    %81 = arith.maximumf %79, %80 : vector<256x32xf32>
    %82 = arith.truncf %81 : vector<256x32xf32> to vector<256x32xbf16>
    %c0_37 = arith.constant 0 : index
    %c0_38 = arith.constant 0 : index
    %83 = vector.load %arg11[%c0_37, %c0_38] : memref<32x128xbf16, #tpu.memory_space<vmem>>, vector<32x128xbf16>
    %cst_39 = arith.constant dense<0.000000e+00> : vector<256x128xf32>
    %84 = tpu.matmul %82, %83, %cst_39 {dimension_numbers = #tpu.dot_dimension_numbers<[1], [0], [0], [1], [0, 0, 1, 1], [], []>} : vector<256x32xbf16>, vector<32x128xbf16>, vector<256x128xf32> -> vector<256x128xf32>
    %c0_40 = arith.constant 0 : index
    %c0_41 = arith.constant 0 : index
    %85 = vector.load %arg12[%c0_40, %c0_41] : memref<1x128xf32, #tpu.memory_space<vmem>>, vector<1x128xf32>
    %86 = vector.broadcast %85 : vector<1x128xf32> to vector<256x128xf32>
    %87 = arith.addf %84, %86 : vector<256x128xf32>
    %88 = math.tanh %87 : vector<256x128xf32>
    %89 = arith.truncf %88 : vector<256x128xf32> to vector<256x128xbf16>
    %c0_42 = arith.constant 0 : index
    %c0_43 = arith.constant 0 : index
    %c0_44 = arith.constant 0 : index
    %90 = vector.load %arg13[%c0_42, %c0_43, %c0_44] : memref<1x256x128xbf16, #tpu.memory_space<vmem>>, vector<1x256x128xbf16>
    %91 = vector.shape_cast %90 : vector<1x256x128xbf16> to vector<256x128xbf16>
    %92 = vector.shape_cast %89 : vector<256x128xbf16> to vector<1x256x128xbf16>
    tpu.vector_store %arg13[%c0_42, %c0_43, %c0_44], %92 {strides = array<i32>} : memref<1x256x128xbf16, #tpu.memory_space<vmem>>, vector<1x256x128xbf16>,
    return
  }
  func.func @transform_0(%arg0: i32) -> (i32, i32, i32) {
    %c0_i32 = arith.constant 0 : i32
    %c0_i32_0 = arith.constant 0 : i32
    %c0_i32_1 = arith.constant 0 : i32
    return %arg0, %c0_i32, %c0_i32_0 : i32, i32, i32
  }
  func.func @transform_1(%arg0: i32) -> (i32, i32) {
    %c0_i32 = arith.constant 0 : i32
    %c0_i32_0 = arith.constant 0 : i32
    %c0_i32_1 = arith.constant 0 : i32
    return %c0_i32, %c0_i32_0 : i32, i32
  }
  func.func @transform_2(%arg0: i32) -> (i32, i32) {
    %c0_i32 = arith.constant 0 : i32
    %c0_i32_0 = arith.constant 0 : i32
    %c0_i32_1 = arith.constant 0 : i32
    return %c0_i32, %c0_i32_0 : i32, i32
  }
  func.func @transform_3(%arg0: i32) -> (i32, i32) {
    %c0_i32 = arith.constant 0 : i32
    %c0_i32_0 = arith.constant 0 : i32
    %c0_i32_1 = arith.constant 0 : i32
    return %c0_i32, %c0_i32_0 : i32, i32
  }
  func.func @transform_4(%arg0: i32) -> (i32, i32) {
    %c0_i32 = arith.constant 0 : i32
    %c0_i32_0 = arith.constant 0 : i32
    %c0_i32_1 = arith.constant 0 : i32
    return %c0_i32, %c0_i32_0 : i32, i32
  }
  func.func @transform_5(%arg0: i32) -> (i32, i32) {
    %c0_i32 = arith.constant 0 : i32
    %c0_i32_0 = arith.constant 0 : i32
    %c0_i32_1 = arith.constant 0 : i32
    return %c0_i32, %c0_i32_0 : i32, i32
  }
  func.func @transform_6(%arg0: i32) -> (i32, i32) {
    %c0_i32 = arith.constant 0 : i32
    %c0_i32_0 = arith.constant 0 : i32
    %c0_i32_1 = arith.constant 0 : i32
    return %c0_i32, %c0_i32_0 : i32, i32
  }
  func.func @transform_7(%arg0: i32) -> (i32, i32) {
    %c0_i32 = arith.constant 0 : i32
    %c0_i32_0 = arith.constant 0 : i32
    %c0_i32_1 = arith.constant 0 : i32
    return %c0_i32, %c0_i32_0 : i32, i32
  }
  func.func @transform_8(%arg0: i32) -> (i32, i32) {
    %c0_i32 = arith.constant 0 : i32
    %c0_i32_0 = arith.constant 0 : i32
    %c0_i32_1 = arith.constant 0 : i32
    return %c0_i32, %c0_i32_0 : i32, i32
  }
  func.func @transform_9(%arg0: i32) -> (i32, i32) {
    %c0_i32 = arith.constant 0 : i32
    %c0_i32_0 = arith.constant 0 : i32
    %c0_i32_1 = arith.constant 0 : i32
    return %c0_i32, %c0_i32_0 : i32, i32
  }
  func.func @transform_10(%arg0: i32) -> (i32, i32) {
    %c0_i32 = arith.constant 0 : i32
    %c0_i32_0 = arith.constant 0 : i32
    %c0_i32_1 = arith.constant 0 : i32
    return %c0_i32, %c0_i32_0 : i32, i32
  }
  func.func @transform_11(%arg0: i32) -> (i32, i32) {
    %c0_i32 = arith.constant 0 : i32
    %c0_i32_0 = arith.constant 0 : i32
    %c0_i32_1 = arith.constant 0 : i32
    return %c0_i32, %c0_i32_0 : i32, i32
  }
  func.func @transform_12(%arg0: i32) -> (i32, i32, i32) {
    %c0_i32 = arith.constant 0 : i32
    %c0_i32_0 = arith.constant 0 : i32
    %c0_i32_1 = arith.constant 0 : i32
    return %arg0, %c0_i32, %c0_i32_0 : i32, i32, i32
  }
}

</mosaic_0001>

<bundles_post_ra>
// kernel: tpu_custom_call.1
= control target key start
LH: loop header
LB: loop body
LE: loop exit
PB: predicated region body
PF: predicated region fallthrough
CT: control target
= control target key end

     0   :  { %s8629_s0 = inlined_call_operand.vmem [shape: f32[2,256,16], index: 0, kind: input, shape index: {}]   ;;  %s8630_s1 = inlined_call_operand.vmem [shape: bf16[256,256], index: 1, kind: input, shape index: {}]   ;;  %s8631_s2 = inlined_call_operand.vmem [shape: bf16[16,32], index: 2, kind: input, shape index: {}]   ;;  %s8632_s3 = inlined_call_operand.vmem [shape: bf16[32,2], index: 3, kind: input, shape index: {}]   ;;  %s8633_s4 = inlined_call_operand.vmem [shape: f32[1,32], index: 4, kind: input, shape index: {}]   ;;  %s8634_s5 = inlined_call_operand.vmem [shape: bf16[32,32], index: 5, kind: input, shape index: {}]   ;;  %s8635_s6 = inlined_call_operand.vmem [shape: bf16[32,2], index: 6, kind: input, shape index: {}]   ;;  %s8636_s7 = inlined_call_operand.vmem [shape: f32[1,32], index: 7, kind: input, shape index: {}]   ;;  %s8637_s8 = inlined_call_operand.vmem [shape: bf16[32,32], index: 8, kind: input, shape index: {}]   ;;  %s8638_s9 = inlined_call_operand.vmem [shape: f32[1,32], index: 9, kind: input, shape index: {}]   ;;  %s8639_s10 = inlined_call_operand.vmem [shape: bf16[32,128], index: 10, kind: input, shape index: {}]   ;;  %s8640_s11 = inlined_call_operand.vmem [shape: f32[1,128], index: 11, kind: input, shape index: {}]   ;;  %s8641_s12 = inlined_call_operand.hbm [shape: bf16[2,256,128], index: 12, kind: output, shape index: {}]  }
   0x1   :  { %8806 = sst [smem:[#allocation77_spill]] %s8629_s0 }
   0x2   :  { %17 = vsyncpa [#allocation3], 0 }
   0x3   :  { %19 = vsyncpa [#allocation3 + $0x1], 0  ;;  %s6288_s21 = smov 0   ;;  %s6290_s22 = smov 0  }
   0x4   :  { %s6292_s23 = smov 0   ;;  %s6294_s24 = smov 0  }
   0x5 LB: > { %s6309_s25 = sadd.s32 4294967295, %s6217_s24   ;;  %s4823_s26 = sadd.s32 4294967294, %s6217_s24   ;;  %s6217_s24 = sphi %s6294_s24, %s9183_s24   ;;  %s6213_s23 = sphi %s6292_s23, %s9182_s23   ;;  %s6209_s22 = sphi %s6290_s22, %s9181_s22   ;;  %s6205_s21 = sphi %s6288_s21, %s9180_s21  }
   0x6   : > { %s6313_s27 = sadd.s32 1, %s6217_s24   ;;  %s289_s28 = sadd.s32 1, %s6213_s23 }
   0x7   : > { %s286_s29 = ssub.s32 %s6217_s24, %s6313_s27  ;;  %p299_p0 = scmp.ne.s32.totalorder %s6213_s23, %s6209_s22 }
   0x8   : > { %p287_p1 = scmp.eq.s32.totalorder %s286_s29, 0  ;;  %p300_p2 = scmp.eq.s32.totalorder %s6309_s25, 1 }
   0x9   : > { %p305_p3 = scmp.ne.s32.totalorder %s6209_s22, %s6205_s21  ;;  %p306_p4 = scmp.eq.s32.totalorder %s4823_s26, 1 }
   0xa   : > { %s6324_s30 = scalar_select %p287_p1, %s6213_s23, %s289_s28  }
   0xb   : > { %p6326_p5 = por %p300_p2, %p299_p0  ;;  %p6330_p6 = por %p306_p4, %p305_p3 }
   0xc   : > { %p4826_p7 = scmp.ge.s32.totalorder %s6217_s24, 1  ;;  %p365_p8 = scmp.lt.s32.totalorder %s6217_s24, 3 }
   0xe   : > { %p366_p9 = pnand %p4826_p7, %p365_p8 }
  0x10   : > { %369 = sbr.rel (%p366_p9) target bundleno = 2931 (0xb73), region = 68 }
  0x17   : > { %v5696_v0 = vld [vmem:[%s8631_s2] sm:$0xff]   ;;  %p407_p10 = scmp.lt.s32.totalorder %s6309_s25, 1  ;;  %s8809_s0 = sld [smem:[#allocation77_spill]]  ;;  %vm570_vm0 = vcmask 130048   ;;  %v5698_v50 = vld [vmem:[%s8632_s3 + $0x8] sm:$0xff]   ;;  %v6219_v51 = vmov 1  }
  0x18   : > { %v5697_v1 = vld [vmem:[%s8632_s3] sm:$0xff]   ;;  %5438 = vmatprep.subr.bf16.mxu0 %v5696_v0  ;;  %5694 = vset.pattern.permute.xlu1 %v6219_v51  ;;  %vm808_vm1 = vcmask 261120   ;;  %s404_s15 = sand.u32 1, %s6209_s22   ;;  %s5011_s18 = sshll.u32 %s6309_s25, 11 }
  0x19   : > { %s408_s19 = scalar_select %p407_p10, %s6309_s25, 1  ;;  %5439 = vmatpush3.bf16.msra.mxu0 %v5696_v0  ;;  %5472 = vmatprep.subr.bf16.mxu1 %v5697_v1 }
  0x1a   : > { %5473 = vmatpush3.bf16.msra.mxu1 %v5697_v1  ;;  %5695 = vset.pattern.permute.xlu0 %v6219_v51  ;;  %s4827_s16 = sshll.u32 %s404_s15, 7  ;;  %s8580_s28 = scalar_lea.hbm %s8641_s12, %s5011_s18 }
  0x1b   : > { %s4978_s20 = sshll.u32 %s408_s19, 8  ;;  %5474 = vmatprep.subr.bf16.mxu1 %v5698_v50  ;;  %s8532_s17 = scalar_lea.vmem [#allocation2], %s4827_s16 }
  0x1c   : > { %s4761_s19 = sshll.u32 %s8532_s17, 4  ;;  %s8588_s25 = scalar_lea.sflag [#allocation3], %s404_s15  ;;  %s8582_s19 = int_to_ptr.vmem [resolvable:$true] %s4761_s19 }
  0x1d   : > { %s6347_s29 = scalar_lea.vmem %s8809_s0, %s4978_s20  ;;  %s6155_s0 = scalar_lea.vmem %s8582_s19, 2048 }
  0x1e   : > { %v413_v2 = vld [vmem:[%s6347_s29] sm:$0xff]  ;;  %v414_v3 = vld [vmem:[%s6347_s29 + $0x8] sm:$0xff]  ;;  %v415_v4 = vld [vmem:[%s6347_s29 + $0x10] sm:$0xff]  ;;  %5475 = vmatpush3.bf16.msra.mxu1 %v5698_v50  ;;  %p6156_p11 = scmp.ne.s32.totalorder %s8582_s19, %s6155_s0 }
  0x1f   : > { %v445_v5 = vpack.c.bf16 %v414_v3, %v413_v2  ;;  %v416_v6 = vld [vmem:[%s6347_s29 + $0x18] sm:$0xff]  ;;  %v417_v7 = vld [vmem:[%s6347_s29 + $0x20] sm:$0xff]  ;;  %v418_v8 = vld [vmem:[%s6347_s29 + $0x28] sm:$0xff] }
  0x20   : > { %v446_v9 = vpack.c.bf16 %v416_v6, %v415_v4  ;;  %v447_v10 = vpack.c.bf16 %v418_v8, %v417_v7  ;;  %v419_v11 = vld [vmem:[%s6347_s29 + $0x30] sm:$0xff]  ;;  %v420_v12 = vld [vmem:[%s6347_s29 + $0x38] sm:$0xff]  ;;  %v421_v13 = vld [vmem:[%s6347_s29 + $0x40] sm:$0xff]  ;;  %p6157_p12 = pnand %p6156_p11, %p6326_p5 }
  0x21   : > { %5440 = vmatprep.mubr.msk.bf16.mxu0 %vm570_vm0, %v445_v5  ;;  %v422_v14 = vld [vmem:[%s6347_s29 + $0x48] sm:$0xff]  ;;  %v448_v15 = vpack.c.bf16 %v420_v12, %v419_v11  ;;  %v423_v17 = vld [vmem:[%s6347_s29 + $0x50] sm:$0xff]  ;;  %v424_v18 = vld [vmem:[%s6347_s29 + $0x58] sm:$0xff] }
  0x22   : > { %5441 = vmatmul.mubr.msk.bf16.vlgmr.msra.gmra.mrb[0].mxu0 %vm570_vm0, %v446_v9  ;;  %v449_v16 = vpack.c.bf16 %v422_v14, %v421_v13  ;;  %v425_v19 = vld [vmem:[%s6347_s29 + $0x60] sm:$0xff]  ;;  %v426_v20 = vld [vmem:[%s6347_s29 + $0x68] sm:$0xff]  ;;  %v450_v21 = vpack.c.bf16 %v424_v18, %v423_v17  ;;  %v427_v23 = vld [vmem:[%s6347_s29 + $0x70] sm:$0xff]  ;;  %p6158_p13 = pneg %p6157_p12 }
  0x23   : > { %5444 = vmatprep.mubr.msk.bf16.mxu0 %vm570_vm0, %v447_v10  ;;  %v451_v22 = vpack.c.bf16 %v426_v20, %v425_v19  ;;  %v428_v24 = vld [vmem:[%s6347_s29 + $0x78] sm:$0xff]  ;;  %v429_v25 = vld [vmem:[%s6347_s29 + $0x80] sm:$0xff]  ;;  %v430_v26 = vld [vmem:[%s6347_s29 + $0x88] sm:$0xff] }
  0x24   : > { %v452_v27 = vpack.c.bf16 %v428_v24, %v427_v23  ;;  %v453_v28 = vpack.c.bf16 %v430_v26, %v429_v25  ;;  %v431_v29 = vld [vmem:[%s6347_s29 + $0x90] sm:$0xff]  ;;  %v432_v30 = vld [vmem:[%s6347_s29 + $0x98] sm:$0xff]  ;;  %v433_v31 = vld [vmem:[%s6347_s29 + $0xa0] sm:$0xff] }
  0x25   : > { %v434_v32 = vld [vmem:[%s6347_s29 + $0xa8] sm:$0xff]  ;;  %v454_v33 = vpack.c.bf16 %v432_v30, %v431_v29  ;;  %v435_v35 = vld [vmem:[%s6347_s29 + $0xb0] sm:$0xff]  ;;  %v436_v36 = vld [vmem:[%s6347_s29 + $0xb8] sm:$0xff] }
  0x26   : > { %v455_v34 = vpack.c.bf16 %v434_v32, %v433_v31  ;;  %v437_v37 = vld [vmem:[%s6347_s29 + $0xc0] sm:$0xff]  ;;  %v438_v38 = vld [vmem:[%s6347_s29 + $0xc8] sm:$0xff]  ;;  %v456_v39 = vpack.c.bf16 %v436_v36, %v435_v35  ;;  %v439_v41 = vld [vmem:[%s6347_s29 + $0xd0] sm:$0xff] }
  0x27   : > { %v457_v40 = vpack.c.bf16 %v438_v38, %v437_v37  ;;  %v440_v42 = vld [vmem:[%s6347_s29 + $0xd8] sm:$0xff]  ;;  %v441_v43 = vld [vmem:[%s6347_s29 + $0xe0] sm:$0xff]  ;;  %v442_v44 = vld [vmem:[%s6347_s29 + $0xe8] sm:$0xff] }
  0x28   : > { %v458_v45 = vpack.c.bf16 %v440_v42, %v439_v41  ;;  %v459_v46 = vpack.c.bf16 %v442_v44, %v441_v43  ;;  %v443_v47 = vld [vmem:[%s6347_s29 + $0xf0] sm:$0xff]  ;;  %v444_v48 = vld [vmem:[%s6347_s29 + $0xf8] sm:$0xff]  ;;  %s6220_s29 = smov [#allocation2]  }
  0x29   : > { %v460_v49 = vpack.c.bf16 %v444_v48, %v443_v47  ;;  %s6159_s16 = sshll.u32 %s6220_s29, 4  ;;  %s6160_s16 = int_to_ptr.vmem [resolvable:$false] %s6159_s16 }
  0x2a   : > { %5445 = vmatmul.mubr.msk.bf16.gmra.mrb[4].mxu0 %vm570_vm0, %v448_v15  ;;  %s6161_s18 = scalar_lea.vmem %s6160_s16, 4096  ;;  %p6162_p0 = scmp.lt.s32.totalorder %s8582_s19, %s6160_s16 }
  0x2b   : > { %5448 = vmatprep.mubr.msk.bf16.mxu0 %vm570_vm0, %v449_v16  ;;  %p6163_p1 = scmp.lt.s32.totalorder %s6161_s18, %s6155_s0 }
  0x2d   : > { %p6164_p2 = por %p6163_p1, %p6162_p0 }
  0x2f   : > { %p6165_p3 = pnand %p6164_p2, %p6158_p13 }
  0x32   : > { %5449 = vmatmul.mubr.msk.bf16.gmra.mrb[8].mxu0 %vm570_vm0, %v450_v21 }
  0x33   : > { %5452 = vmatprep.mubr.msk.bf16.mxu0 %vm570_vm0, %v451_v22 }
  0x3a   : > { %5453 = vmatmul.mubr.msk.bf16.gmra.mrb[12].mxu0 %vm570_vm0, %v452_v27 }
  0x3b   : > { %5456 = vmatprep.mubr.msk.bf16.mxu0 %vm570_vm0, %v453_v28 }
  0x42   : > { %5457 = vmatmul.mubr.msk.bf16.gmra.mrb[16].mxu0 %vm570_vm0, %v454_v33 }
  0x43   : > { %5460 = vmatprep.mubr.msk.bf16.mxu0 %vm570_vm0, %v455_v34 }
  0x4a   : > { %5461 = vmatmul.mubr.msk.bf16.gmra.mrb[20].mxu0 %vm570_vm0, %v456_v39 }
  0x4b   : > { %5464 = vmatprep.mubr.msk.bf16.mxu0 %vm570_vm0, %v457_v40 }
  0x52   : > { %5465 = vmatmul.mubr.msk.bf16.gmra.mrb[24].mxu0 %vm570_vm0, %v458_v45 }
  0x53   : > { %5468 = vmatprep.mubr.msk.bf16.mxu0 %vm570_vm0, %v459_v46 }
  0x5a   : > { %5469 = vmatmul.mubr.msk.bf16.gmra.mrb[28].mxu0 %vm570_vm0, %v460_v49 }
  0xf5   : > { %v5442_v52 = vpop.f32.mrb[0].mxu0 }
  0xf6   : > { %v653_v53 = vpop.f32.mrb[1].mxu0 }
  0xf7   : > { %v5443_v54 = vpop.f32.mrb[2].mxu0 }
  0xf8   : > { %v781_v55 = vpack.c.bf16 %v5443_v54, %v5442_v52  ;;  %v656_v56 = vpop.f32.mrb[3].mxu0 }
  0xf9   : > { %v780_v57 = vpack.c.bf16 %v656_v56, %v653_v53 }
  0xfb   : > { %5476 = vmatprep.mubr.msk.bf16.mxu1 %vm808_vm1, %v780_v57 }
  0xfc   : > { %5477 = vmatmul.mubr.msk.bf16.vlgmr.msra.gmra.mrb[0].mxu1 %vm808_vm1, %v781_v55 }
  0xfd   : > { %v5446_v58 = vpop.f32.mrb[4].mxu0 }
  0xfe   : > { %v669_v59 = vpop.f32.mrb[5].mxu0 }
  0xff   : > { %v5447_v60 = vpop.f32.mrb[6].mxu0 }
 0x100   : > { %v783_v61 = vpack.c.bf16 %v5447_v60, %v5446_v58  ;;  %v672_v62 = vpop.f32.mrb[7].mxu0 }
 0x101   : > { %v782_v63 = vpack.c.bf16 %v672_v62, %v669_v59 }
 0x103   : > { %5480 = vmatprep.mubr.msk.bf16.mxu1 %vm808_vm1, %v782_v63 }
 0x104   : > { %5481 = vmatmul.mubr.msk.bf16.gmra.mrb[4].mxu1 %vm808_vm1, %v783_v61 }
 0x105   : > { %v5450_v0 = vpop.f32.mrb[8].mxu0 }
 0x106   : > { %v685_v1 = vpop.f32.mrb[9].mxu0 }
 0x107   : > { %v5451_v2 = vpop.f32.mrb[10].mxu0 }
 0x108   : > { %v785_v3 = vpack.c.bf16 %v5451_v2, %v5450_v0  ;;  %v688_v4 = vpop.f32.mrb[11].mxu0 }
 0x109   : > { %v784_v5 = vpack.c.bf16 %v688_v4, %v685_v1 }
 0x10b   : > { %5484 = vmatprep.mubr.msk.bf16.mxu1 %vm808_vm1, %v784_v5 }
 0x10c   : > { %5485 = vmatmul.mubr.msk.bf16.gmra.mrb[8].mxu1 %vm808_vm1, %v785_v3 }
 0x10d   : > { %v5454_v6 = vpop.f32.mrb[12].mxu0 }
 0x10e   : > { %v701_v7 = vpop.f32.mrb[13].mxu0 }
 0x10f   : > { %v5455_v8 = vpop.f32.mrb[14].mxu0 }
 0x110   : > { %v787_v9 = vpack.c.bf16 %v5455_v8, %v5454_v6  ;;  %v704_v10 = vpop.f32.mrb[15].mxu0 }
 0x111   : > { %v786_v11 = vpack.c.bf16 %v704_v10, %v701_v7 }
 0x113   : > { %5488 = vmatprep.mubr.msk.bf16.mxu1 %vm808_vm1, %v786_v11 }
 0x114   : > { %5489 = vmatmul.mubr.msk.bf16.gmra.mrb[12].mxu1 %vm808_vm1, %v787_v9 }
 0x115   : > { %v5458_v12 = vpop.f32.mrb[16].mxu0 }
 0x116   : > { %v717_v13 = vpop.f32.mrb[17].mxu0 }
 0x117   : > { %v5459_v14 = vpop.f32.mrb[18].mxu0 }
 0x118   : > { %v789_v15 = vpack.c.bf16 %v5459_v14, %v5458_v12  ;;  %v720_v16 = vpop.f32.mrb[19].mxu0 }
 0x119   : > { %v788_v17 = vpack.c.bf16 %v720_v16, %v717_v13 }
 0x11b   : > { %5492 = vmatprep.mubr.msk.bf16.mxu1 %vm808_vm1, %v788_v17  ;;  %5142 = vmatprep.subr.bf16.mxu0 %v788_v17 }
 0x11c   : > { %5493 = vmatmul.mubr.msk.bf16.gmra.mrb[16].mxu1 %vm808_vm1, %v789_v15  ;;  %5143 = vmatpush3.bf16.msra.mxu0 %v780_v57 }
 0x11d   : > { %v5462_v18 = vpop.f32.mrb[20].mxu0  ;;  %5144 = vmatprep.subr.bf16.mxu0 %v789_v15 }
 0x11e   : > { %v733_v19 = vpop.f32.mrb[21].mxu0 }
 0x11f   : > { %v5463_v20 = vpop.f32.mrb[22].mxu0 }
 0x120   : > { %v791_v21 = vpack.c.bf16 %v5463_v20, %v5462_v18  ;;  %v736_v22 = vpop.f32.mrb[23].mxu0  ;;  %5145 = vmatpush3.bf16.msra.mxu0 %v781_v55 }
 0x121   : > { %v790_v23 = vpack.c.bf16 %v736_v22, %v733_v19 }
 0x123   : > { %5496 = vmatprep.mubr.msk.bf16.mxu1 %vm808_vm1, %v790_v23  ;;  %5146 = vmatprep.subr.bf16.mxu0 %v790_v23 }
 0x124   : > { %5497 = vmatmul.mubr.msk.bf16.gmra.mrb[20].mxu1 %vm808_vm1, %v791_v21  ;;  %5147 = vmatpush3.bf16.msra.mxu0 %v782_v63 }
 0x125   : > { %v5466_v24 = vpop.f32.mrb[24].mxu0  ;;  %5148 = vmatprep.subr.bf16.mxu0 %v791_v21 }
 0x126   : > { %v749_v25 = vpop.f32.mrb[25].mxu0 }
 0x127   : > { %v5467_v26 = vpop.f32.mrb[26].mxu0 }
 0x128   : > { %v793_v27 = vpack.c.bf16 %v5467_v26, %v5466_v24  ;;  %v752_v28 = vpop.f32.mrb[27].mxu0  ;;  %5149 = vmatpush3.bf16.msra.mxu0 %v783_v61 }
 0x129   : > { %v792_v29 = vpack.c.bf16 %v752_v28, %v749_v25 }
 0x12b   : > { %5500 = vmatprep.mubr.msk.bf16.mxu1 %vm808_vm1, %v792_v29  ;;  %5150 = vmatprep.subr.bf16.mxu0 %v792_v29 }
 0x12c   : > { %5501 = vmatmul.mubr.msk.bf16.gmra.mrb[24].mxu1 %vm808_vm1, %v793_v27  ;;  %5151 = vmatpush3.bf16.msra.mxu0 %v784_v5 }
 0x12d   : > { %v5470_v30 = vpop.f32.mrb[28].mxu0  ;;  %5152 = vmatprep.subr.bf16.mxu0 %v793_v27 }
 0x12e   : > { %v765_v31 = vpop.f32.mrb[29].mxu0 }
 0x12f   : > { %v5471_v32 = vpop.f32.mrb[30].mxu0 }
 0x130   : > { %v795_v33 = vpack.c.bf16 %v5471_v32, %v5470_v30  ;;  %v768_v34 = vpop.f32.mrb[31].mxu0  ;;  %5153 = vmatpush3.bf16.msra.mxu0 %v785_v3 }
 0x131   : > { %v794_v35 = vpack.c.bf16 %v768_v34, %v765_v31  ;;  %v1242_v31 = vlaneseq }
 0x133   : > { %5504 = vmatprep.mubr.msk.bf16.mxu1 %vm808_vm1, %v794_v35  ;;  %5154 = vmatprep.subr.bf16.mxu0 %v794_v35 }
 0x134   : > { %5505 = vmatmul.mubr.msk.bf16.gmra.mrb[28].mxu1 %vm808_vm1, %v795_v33  ;;  %5155 = vmatpush3.bf16.msra.mxu0 %v786_v11 }
 0x135   : > { %5156 = vmatprep.subr.bf16.mxu0 %v795_v33  ;;  %v1243_v33 = vshrl.u32 %v1242_v31, 7 }
 0x138   : > { %5157 = vmatpush3.bf16.msra.mxu0 %v787_v9 }
 0x1cf   : > { %v6416_v36 = vpop.f32.mrb[0].mxu1 }
 0x1d0   : > { %1094 = vperm.xlu1 %5694, %v6416_v36   ;;  %v891_v37 = vpop.f32.mrb[1].mxu1 }
 0x1d1   : > { %1084 = vperm.xlu0 %5695, %v891_v37   ;;  %v5479_v38 = vpop.f32.mrb[2].mxu1 }
 0x1d2   : > { %v894_v39 = vpop.f32.mrb[3].mxu1 }
 0x1d4   : > { %1099 = vperm.xlu1 %5694, %v5479_v38  }
 0x1d5   : > { %1089 = vperm.xlu0 %5695, %v894_v39  }
 0x1d7   : > { %v5482_v40 = vpop.f32.mrb[4].mxu1 }
 0x1d8   : > { %v907_v41 = vpop.f32.mrb[5].mxu1 }
 0x1d9   : > { %1114 = vperm.xlu0 %5695, %v5482_v40   ;;  %v5483_v42 = vpop.f32.mrb[6].mxu1 }
 0x1da   : > { %1119 = vperm.xlu1 %5694, %v5483_v42   ;;  %v910_v43 = vpop.f32.mrb[7].mxu1 }
 0x1dd   : > { %1104 = vperm.xlu0 %5695, %v907_v41  }
 0x1de   : > { %1109 = vperm.xlu1 %5694, %v910_v43  }
 0x1df   : > { %v5486_v44 = vpop.f32.mrb[8].mxu1 }
 0x1e0   : > { %v923_v45 = vpop.f32.mrb[9].mxu1 }
 0x1e1   : > { %1134 = vperm.xlu0 %5695, %v5486_v44   ;;  %v5487_v46 = vpop.f32.mrb[10].mxu1 }
 0x1e2   : > { %1139 = vperm.xlu1 %5694, %v5487_v46   ;;  %v926_v47 = vpop.f32.mrb[11].mxu1 }
 0x1e5   : > { %1124 = vperm.xlu0 %5695, %v923_v45  }
 0x1e6   : > { %1129 = vperm.xlu1 %5694, %v926_v47  }
 0x1e7   : > { %v6419_v48 = vpop.f32.mrb[12].mxu1 }
 0x1e8   : > { %v939_v49 = vpop.f32.mrb[13].mxu1 }
 0x1e9   : > { %1154 = vperm.xlu0 %5695, %v6419_v48   ;;  %v6422_v50 = vpop.f32.mrb[14].mxu1 }
 0x1ea   : > { %1159 = vperm.xlu1 %5694, %v6422_v50   ;;  %v942_v51 = vpop.f32.mrb[15].mxu1 }
 0x1ed   : > { %1144 = vperm.xlu0 %5695, %v939_v49  }
 0x1ee   : > { %1149 = vperm.xlu1 %5694, %v942_v51  }
 0x1ef   : > { %v5494_v52 = vpop.f32.mrb[16].mxu1 }
 0x1f0   : > { %v955_v53 = vpop.f32.mrb[17].mxu1 }
 0x1f1   : > { %1174 = vperm.xlu0 %5695, %v5494_v52   ;;  %v5495_v54 = vpop.f32.mrb[18].mxu1 }
 0x1f2   : > { %1179 = vperm.xlu1 %5694, %v5495_v54   ;;  %v958_v55 = vpop.f32.mrb[19].mxu1 }
 0x1f5   : > { %1164 = vperm.xlu0 %5695, %v955_v53  }
 0x1f6   : > { %1169 = vperm.xlu1 %5694, %v958_v55  }
 0x1f7   : > { %v5498_v56 = vpop.f32.mrb[20].mxu1 }
 0x1f8   : > { %v971_v57 = vpop.f32.mrb[21].mxu1 }
 0x1f9   : > { %1194 = vperm.xlu0 %5695, %v5498_v56   ;;  %v5499_v58 = vpop.f32.mrb[22].mxu1 }
 0x1fa   : > { %1199 = vperm.xlu1 %5694, %v5499_v58   ;;  %v974_v59 = vpop.f32.mrb[23].mxu1 }
 0x1fd   : > { %1184 = vperm.xlu0 %5695, %v971_v57  }
 0x1fe   : > { %1189 = vperm.xlu1 %5694, %v974_v59  }
 0x1ff   : > { %v5502_v60 = vpop.f32.mrb[24].mxu1 }
 0x200   : > { %v987_v61 = vpop.f32.mrb[25].mxu1 }
 0x201   : > { %1214 = vperm.xlu0 %5695, %v5502_v60   ;;  %v5503_v62 = vpop.f32.mrb[26].mxu1 }
 0x202   : > { %1219 = vperm.xlu1 %5694, %v5503_v62   ;;  %v990_v63 = vpop.f32.mrb[27].mxu1 }
 0x205   : > { %1204 = vperm.xlu0 %5695, %v987_v61  }
 0x206   : > { %1209 = vperm.xlu1 %5694, %v990_v63  }
 0x207   : > { %v6425_v0 = vpop.f32.mrb[28].mxu1 }
 0x208   : > { %8810 = vst [vmem:[#allocation5_spill] sm:$0xff] %v6425_v0  ;;  %v1003_v1 = vpop.f32.mrb[29].mxu1 }
 0x209   : > { %1224 = vperm.xlu0 %5695, %v1003_v1   ;;  %v6427_v2 = vpop.f32.mrb[30].mxu1 }
 0x20a   : > { %8811 = vst [vmem:[#allocation6_spill] sm:$0xff] %v6427_v2  ;;  %v1006_v3 = vpop.f32.mrb[31].mxu1 }
 0x20b   : > { %1229 = vperm.xlu1 %5694, %v1006_v3  }
 0x227   : > { %1018 = vxpose.xlu0.b32.start [1/16] (narrow) %v891_v37, 8 }
 0x22b   : > { %1019 = vxpose.xlu0.b32.cont [2/16] (narrow) %v894_v39, 8 }
 0x22f   : > { %1020 = vxpose.xlu0.b32.cont [3/16] (narrow) %v6416_v36, 8  ;;  %v6494_v36 = vsub.s32 0, %v1243_v33 }
 0x231   : > { %8830 = vst [vmem:[#allocation25_spill] sm:$0xff] %v6494_v36 }
 0x233   : > { %1021 = vxpose.xlu0.b32.cont [4/16] (narrow) %v5479_v38, 8  ;;  %v6499_v38 = vld [vmem:[%s8630_s1 + $0x8] sm:$0xff] }
 0x234   : > { %1050 = vxpose.xlu1.b32.start [1/16] (narrow) %v955_v53, 8  ;;  %8831 = vst [vmem:[#allocation26_spill] sm:$0xff] %v6499_v38 }
 0x237   : > { %1022 = vxpose.xlu0.b32.cont [5/16] (narrow) %v907_v41, 8  ;;  %v6507_v41 = vld [vmem:[%s8630_s1] sm:$0xff] }
 0x238   : > { %1051 = vxpose.xlu1.b32.cont [2/16] (narrow) %v958_v55, 8  ;;  %8833 = vst [vmem:[#allocation28_spill] sm:$0xff] %v6507_v41  ;;  %v6555_v55 = vld [vmem:[%s8630_s1 + $0x40] sm:$0xff] }
 0x239   : > { %8842 = vst [vmem:[#allocation37_spill] sm:$0xff] %v6555_v55 }
 0x23b   : > { %1023 = vxpose.xlu0.b32.cont [6/16] (narrow) %v910_v43, 8  ;;  %v6517_v43 = vld [vmem:[%s8630_s1 + $0x10] sm:$0xff] }
 0x23c   : > { %1052 = vxpose.xlu1.b32.cont [3/16] (narrow) %v5494_v52, 8  ;;  %8835 = vst [vmem:[#allocation30_spill] sm:$0xff] %v6517_v43 }
 0x23f   : > { %1024 = vxpose.xlu0.b32.cont [7/16] (narrow) %v5482_v40, 8 }
 0x240   : > { %1053 = vxpose.xlu1.b32.cont [4/16] (narrow) %v5495_v54, 8  ;;  %v6550_v54 = vld [vmem:[%s8630_s1 + $0x48] sm:$0xff] }
 0x241   : > { %8841 = vst [vmem:[#allocation36_spill] sm:$0xff] %v6550_v54 }
 0x243   : > { %1025 = vxpose.xlu0.b32.cont [8/16] (narrow) %v5483_v42, 8  ;;  %v6512_v42 = vld [vmem:[%s8630_s1 + $0x18] sm:$0xff] }
 0x244   : > { %1054 = vxpose.xlu1.b32.cont [5/16] (narrow) %v971_v57, 8  ;;  %8834 = vst [vmem:[#allocation29_spill] sm:$0xff] %v6512_v42 }
 0x247   : > { %1026 = vxpose.xlu0.b32.cont [9/16] (narrow) %v923_v45, 8  ;;  %v6527_v45 = vld [vmem:[%s8630_s1 + $0x20] sm:$0xff] }
 0x248   : > { %1055 = vxpose.xlu1.b32.cont [6/16] (narrow) %v974_v59, 8  ;;  %8837 = vst [vmem:[#allocation32_spill] sm:$0xff] %v6527_v45 }
 0x24b   : > { %1027 = vxpose.xlu0.b32.cont [10/16] (narrow) %v926_v47, 8 }
 0x24c   : > { %1056 = vxpose.xlu1.b32.cont [7/16] (narrow) %v5498_v56, 8 }
 0x24f   : > { %1028 = vxpose.xlu0.b32.cont [11/16] (narrow) %v5486_v44, 8  ;;  %v6433_v5 = vpop.permute.xlu1 %1094  ;;  %v6522_v44 = vld [vmem:[%s8630_s1 + $0x28] sm:$0xff] }
 0x250   : > { %1057 = vxpose.xlu1.b32.cont [8/16] (narrow) %v5499_v58, 8  ;;  %v6430_v4 = vpop.permute.xlu0 %1084  ;;  %8836 = vst [vmem:[#allocation31_spill] sm:$0xff] %v6522_v44 }
 0x253   : > { %1029 = vxpose.xlu0.b32.cont [12/16] (narrow) %v5487_v46, 8  ;;  %v6438_v7 = vpop.permute.xlu1 %1099 }
 0x254   : > { %1058 = vxpose.xlu1.b32.cont [9/16] (narrow) %v987_v61, 8  ;;  %v6435_v6 = vpop.permute.xlu0 %1089 }
 0x257   : > { %1030 = vxpose.xlu0.b32.cont [13/16] (narrow) %v939_v49, 8  ;;  %v6539_v49 = vld [vmem:[%s8630_s1 + $0x30] sm:$0xff] }
 0x258   : > { %1059 = vxpose.xlu1.b32.cont [10/16] (narrow) %v990_v63, 8  ;;  %v6440_v8 = vpop.permute.xlu0 %1114  ;;  %8839 = vst [vmem:[#allocation34_spill] sm:$0xff] %v6539_v49 }
 0x259   : > { %v6442_v9 = vpop.permute.xlu1 %1119 }
 0x25b   : > { %1031 = vxpose.xlu0.b32.cont [14/16] (narrow) %v942_v51, 8 }
 0x25c   : > { %1060 = vxpose.xlu1.b32.cont [11/16] (narrow) %v5502_v60, 8  ;;  %v6445_v10 = vpop.permute.xlu0 %1104 }
 0x25d   : > { %v6448_v11 = vpop.permute.xlu1 %1109 }
 0x25f   : > { %1032 = vxpose.xlu0.b32.cont [15/16] (narrow) %v6419_v48, 8  ;;  %v6534_v48 = vld [vmem:[%s8630_s1 + $0x38] sm:$0xff] }
 0x260   : > { %1061 = vxpose.xlu1.b32.cont [12/16] (narrow) %v5503_v62, 8  ;;  %v6450_v12 = vpop.permute.xlu0 %1134  ;;  %8838 = vst [vmem:[#allocation33_spill] sm:$0xff] %v6534_v48 }
 0x261   : > { %v6452_v13 = vpop.permute.xlu1 %1139 }
 0x263   : > { %1033 = vxpose.xlu0.b32.end [16/16] (narrow) %v6422_v50, 8 }
 0x264   : > { %1062 = vxpose.xlu1.b32.cont [13/16] (narrow) %v1003_v1, 8  ;;  %v6454_v14 = vpop.permute.xlu0 %1124 }
 0x265   : > { %v6456_v15 = vpop.permute.xlu1 %1129 }
 0x268   : > { %1063 = vxpose.xlu1.b32.cont [14/16] (narrow) %v1006_v3, 8  ;;  %v6458_v16 = vpop.permute.xlu0 %1154 }
 0x269   : > { %8812 = vst [vmem:[#allocation7_spill] sm:$0xff] %v6458_v16  ;;  %v6460_v17 = vpop.permute.xlu1 %1159  ;;  %v8850_v16 = vunpack.c.l.bf16 %v6507_v41 }
 0x26a   : > { %8813 = vst [vmem:[#allocation8_spill] sm:$0xff] %v6460_v17 }
 0x26c   : > { %1064 = vxpose.xlu1.b32.cont [15/16] (narrow) %v6425_v0, 8  ;;  %v6462_v18 = vpop.permute.xlu0 %1144  ;;  %v8854_v0 = vunpack.c.l.bf16 %v6512_v42 }
 0x26d   : > { %8814 = vst [vmem:[#allocation9_spill] sm:$0xff] %v6462_v18  ;;  %v6464_v19 = vpop.permute.xlu1 %1149 }
 0x26e   : > { %8815 = vst [vmem:[#allocation10_spill] sm:$0xff] %v6464_v19 }
 0x270   : > { %1065 = vxpose.xlu1.b32.end [16/16] (narrow) %v6427_v2, 8  ;;  %v6466_v20 = vpop.permute.xlu0 %1174 }
 0x271   : > { %8816 = vst [vmem:[#allocation11_spill] sm:$0xff] %v6466_v20  ;;  %v6468_v21 = vpop.permute.xlu1 %1179 }
 0x272   : > { %8817 = vst [vmem:[#allocation12_spill] sm:$0xff] %v6468_v21 }
 0x274   : > { %v6470_v22 = vpop.permute.xlu0 %1164 }
 0x275   : > { %8818 = vst [vmem:[#allocation13_spill] sm:$0xff] %v6470_v22  ;;  %v6472_v23 = vpop.permute.xlu1 %1169 }
 0x276   : > { %8819 = vst [vmem:[#allocation14_spill] sm:$0xff] %v6472_v23 }
 0x278   : > { %v6474_v24 = vpop.permute.xlu0 %1194 }
 0x279   : > { %8820 = vst [vmem:[#allocation15_spill] sm:$0xff] %v6474_v24  ;;  %v6476_v25 = vpop.permute.xlu1 %1199  ;;  %v8844_v24 = vunpack.c.l.bf16 %v6499_v38 }
 0x27a   : > { %8821 = vst [vmem:[#allocation16_spill] sm:$0xff] %v6476_v25 }
 0x27c   : > { %v6478_v26 = vpop.permute.xlu0 %1184 }
 0x27d   : > { %8822 = vst [vmem:[#allocation17_spill] sm:$0xff] %v6478_v26  ;;  %v6480_v27 = vpop.permute.xlu1 %1189  ;;  %v8846_v26 = vunpack.c.h.bf16 %v6499_v38 }
 0x27e   : > { %8823 = vst [vmem:[#allocation18_spill] sm:$0xff] %v6480_v27 }
 0x280   : > { %v6482_v28 = vpop.permute.xlu0 %1214 }
 0x281   : > { %8824 = vst [vmem:[#allocation19_spill] sm:$0xff] %v6482_v28  ;;  %v6484_v29 = vpop.permute.xlu1 %1219 }
 0x282   : > { %8825 = vst [vmem:[#allocation20_spill] sm:$0xff] %v6484_v29 }
 0x284   : > { %v6486_v30 = vpop.permute.xlu0 %1204 }
 0x285   : > { %8826 = vst [vmem:[#allocation21_spill] sm:$0xff] %v6486_v30  ;;  %v6488_v32 = vpop.permute.xlu1 %1209 }
 0x286   : > { %8827 = vst [vmem:[#allocation22_spill] sm:$0xff] %v6488_v32 }
 0x288   : > { %v6490_v34 = vpop.permute.xlu0 %1224 }
 0x289   : > { %8828 = vst [vmem:[#allocation23_spill] sm:$0xff] %v6490_v34 }
 0x28a   : > { %v6492_v35 = vpop.permute.xlu1 %1229 }
 0x28b   : > { %8829 = vst [vmem:[#allocation24_spill] sm:$0xff] %v6492_v35 }
 0x2a7   : > { %v1034_v37 = vpop.trf.xlu0 }
 0x2a8   : > { %v6502_v39 = vrot.slane %v1034_v37, %v6494_v36  ;;  %v6573_v37 = vld [vmem:[%s8630_s1 + $0x58] sm:$0xff] }
 0x2a9   : > { %8843 = vst [vmem:[#allocation38_spill] sm:$0xff] %v6573_v37 }
 0x2aa   : > { %8832 = vst [vmem:[#allocation27_spill] sm:$0xff] %v6502_v39  ;;  %v1252_v56 = vadd.f32 %v6502_v39, %v6435_v6  ;;  %v6581_v63 = vadd.f32 %v6502_v39, %v6433_v5  ;;  %v6588_v33 = vadd.f32 %v6502_v39, %v6438_v7  ;;  %v6592_v3 = vadd.f32 %v6502_v39, %v6445_v10 }
 0x2ab   : > { %v6597_v58 = vadd.f32 %v6502_v39, %v6448_v11  ;;  %v6605_v31 = vadd.f32 %v6502_v39, %v6442_v9  ;;  %v6610_v57 = vadd.f32 %v6502_v39, %v6454_v14  ;;  %v6614_v1 = vadd.f32 %v6502_v39, %v6456_v15 }
 0x2ac   : > { %v1380_v59 = vmul.f32 0.2, %v1252_v56  ;;  %v6618_v60 = vadd.f32 %v6502_v39, %v6450_v12  ;;  %v6623_v51 = vmul.f32 0.2, %v6581_v63  ;;  %vm1316_vm2 = vcmp.gt.f32.partialorder %v1252_v56, 0.0 }
 0x2ad   : > { %v1384_v61 = vmul.f32 0.2, %v6588_v33  ;;  %v6627_v47 = vmul.f32 0.2, %v6592_v3  ;;  %v6631_v35 = vadd.f32 %v6502_v39, %v6452_v13  ;;  %v1388_v53 = vmul.f32 0.2, %v6597_v58 }
 0x2ae   : > { %v6638_v34 = vmul.f32 0.2, %v6605_v31  ;;  %vm1320_vm6 = vcmp.gt.f32.partialorder %v6588_v33, 0.0  ;;  %vm1318_vm8 = vcmp.gt.f32.partialorder %v6581_v63, 0.0  ;;  %vm1324_vm10 = vcmp.gt.f32.partialorder %v6597_v58, 0.0 }
 0x2af   : > { %vm1322_vm12 = vcmp.gt.f32.partialorder %v6592_v3, 0.0  ;;  %vm1328_vm14 = vcmp.gt.f32.partialorder %v6605_v31, 0.0 }
 0x2b4   : > { %v1066_v40 = vpop.trf.xlu1 }
 0x2b5   : > { %v6542_v50 = vrot.slane %v1066_v40, %v6494_v36  ;;  %v6577_v40 = vadd.f32 %v6502_v39, %v6430_v4  ;;  %v1444_v36 = vsel %vm1316_vm2, %v1252_v56, %v1380_v59  ;;  %v6645_v56 = vmul.f32 0.2, %v6610_v57 }
 0x2b6   : > { %v6653_v27 = vadd.f32 %v1444_v36, %v8844_v24  ;;  %v6692_v36 = vmul.f32 0.2, %v6618_v60 }
 0x2b7   : > { %8840 = vst [vmem:[#allocation35_spill] sm:$0xff] %v6542_v50  ;;  %v1253_v62 = vadd.f32 %v6542_v50, %v6435_v6  ;;  %v6601_v6 = vadd.f32 %v6502_v39, %v6440_v8  ;;  %v1378_v52 = vmul.f32 0.2, %v6577_v40  ;;  %v1251_v28 = vadd.f32 %v6542_v50, %v6430_v4 }
 0x2b8   : > { %v1255_v32 = vadd.f32 %v6542_v50, %v6433_v5  ;;  %v1257_v30 = vadd.f32 %v6542_v50, %v6438_v7  ;;  %v1259_v25 = vadd.f32 %v6542_v50, %v6445_v10  ;;  %8845 = vst [vmem:[#allocation39_spill] sm:$0xff] %v6653_v27  ;;  %v1261_v5 = vadd.f32 %v6542_v50, %v6448_v11 }
 0x2b9   : > { %vm1317_vm3 = vcmp.gt.f32.partialorder %v1253_v62, 0.0  ;;  %v1381_v46 = vmul.f32 0.2, %v1253_v62  ;;  %v6635_v29 = vmul.f32 0.2, %v6601_v6  ;;  %v6667_v7 = vadd.f32 %v6542_v50, %v6442_v9  ;;  %v6689_v9 = vld [vmem:[%s8630_s1 + $0x50] sm:$0xff] }
 0x2ba   : > { %v6670_v10 = vmul.f32 0.2, %v6614_v1  ;;  %v6674_v24 = vadd.f32 %v6542_v50, %v6454_v14  ;;  %v6682_v11 = vadd.f32 %v6542_v50, %v6452_v13  ;;  %8848 = vst [vmem:[#allocation41_spill] sm:$0xff] %v6689_v9  ;;  %8849 = vst [vmem:[#allocation42_spill] sm:$0xff] %v6692_v36  ;;  %v6695_v14 = vmul.f32 0.2, %v6631_v35 }
 0x2bb   : > { %v1445_v59 = vsel %vm1317_vm3, %v1253_v62, %v1381_v46  ;;  %v6663_v46 = vadd.f32 %v6542_v50, %v6440_v8  ;;  %v1383_v13 = vmul.f32 0.2, %v1255_v32  ;;  %v1387_v38 = vmul.f32 0.2, %v1259_v25 }
 0x2bc   : > { %v6657_v4 = vadd.f32 %v1445_v59, %v8846_v26  ;;  %v6678_v26 = vadd.f32 %v6542_v50, %v6456_v15  ;;  %v1379_v15 = vmul.f32 0.2, %v1251_v28  ;;  %v1385_v59 = vmul.f32 0.2, %v1257_v30 }
 0x2bd   : > { %v1391_v21 = vmul.f32 0.2, %v6663_v46  ;;  %v1393_v20 = vmul.f32 0.2, %v6667_v7  ;;  %v6704_v22 = vadd.f32 %v6542_v50, %v6450_v12  ;;  %v6707_v17 = vmul.f32 0.2, %v6674_v24 }
 0x2be   : > { %8847 = vst [vmem:[#allocation40_spill] sm:$0xff] %v6657_v4  ;;  %v1573_v8 = vmax.f32 %v6653_v27, %v6657_v4  ;;  %v1389_v27 = vmul.f32 0.2, %v1261_v5  ;;  %v6711_v62 = vmul.f32 0.2, %v6682_v11  ;;  %vm1314_vm4 = vcmp.gt.f32.partialorder %v6577_v40, 0.0 }
 0x2bf   : > { %vm1315_vm5 = vcmp.gt.f32.partialorder %v1251_v28, 0.0  ;;  %vm1321_vm7 = vcmp.gt.f32.partialorder %v1257_v30, 0.0  ;;  %v1442_v23 = vsel %vm1314_vm4, %v6577_v40, %v1378_v52  ;;  %v1448_v12 = vsel %vm1320_vm6, %v6588_v33, %v1384_v61 }
 0x2c0   : > { %1574 = vmax.xlane.f32.xlu1 %v1573_v8  ;;  %v1397_v8 = vmul.f32 0.2, %v6678_v26  ;;  %v1443_v4 = vsel %vm1315_vm5, %v1251_v28, %v1379_v15  ;;  %v1449_v50 = vsel %vm1321_vm7, %v1257_v30, %v1385_v59  ;;  %v6719_v19 = vadd.f32 %v1442_v23, %v8850_v16 }
 0x2c1   : > { %v8852_v39 = vunpack.c.h.bf16 %v6507_v41  ;;  %v6727_v2 = vadd.f32 %v1448_v12, %v8854_v0  ;;  %v8856_v36 = vunpack.c.h.bf16 %v6512_v42  ;;  %vm1319_vm9 = vcmp.gt.f32.partialorder %v1255_v32, 0.0  ;;  %v8925_v42 = vld [vmem:[#allocation21_spill] sm:$0xff] }
 0x2c2   : > { %8851 = vst [vmem:[#allocation43_spill] sm:$0xff] %v6719_v19  ;;  %vm1325_vm11 = vcmp.gt.f32.partialorder %v1261_v5, 0.0  ;;  %v1446_v0 = vsel %vm1318_vm8, %v6581_v63, %v6623_v51  ;;  %v1447_v28 = vsel %vm1319_vm9, %v1255_v32, %v1383_v13  ;;  %v8858_v30 = vunpack.c.l.bf16 %v6517_v43 }
 0x2c3   : > { %v6723_v18 = vadd.f32 %v1443_v4, %v8852_v39  ;;  %8855 = vst [vmem:[#allocation45_spill] sm:$0xff] %v6727_v2  ;;  %v6731_v9 = vadd.f32 %v1449_v50, %v8856_v36  ;;  %v8860_v50 = vunpack.c.h.bf16 %v6517_v43  ;;  %v1452_v61 = vsel %vm1324_vm10, %v6597_v58, %v1388_v53 }
 0x2c4   : > { %v6743_v39 = vadd.f32 %v1446_v0, %v8858_v30  ;;  %v1453_v33 = vsel %vm1325_vm11, %v1261_v5, %v1389_v27  ;;  %v8862_v40 = vunpack.c.l.bf16 %v6522_v44  ;;  %v8864_v51 = vunpack.c.h.bf16 %v6522_v44  ;;  %v8924_v44 = vld [vmem:[#allocation16_spill] sm:$0xff] }
 0x2c5   : > { %8853 = vst [vmem:[#allocation44_spill] sm:$0xff] %v6723_v18  ;;  %8857 = vst [vmem:[#allocation46_spill] sm:$0xff] %v6731_v9  ;;  %v1570_v16 = vmax.f32 %v6719_v19, %v6723_v18  ;;  %v1579_v23 = vmax.f32 %v6727_v2, %v6731_v9  ;;  %v6747_v52 = vadd.f32 %v1447_v28, %v8860_v50  ;;  %vm1323_vm13 = vcmp.gt.f32.partialorder %v1259_v25, 0.0 }
 0x2c6   : > { %8859 = vst [vmem:[#allocation47_spill] sm:$0xff] %v6743_v39  ;;  %v6752_v4 = vadd.f32 %v1452_v61, %v8862_v40  ;;  %v6756_v32 = vadd.f32 %v1453_v33, %v8864_v51  ;;  %v1450_v53 = vsel %vm1322_vm12, %v6592_v3, %v6627_v47  ;;  %v1451_v27 = vsel %vm1323_vm13, %v1259_v25, %v1387_v38 }
 0x2c7   : > { %8861 = vst [vmem:[#allocation48_spill] sm:$0xff] %v6747_v52  ;;  %1571 = vmax.xlane.f32.xlu0 %v1570_v16  ;;  %1580 = vmax.xlane.f32.xlu1 %v1579_v23  ;;  %v1576_v63 = vmax.f32 %v6743_v39, %v6747_v52  ;;  %v8866_v5 = vunpack.c.l.bf16 %v6527_v45  ;;  %v8868_v15 = vunpack.c.h.bf16 %v6527_v45  ;;  %vm1329_vm15 = vcmp.gt.f32.partialorder %v6667_v7, 0.0 }
 0x2c8   : > { %8863 = vst [vmem:[#allocation49_spill] sm:$0xff] %v6752_v4  ;;  %8865 = vst [vmem:[#allocation50_spill] sm:$0xff] %v6756_v32  ;;  %v1585_v58 = vmax.f32 %v6752_v4, %v6756_v32  ;;  %v1456_v59 = vsel %vm1328_vm14, %v6605_v31, %v6638_v34  ;;  %v1457_v25 = vsel %vm1329_vm15, %v6667_v7, %v1393_v20  ;;  %vm1326_vm0 = vcmp.gt.f32.partialorder %v6601_v6, 0.0 }
 0x2c9   : > { %v6768_v36 = vadd.f32 %v1450_v53, %v8866_v5  ;;  %v6772_v13 = vadd.f32 %v1451_v27, %v8868_v15  ;;  %vm1327_vm2 = vcmp.gt.f32.partialorder %v6663_v46, 0.0  ;;  %v8870_v47 = vunpack.c.l.bf16 %v6534_v48  ;;  %v8891_v27 = vld [vmem:[#allocation42_spill] sm:$0xff] }
 0x2ca   : > { %v8872_v12 = vunpack.c.h.bf16 %v6534_v48  ;;  %vm1332_vm3 = vcmp.gt.f32.partialorder %v6614_v1, 0.0  ;;  %v1454_v20 = vsel %vm1326_vm0, %v6601_v6, %v6635_v29  ;;  %v1455_v34 = vsel %vm1327_vm2, %v6663_v46, %v1391_v21  ;;  %v8923_v48 = vld [vmem:[#allocation15_spill] sm:$0xff] }
 0x2cb   : > { %8867 = vst [vmem:[#allocation51_spill] sm:$0xff] %v6768_v36  ;;  %8869 = vst [vmem:[#allocation52_spill] sm:$0xff] %v6772_v13  ;;  %1577 = vmax.xlane.f32.xlu0 %v1576_v63  ;;  %1586 = vmax.xlane.f32.xlu1 %v1585_v58  ;;  %v1582_v38 = vmax.f32 %v6768_v36, %v6772_v13  ;;  %v6784_v3 = vadd.f32 %v1456_v59, %v8870_v47  ;;  %vm1333_vm4 = vcmp.gt.f32.partialorder %v6678_v26, 0.0  ;;  %v6873_v47 = vld [vmem:[%s8630_s1 + $0x68] sm:$0xff] }
 0x2cc   : > { %v6788_v16 = vadd.f32 %v1457_v25, %v8872_v12  ;;  %v1460_v31 = vsel %vm1332_vm3, %v6614_v1, %v6670_v10  ;;  %v8874_v23 = vunpack.c.l.bf16 %v6539_v49  ;;  %v8876_v28 = vunpack.c.h.bf16 %v6539_v49  ;;  %v6878_v12 = vld [vmem:[%s8630_s1 + $0x60] sm:$0xff] }
 0x2cd   : > { %8871 = vst [vmem:[#allocation53_spill] sm:$0xff] %v6784_v3  ;;  %v1461_v29 = vsel %vm1333_vm4, %v6678_v26, %v1397_v8  ;;  %v8878_v21 = vunpack.c.l.bf16 %v6550_v54  ;;  %v8880_v46 = vunpack.c.h.bf16 %v6550_v54  ;;  %vm1330_vm5 = vcmp.gt.f32.partialorder %v6610_v57, 0.0  ;;  %8897 = vst [vmem:[#allocation64_spill] sm:$0xff] %v6878_v12  ;;  %v8922_v54 = vld [vmem:[#allocation18_spill] sm:$0xff] }
 0x2ce   : > { %8873 = vst [vmem:[#allocation54_spill] sm:$0xff] %v6788_v16  ;;  %v1591_v7 = vmax.f32 %v6784_v3, %v6788_v16  ;;  %v6801_v0 = vadd.f32 %v1454_v20, %v8874_v23  ;;  %v6805_v30 = vadd.f32 %v1455_v34, %v8876_v28  ;;  %vm1331_vm6 = vcmp.gt.f32.partialorder %v6674_v24, 0.0  ;;  %v6883_v20 = vld [vmem:[%s8630_s1 + $0x80] sm:$0xff]  ;;  %v6888_v34 = vld [vmem:[%s8630_s1 + $0x70] sm:$0xff]  ;;  %v6908_v28 = vld [vmem:[%s8630_s1 + $0x88] sm:$0xff] }
 0x2cf   : > { %v6810_v6 = vadd.f32 %v1460_v31, %v8878_v21  ;;  %v6814_v1 = vadd.f32 %v1461_v29, %v8880_v46  ;;  %v1399_v10 = vmul.f32 0.2, %v6704_v22  ;;  %1583 = vmax.xlane.f32.xlu0 %v1582_v38  ;;  %v1459_v26 = vsel %vm1331_vm6, %v6674_v24, %v6707_v17  ;;  %8898 = vst [vmem:[#allocation65_spill] sm:$0xff] %v6883_v20  ;;  %v6893_v31 = vld [vmem:[%s8630_s1 + $0x90] sm:$0xff]  ;;  %v6903_v23 = vld [vmem:[%s8630_s1 + $0xa0] sm:$0xff]  ;;  %v6918_v21 = vld [vmem:[%s8630_s1 + $0x98] sm:$0xff] }
 0x2d0   : > { %8875 = vst [vmem:[#allocation55_spill] sm:$0xff] %v6801_v0  ;;  %8877 = vst [vmem:[#allocation56_spill] sm:$0xff] %v6805_v30  ;;  %1592 = vmax.xlane.f32.xlu1 %v1591_v7  ;;  %v1588_v50 = vmax.f32 %v6801_v0, %v6805_v30  ;;  %vm1336_vm7 = vcmp.gt.f32.partialorder %v6631_v35, 0.0  ;;  %v1458_v61 = vsel %vm1330_vm5, %v6610_v57, %v6645_v56  ;;  %v8882_v33 = vunpack.c.h.bf16 %v6555_v55  ;;  %v6898_v7 = vld [vmem:[%s8630_s1 + $0x78] sm:$0xff]  ;;  %v6913_v29 = vld [vmem:[%s8630_s1 + $0xb0] sm:$0xff] }
 0x2d1   : > { %8879 = vst [vmem:[#allocation57_spill] sm:$0xff] %v6810_v6  ;;  %8881 = vst [vmem:[#allocation58_spill] sm:$0xff] %v6814_v1  ;;  %v1597_v8 = vmax.f32 %v6810_v6, %v6814_v1  ;;  %vm1337_vm8 = vcmp.gt.f32.partialorder %v6682_v11, 0.0  ;;  %v1464_v51 = vsel %vm1336_vm7, %v6631_v35, %v6695_v14  ;;  %vm1334_vm9 = vcmp.gt.f32.partialorder %v6618_v60, 0.0  ;;  %v8890_v14 = vld [vmem:[#allocation41_spill] sm:$0xff]  ;;  %v8930_v0 = vld [vmem:[#allocation23_spill] sm:$0xff] }
 0x2d2   : > { %v6830_v40 = vadd.f32 %v1459_v26, %v8882_v33  ;;  %v1465_v17 = vsel %vm1337_vm8, %v6682_v11, %v6711_v62  ;;  %vm1335_vm10 = vcmp.gt.f32.partialorder %v6704_v22, 0.0  ;;  %v8884_v24 = vunpack.c.h.bf16 %v6573_v37  ;;  %8899 = vst [vmem:[#allocation66_spill] sm:$0xff] %v6888_v34  ;;  %8900 = vst [vmem:[#allocation67_spill] sm:$0xff] %v6893_v31  ;;  %v8906_v46 = vld [vmem:[#allocation5_spill] sm:$0xff]  ;;  %v6933_v33 = vld [vmem:[%s8630_s1 + $0xa8] sm:$0xff] }
 0x2d3   : > { %1589 = vmax.xlane.f32.xlu0 %v1588_v50  ;;  %v8886_v57 = vunpack.c.l.bf16 %v6555_v55  ;;  %v8888_v53 = vunpack.c.l.bf16 %v6573_v37  ;;  %v8674_v11 = vunpack.c.l.bf16 %v8890_v14  ;;  %v1463_v62 = vsel %vm1335_vm10, %v6704_v22, %v1399_v10  ;;  %8901 = vst [vmem:[#allocation68_spill] sm:$0xff] %v6898_v7  ;;  %8902 = vst [vmem:[#allocation69_spill] sm:$0xff] %v6903_v23  ;;  %v8912_v26 = vld [vmem:[#allocation9_spill] sm:$0xff] }
 0x2d4   : > { %8883 = vst [vmem:[#allocation59_spill] sm:$0xff] %v6830_v40  ;;  %v6841_v63 = vadd.f32 %v1465_v17, %v8884_v24  ;;  %1598 = vmax.xlane.f32.xlu1 %v1597_v8  ;;  %v1462_v58 = vsel %vm1334_vm9, %v6618_v60, %v8891_v27  ;;  %v8892_v59 = vunpack.c.h.bf16 %v8890_v14  ;;  %v8895_v60 = vld [vmem:[#allocation6_spill] sm:$0xff]  ;;  %8903 = vst [vmem:[#allocation70_spill] sm:$0xff] %v6908_v28  ;;  %v8917_v24 = vld [vmem:[#allocation13_spill] sm:$0xff] }
 0x2d5   : > { %v6845_v56 = vadd.f32 %v1458_v61, %v8886_v57  ;;  %v6849_v35 = vadd.f32 %v1464_v51, %v8888_v53  ;;  %v6865_v38 = vadd.f32 %v1462_v58, %v8674_v11  ;;  %8896 = vst [vmem:[#allocation6_spill] sm:$0xff] %v6873_v47  ;;  %8904 = vst [vmem:[#allocation71_spill] sm:$0xff] %v6913_v29  ;;  %v6928_v61 = vld [vmem:[%s8630_s1 + $0xc0] sm:$0xff]  ;;  %v6942_v53 = vld [vmem:[%s8630_s1 + $0xd0] sm:$0xff] }
 0x2d6   : > { %8885 = vst [vmem:[#allocation60_spill] sm:$0xff] %v6841_v63  ;;  %v6861_v25 = vadd.f32 %v1463_v62, %v8892_v59  ;;  %8905 = vst [vmem:[#allocation72_spill] sm:$0xff] %v6918_v21  ;;  %v6947_v62 = vld [vmem:[%s8630_s1 + $0xb8] sm:$0xff]  ;;  %v6956_v59 = vld [vmem:[%s8630_s1 + $0xe0] sm:$0xff] }
 0x2d7   : > { %8887 = vst [vmem:[#allocation61_spill] sm:$0xff] %v6845_v56  ;;  %8889 = vst [vmem:[#allocation62_spill] sm:$0xff] %v6849_v35  ;;  %v1594_v5 = vmax.f32 %v6845_v56, %v6830_v40  ;;  %v1603_v15 = vmax.f32 %v6849_v35, %v6841_v63  ;;  %v8916_v11 = vld [vmem:[#allocation8_spill] sm:$0xff]  ;;  %v8918_v58 = vld [vmem:[#allocation14_spill] sm:$0xff] }
 0x2d8   : > { %8893 = vst [vmem:[#allocation42_spill] sm:$0xff] %v6861_v25  ;;  %8894 = vst [vmem:[#allocation63_spill] sm:$0xff] %v6865_v38  ;;  %v1600_v22 = vmax.f32 %v6865_v38, %v6861_v25  ;;  %v8919_v27 = vld [vmem:[#allocation11_spill] sm:$0xff]  ;;  %v8920_v8 = vld [vmem:[#allocation12_spill] sm:$0xff] }
 0x2d9   : > { %1595 = vmax.xlane.f32.xlu0 %v1594_v5  ;;  %1604 = vmax.xlane.f32.xlu1 %v1603_v15  ;;  %8907 = vst [vmem:[#allocation5_spill] sm:$0xff] %v6928_v61  ;;  %8908 = vst [vmem:[#allocation73_spill] sm:$0xff] %v6933_v33  ;;  %v8913_v5 = vld [vmem:[#allocation27_spill] sm:$0xff]  ;;  %v8914_v15 = vld [vmem:[#allocation10_spill] sm:$0xff] }
 0x2da   : > { %8909 = vst [vmem:[#allocation74_spill] sm:$0xff] %v6942_v53  ;;  %8910 = vst [vmem:[#allocation75_spill] sm:$0xff] %v6947_v62  ;;  %v6976_v50 = vadd.f32 %v8913_v5, %v8912_v26  ;;  %v1276_v17 = vadd.f32 %v8913_v5, %v8914_v15  ;;  %v6988_v57 = vadd.f32 %v8913_v5, %v8916_v11  ;;  %v8921_v37 = vld [vmem:[#allocation17_spill] sm:$0xff]  ;;  %v8926_v38 = vld [vmem:[#allocation35_spill] sm:$0xff] }
 0x2db   : > { %8911 = vst [vmem:[#allocation76_spill] sm:$0xff] %v6956_v59  ;;  %v6996_v10 = vadd.f32 %v8913_v5, %v8918_v58  ;;  %v7000_v51 = vadd.f32 %v8913_v5, %v8919_v27  ;;  %v7004_v14 = vadd.f32 %v8913_v5, %v8920_v8  ;;  %v7008_v55 = vadd.f32 %v8913_v5, %v8921_v37  ;;  %v8927_v25 = vld [vmem:[#allocation22_spill] sm:$0xff]  ;;  %v8929_v56 = vld [vmem:[#allocation19_spill] sm:$0xff] }
 0x2dc   : > { %v7012_v49 = vadd.f32 %v8913_v5, %v8922_v54  ;;  %v7016_v45 = vadd.f32 %v8913_v5, %v8923_v48  ;;  %v7020_v43 = vadd.f32 %v8913_v5, %v8924_v44  ;;  %v7024_v41 = vadd.f32 %v8913_v5, %v8925_v42 }
 0x2dd   : > { %1601 = vmax.xlane.f32.xlu0 %v1600_v22  ;;  %v6992_v22 = vadd.f32 %v8913_v5, %v8917_v24  ;;  %v1277_v35 = vadd.f32 %v8926_v38, %v8914_v15  ;;  %v7030_v63 = vadd.f32 %v8913_v5, %v8927_v25  ;;  %v7034_v6 = vadd.f32 %v8913_v5, %v8929_v56 }
 0x2de   : > { %v1402_v40 = vmul.f32 0.2, %v6976_v50  ;;  %v1404_v1 = vmul.f32 0.2, %v1276_v17  ;;  %v7039_v3 = vadd.f32 %v8913_v5, %v8930_v0  ;;  %v7045_v15 = vmul.f32 0.2, %v6988_v57 }
 0x2df   : > { %8928 = vst [vmem:[#allocation9_spill] sm:$0xff] %v7030_v63  ;;  %v1410_v16 = vmul.f32 0.2, %v6992_v22  ;;  %v1275_v36 = vadd.f32 %v8926_v38, %v8912_v26  ;;  %v7054_v13 = vadd.f32 %v8926_v38, %v8916_v11  ;;  %v1283_v32 = vadd.f32 %v8926_v38, %v8917_v24 }
 0x2e0   : > { %v7060_v52 = vadd.f32 %v8926_v38, %v8918_v58  ;;  %v1287_v39 = vadd.f32 %v8926_v38, %v8919_v27  ;;  %v7066_v26 = vadd.f32 %v8926_v38, %v8920_v8  ;;  %v1405_v2 = vmul.f32 0.2, %v1277_v35  ;;  %v8932_v58 = vld [vmem:[#allocation20_spill] sm:$0xff] }
 0x2e1   : > { %v7074_v11 = vadd.f32 %v8926_v38, %v8922_v54  ;;  %v7078_v24 = vadd.f32 %v8926_v38, %v8923_v48  ;;  %vm1341_vm11 = vcmp.gt.f32.partialorder %v1277_v35, 0.0  ;;  %v7082_v27 = vadd.f32 %v8926_v38, %v8924_v44 }
 0x2e2   : > { %v7086_v8 = vadd.f32 %v8926_v38, %v8925_v42  ;;  %v7094_v54 = vadd.f32 %v8926_v38, %v8929_v56  ;;  %v7098_v48 = vadd.f32 %v8926_v38, %v8932_v58  ;;  %v7101_v9 = vmul.f32 0.2, %v6996_v10 }
 0x2e3   : > { %v1403_v44 = vmul.f32 0.2, %v1275_v36  ;;  %vm1340_vm12 = vcmp.gt.f32.partialorder %v1276_v17, 0.0  ;;  %v1414_v42 = vmul.f32 0.2, %v7000_v51  ;;  %v1469_v19 = vsel %vm1341_vm11, %v1277_v35, %v1405_v2 }
 0x2e4   : > { %v1411_v18 = vmul.f32 0.2, %v1283_v32  ;;  %vm1339_vm13 = vcmp.gt.f32.partialorder %v1275_v36, 0.0  ;;  %v7109_v56 = vmul.f32 0.2, %v7004_v14  ;;  %vm1347_vm14 = vcmp.gt.f32.partialorder %v1283_v32, 0.0 }
 0x2e5   : > { %v1418_v59 = vmul.f32 0.2, %v7008_v55  ;;  %v7116_v62 = vmul.f32 0.2, %v7016_v45  ;;  %v1468_v63 = vsel %vm1340_vm12, %v1276_v17, %v1404_v1  ;;  %vm1338_vm15 = vcmp.gt.f32.partialorder %v6976_v50, 0.0 }
 0x2e6   : > { %v8934_v35 = vunpack.c.h.bf16 %v6873_v47  ;;  %vm1346_vm0 = vcmp.gt.f32.partialorder %v6992_v22, 0.0  ;;  %v1415_v58 = vmul.f32 0.2, %v1287_v39  ;;  %v7128_v53 = vmul.f32 0.2, %v7024_v41 }
 0x2e7   : > { %v8935_v1 = vunpack.c.l.bf16 %v6873_v47  ;;  %v1466_v33 = vsel %vm1338_vm15, %v6976_v50, %v1402_v40  ;;  %vm1351_vm3 = vcmp.gt.f32.partialorder %v1287_v39, 0.0  ;;  %vm1350_vm5 = vcmp.gt.f32.partialorder %v7000_v51, 0.0 }
 0x2e8   : > { %v8938_v50 = vunpack.c.l.bf16 %v6878_v12  ;;  %vm1345_vm6 = vcmp.gt.f32.partialorder %v7054_v13, 0.0  ;;  %vm1344_vm8 = vcmp.gt.f32.partialorder %v6988_v57, 0.0  ;;  %vm1354_vm9 = vcmp.gt.f32.partialorder %v7008_v55, 0.0 }
 0x2e9   : > { %v7132_v17 = vadd.f32 %v1468_v63, %v8935_v1  ;;  %vm1349_vm10 = vcmp.gt.f32.partialorder %v7060_v52, 0.0  ;;  %vm1359_vm11 = vcmp.gt.f32.partialorder %v7078_v24, 0.0  ;;  %vm1348_vm12 = vcmp.gt.f32.partialorder %v6996_v10, 0.0 }
 0x2ea   : > { %1239 = vperm.xlu1 %5694, %v8895_v60   ;;  %v8915_v60 = vld [vmem:[#allocation7_spill] sm:$0xff]  ;;  %vm1363_vm15 = vcmp.gt.f32.partialorder %v7086_v8, 0.0 }
 0x2eb   : > { %v1279_v4 = vadd.f32 %v8926_v38, %v8915_v60  ;;  %8933 = vst [vmem:[#allocation7_spill] sm:$0xff] %v7098_v48  ;;  %v7113_v48 = vmul.f32 0.2, %v7012_v49 }
 0x2ed   : > { %v1407_v2 = vmul.f32 0.2, %v1279_v4  ;;  %vm1343_vm2 = vcmp.gt.f32.partialorder %v1279_v4, 0.0 }
 0x2ef   : > { %v1471_v1 = vsel %vm1343_vm2, %v1279_v4, %v1407_v2  ;;  %vm1362_vm2 = vcmp.gt.f32.partialorder %v7024_v41, 0.0 }
 0x2f3   : > { %1234 = vperm.xlu0 %5695, %v8906_v46   ;;  %v6984_v46 = vadd.f32 %v8913_v5, %v8915_v60  ;;  %v7070_v60 = vadd.f32 %v8926_v38, %v8921_v37  ;;  %v7090_v37 = vadd.f32 %v8926_v38, %v8927_v25  ;;  %v7106_v25 = vadd.f32 %v8926_v38, %v8930_v0 }
 0x2f4   : > { %v7121_v0 = vadd.f32 %v1469_v19, %v8934_v35  ;;  %v1467_v38 = vsel %vm1339_vm13, %v1275_v36, %v1403_v44  ;;  %v7125_v5 = vmul.f32 0.2, %v7020_v43  ;;  %v1409_v19 = vmul.f32 0.2, %v7054_v13 }
 0x2f5   : > { %v7042_v30 = vmul.f32 0.2, %v6984_v46  ;;  %8931 = vst [vmem:[#allocation10_spill] sm:$0xff] %v7090_v37  ;;  %v1475_v37 = vsel %vm1347_vm14, %v1283_v32, %v1411_v18  ;;  %v8936_v36 = vunpack.c.h.bf16 %v6878_v12  ;;  %v1474_v35 = vsel %vm1346_vm0, %v6992_v22, %v1410_v16 }
 0x2f6   : > { %vm1342_vm4 = vcmp.gt.f32.partialorder %v6984_v46, 0.0  ;;  %v1609_v18 = vmax.f32 %v7132_v17, %v7121_v0  ;;  %v8937_v32 = vunpack.c.h.bf16 %v6883_v20  ;;  %v1419_v40 = vmul.f32 0.2, %v7070_v60 }
 0x2f7   : > { %v7138_v44 = vadd.f32 %v1467_v38, %v8936_v36  ;;  %v7152_v38 = vadd.f32 %v1466_v33, %v8938_v50  ;;  %v1479_v36 = vsel %vm1351_vm3, %v1287_v39, %v1415_v58  ;;  %v1413_v16 = vmul.f32 0.2, %v7060_v52 }
 0x2f8   : > { %v7146_v63 = vadd.f32 %v1475_v37, %v8937_v32  ;;  %v8939_v22 = vunpack.c.l.bf16 %v6883_v20  ;;  %v1470_v4 = vsel %vm1342_vm4, %v6984_v46, %v7042_v30  ;;  %vm1355_vm7 = vcmp.gt.f32.partialorder %v7070_v60, 0.0 }
 0x2f9   : > { %v1606_v37 = vmax.f32 %v7152_v38, %v7138_v44  ;;  %v8940_v33 = vunpack.c.h.bf16 %v6888_v34  ;;  %v1478_v58 = vsel %vm1350_vm5, %v7000_v51, %v1414_v42  ;;  %v1473_v30 = vsel %vm1345_vm6, %v7054_v13, %v1409_v19 }
 0x2fa   : > { %v7158_v47 = vadd.f32 %v1474_v35, %v8939_v22  ;;  %v8941_v35 = vunpack.c.h.bf16 %v6893_v31  ;;  %v1423_v46 = vmul.f32 0.2, %v7078_v24  ;;  %v8942_v32 = vunpack.c.l.bf16 %v6888_v34 }
 0x2fb   : > { %v7167_v39 = vadd.f32 %v1471_v1, %v8940_v33  ;;  %v1483_v51 = vsel %vm1355_vm7, %v7070_v60, %v1419_v40  ;;  %v1417_v42 = vmul.f32 0.2, %v7066_v26  ;;  %v8943_v50 = vunpack.c.l.bf16 %v6893_v31 }
 0x2fc   : > { %v1618_v2 = vmax.f32 %v7158_v47, %v7146_v63  ;;  %v7182_v1 = vadd.f32 %v1470_v4, %v8942_v32  ;;  %v1472_v13 = vsel %vm1344_vm8, %v6988_v57, %v7045_v15  ;;  %v8944_v60 = vunpack.c.h.bf16 %v6898_v7 }
 0x2fd   : > { %v1482_v22 = vsel %vm1354_vm9, %v7008_v55, %v1418_v59  ;;  %v1477_v57 = vsel %vm1349_vm10, %v7060_v52, %v1413_v16  ;;  %vm1358_vm13 = vcmp.gt.f32.partialorder %v7016_v45, 0.0  ;;  %v1427_v15 = vmul.f32 0.2, %v7086_v8 }
 0x2fe   : > { %v1612_v19 = vmax.f32 %v7182_v1, %v7167_v39  ;;  %v7198_v40 = vadd.f32 %v1473_v30, %v8944_v60  ;;  %v1487_v55 = vsel %vm1359_vm11, %v7078_v24, %v1423_v46  ;;  %vm1353_vm14 = vcmp.gt.f32.partialorder %v7066_v26, 0.0 }
 0x2ff   : > { %v1421_v59 = vmul.f32 0.2, %v7074_v11  ;;  %v1476_v52 = vsel %vm1348_vm12, %v6996_v10, %v7101_v9  ;;  %v8948_v24 = vunpack.c.h.bf16 %v6908_v28  ;;  %v1486_v32 = vsel %vm1358_vm13, %v7016_v45, %v7116_v62 }
 0x300   : > { %vm1352_vm0 = vcmp.gt.f32.partialorder %v7004_v14, 0.0  ;;  %v1481_v10 = vsel %vm1353_vm14, %v7066_v26, %v1417_v42  ;;  %v1491_v45 = vsel %vm1363_vm15, %v7086_v8, %v1427_v15  ;;  %vm1357_vm3 = vcmp.gt.f32.partialorder %v7074_v11, 0.0 }
 0x301   : > { %v7229_v46 = vadd.f32 %v1477_v57, %v8948_v24  ;;  %v1430_v62 = vmul.f32 0.2, %v7034_v6  ;;  %v1480_v26 = vsel %vm1352_vm0, %v7004_v14, %v7109_v56  ;;  %vm1367_vm4 = vcmp.gt.f32.partialorder %v7094_v54, 0.0 }
 0x302   : > { %v8952_v8 = vunpack.c.h.bf16 %v6918_v21  ;;  %v1490_v57 = vsel %vm1362_vm2, %v7024_v41, %v7128_v53  ;;  %vm1356_vm5 = vcmp.gt.f32.partialorder %v7012_v49, 0.0  ;;  %v1485_v56 = vsel %vm1357_vm3, %v7074_v11, %v1421_v59 }
 0x303   : > { %vm1366_vm6 = vcmp.gt.f32.partialorder %v7034_v6, 0.0  ;;  %v1484_v11 = vsel %vm1356_vm5, %v7012_v49, %v7113_v48  ;;  %vm1361_vm7 = vcmp.gt.f32.partialorder %v7082_v27, 0.0  ;;  %vm1371_vm8 = vcmp.gt.f32.partialorder %v7106_v25, 0.0 }
 0x304   : > { %v1434_v59 = vmul.f32 0.2, %v7039_v3  ;;  %vm1360_vm9 = vcmp.gt.f32.partialorder %v7020_v43, 0.0  ;;  %vm1370_vm10 = vcmp.gt.f32.partialorder %v7039_v3, 0.0 }
 0x30e   : > { %1610 = vmax.xlane.f32.xlu1 %v1609_v18  ;;  %v7175_v18 = vadd.f32 %v1479_v36, %v8941_v35  ;;  %v7189_v36 = vadd.f32 %v1478_v58, %v8943_v50  ;;  %v8946_v58 = vunpack.c.l.bf16 %v6898_v7  ;;  %v8947_v35 = vunpack.c.l.bf16 %v6903_v23 }
 0x30f   : > { %v8949_v50 = vunpack.c.h.bf16 %v6913_v29 }
 0x310   : > { %v1624_v4 = vmax.f32 %v7189_v36, %v7175_v18  ;;  %v7220_v30 = vadd.f32 %v1482_v22, %v8947_v35  ;;  %v8951_v22 = vunpack.c.l.bf16 %v6913_v29  ;;  %v1435_v35 = vmul.f32 0.2, %v7106_v25 }
 0x311   : > { %v7238_v9 = vadd.f32 %v1487_v55, %v8949_v50  ;;  %v1425_v55 = vmul.f32 0.2, %v7082_v27 }
 0x312   : > { %1607 = vmax.xlane.f32.xlu0 %v1606_v37  ;;  %1619 = vmax.xlane.f32.xlu1 %v1618_v2  ;;  %v8945_v37 = vunpack.c.h.bf16 %v6903_v23  ;;  %v7213_v2 = vadd.f32 %v1472_v13, %v8946_v58  ;;  %v1431_v13 = vmul.f32 0.2, %v7094_v54  ;;  %v8953_v58 = vunpack.c.h.bf16 %v6928_v61  ;;  %v8996_v23 = vld [vmem:[#allocation45_spill] sm:$0xff] }
 0x314   : > { %v7206_v33 = vadd.f32 %v1483_v51, %v8945_v37  ;;  %v1615_v16 = vmax.f32 %v7213_v2, %v7198_v40  ;;  %v7261_v37 = vadd.f32 %v1481_v10, %v8952_v8  ;;  %v7270_v14 = vadd.f32 %v1491_v45, %v8953_v58  ;;  %v8960_v45 = vld [vmem:[#allocation10_spill] sm:$0xff] }
 0x315   : > { %v1495_v53 = vsel %vm1367_vm4, %v7094_v54, %v1431_v13  ;;  %v1494_v10 = vsel %vm1366_vm6, %v7034_v6, %v1430_v62  ;;  %v1489_v8 = vsel %vm1361_vm7, %v7082_v27, %v1425_v55  ;;  %v1499_v6 = vsel %vm1371_vm8, %v7106_v25, %v1435_v35  ;;  %v7315_v62 = vld [vmem:[%s8630_s1 + $0xc8] sm:$0xff]  ;;  %v8966_v27 = vld [vmem:[#allocation9_spill] sm:$0xff] }
 0x316   : > { %1613 = vmax.xlane.f32.xlu0 %v1612_v19  ;;  %1625 = vmax.xlane.f32.xlu1 %v1624_v4  ;;  %v1630_v51 = vmax.f32 %v7220_v30, %v7206_v33  ;;  %v8950_v19 = vunpack.c.l.bf16 %v6908_v28  ;;  %v7252_v4 = vadd.f32 %v1486_v32, %v8951_v22  ;;  %v1429_v22 = vmul.f32 0.2, %v8960_v45  ;;  %8962 = vst [vmem:[#allocation8_spill] sm:$0xff] %v7315_v62 }
 0x317   : > { %vm1365_vm11 = vcmp.gt.f32.partialorder %v8960_v45, 0.0  ;;  %v1428_v25 = vmul.f32 0.2, %v8966_v27  ;;  %v1488_v35 = vsel %vm1360_vm9, %v7020_v43, %v7125_v5  ;;  %vm1364_vm12 = vcmp.gt.f32.partialorder %v8966_v27, 0.0 }
 0x318   : > { %v7245_v60 = vadd.f32 %v1476_v52, %v8950_v19  ;;  %v1636_v15 = vmax.f32 %v7252_v4, %v7238_v9  ;;  %v8954_v52 = vunpack.c.l.bf16 %v6918_v21  ;;  %v8958_v19 = vld [vmem:[#allocation74_spill] sm:$0xff] }
 0x319   : > { %v8959_v49 = vunpack.c.h.bf16 %v8958_v19 }
 0x31a   : > { %1616 = vmax.xlane.f32.xlu0 %v1615_v16  ;;  %1631 = vmax.xlane.f32.xlu1 %v1630_v51  ;;  %v1621_v42 = vmax.f32 %v7245_v60, %v7229_v46  ;;  %v7278_v41 = vadd.f32 %v1480_v26, %v8954_v52  ;;  %v8955_v16 = vunpack.c.l.bf16 %v6928_v61  ;;  %v8956_v51 = vld [vmem:[#allocation73_spill] sm:$0xff] }
 0x31b   : > { %v8957_v54 = vunpack.c.h.bf16 %v8956_v51  ;;  %v7301_v48 = vadd.f32 %v1495_v53, %v8959_v49  ;;  %v8961_v26 = vunpack.c.l.bf16 %v8956_v51 }
 0x31c   : > { %v7283_v24 = vadd.f32 %v1490_v57, %v8955_v16  ;;  %v1627_v32 = vmax.f32 %v7278_v41, %v7261_v37  ;;  %v8963_v57 = vld [vmem:[#allocation20_spill] sm:$0xff]  ;;  %v1498_v16 = vsel %vm1370_vm10, %v7039_v3, %v1434_v59  ;;  %v1493_v3 = vsel %vm1365_vm11, %v8960_v45, %v1429_v22 }
 0x31d   : > { %v7294_v50 = vadd.f32 %v1485_v56, %v8957_v54  ;;  %v8965_v56 = vunpack.c.l.bf16 %v8958_v19  ;;  %v8975_v19 = vld [vmem:[#allocation7_spill] sm:$0xff] }
 0x31e   : > { %1622 = vmax.xlane.f32.xlu0 %v1621_v42  ;;  %1637 = vmax.xlane.f32.xlu1 %v1636_v15  ;;  %v1642_v13 = vmax.f32 %v7283_v24, %v7270_v14  ;;  %v7308_v42 = vadd.f32 %v1484_v11, %v8961_v26  ;;  %v8964_v15 = vld [vmem:[#allocation27_spill] sm:$0xff]  ;;  %v1433_v43 = vmul.f32 0.2, %v8975_v19  ;;  %vm1369_vm13 = vcmp.gt.f32.partialorder %v8975_v19, 0.0 }
 0x31f   : > { %v1304_v58 = vadd.f32 %v8964_v15, %v8963_v57  ;;  %v7321_v52 = vadd.f32 %v1494_v10, %v8965_v56  ;;  %v8973_v57 = vld [vmem:[#allocation24_spill] sm:$0xff]  ;;  %v8974_v56 = vld [vmem:[#allocation35_spill] sm:$0xff] }
 0x320   : > { %v1633_v55 = vmax.f32 %v7308_v42, %v7294_v50  ;;  %v1309_v53 = vadd.f32 %v8974_v56, %v8973_v57  ;;  %v1308_v45 = vadd.f32 %v8964_v15, %v8973_v57 }
 0x321   : > { %v1648_v11 = vmax.f32 %v7321_v52, %v7301_v48  ;;  %v1432_v22 = vmul.f32 0.2, %v1304_v58  ;;  %vm1368_vm14 = vcmp.gt.f32.partialorder %v1304_v58, 0.0 }
 0x322   : > { %1628 = vmax.xlane.f32.xlu0 %v1627_v32  ;;  %1643 = vmax.xlane.f32.xlu1 %v1642_v13  ;;  %v8967_v32 = vld [vmem:[#allocation75_spill] sm:$0xff]  ;;  %v8970_v13 = vld [vmem:[#allocation76_spill] sm:$0xff]  ;;  %vm1373_vm15 = vcmp.gt.f32.partialorder %v1309_v53, 0.0  ;;  %vm1372_vm0 = vcmp.gt.f32.partialorder %v1308_v45, 0.0 }
 0x323   : > { %v8968_v54 = vunpack.c.h.bf16 %v8967_v32  ;;  %v8971_v49 = vunpack.c.h.bf16 %v8970_v13  ;;  %v8976_v5 = vunpack.c.l.bf16 %v8967_v32  ;;  %v1496_v32 = vsel %vm1368_vm14, %v1304_v58, %v1432_v22 }
 0x325   : > { %v7335_v10 = vadd.f32 %v1489_v8, %v8968_v54  ;;  %v7339_v26 = vadd.f32 %v1499_v6, %v8971_v49  ;;  %v7348_v59 = vadd.f32 %v1488_v35, %v8976_v5  ;;  %v8978_v8 = vunpack.c.l.bf16 %v8970_v13  ;;  %v7358_v49 = vld [vmem:[%s8630_s1 + $0xd8] sm:$0xff] }
 0x326   : > { %1634 = vmax.xlane.f32.xlu0 %v1633_v55  ;;  %1649 = vmax.xlane.f32.xlu1 %v1648_v11  ;;  %8980 = vst [vmem:[#allocation17_spill] sm:$0xff] %v7358_v49  ;;  %v1492_v55 = vsel %vm1364_vm12, %v8966_v27, %v1428_v25  ;;  %v8981_v5 = vunpack.c.h.bf16 %v7315_v62  ;;  %v1437_v6 = vmul.f32 0.2, %v1309_v53  ;;  %v1497_v13 = vsel %vm1369_vm13, %v8975_v19, %v1433_v43 }
 0x327   : > { %8969 = vst [vmem:[#allocation13_spill] sm:$0xff] %v7335_v10  ;;  %8972 = vst [vmem:[#allocation14_spill] sm:$0xff] %v7339_v26  ;;  %v7352_v54 = vadd.f32 %v1498_v16, %v8978_v8  ;;  %v1639_v16 = vmax.f32 %v7348_v59, %v7335_v10  ;;  %v8983_v27 = vunpack.c.l.bf16 %v7315_v62  ;;  %v8738_v57 = vunpack.c.l.bf16 %v7358_v49  ;;  %v9017_v10 = vld [vmem:[#allocation60_spill] sm:$0xff] }
 0x328   : > { %8977 = vst [vmem:[#allocation11_spill] sm:$0xff] %v7348_v59  ;;  %v7371_v8 = vadd.f32 %v1493_v3, %v8981_v5  ;;  %v1436_v35 = vmul.f32 0.2, %v1308_v45  ;;  %v7382_v3 = vld [vmem:[%s8630_s1 + $0xe8] sm:$0xff]  ;;  %v8986_v19 = vunpack.c.h.bf16 %v7358_v49 }
 0x329   : > { %8979 = vst [vmem:[#allocation12_spill] sm:$0xff] %v7352_v54  ;;  %v1654_v11 = vmax.f32 %v7352_v54, %v7339_v26  ;;  %v7376_v25 = vadd.f32 %v1492_v55, %v8983_v27  ;;  %8985 = vst [vmem:[#allocation16_spill] sm:$0xff] %v7382_v3  ;;  %v8742_v55 = vunpack.c.h.bf16 %v7382_v3  ;;  %v7393_v58 = vadd.f32 %v1496_v32, %v8738_v57 }
 0x32a   : > { %8982 = vst [vmem:[#allocation18_spill] sm:$0xff] %v7371_v8  ;;  %1640 = vmax.xlane.f32.xlu0 %v1639_v16  ;;  %v7388_v43 = vadd.f32 %v1497_v13, %v8986_v19  ;;  %v1501_v16 = vsel %vm1373_vm15, %v1309_v53, %v1437_v6  ;;  %v8747_v22 = vunpack.c.l.bf16 %v7382_v3  ;;  %v8991_v6 = vld [vmem:[#allocation39_spill] sm:$0xff]  ;;  %v8995_v3 = vld [vmem:[#allocation46_spill] sm:$0xff] }
 0x32b   : > { %1655 = vmax.xlane.f32.xlu1 %v1654_v11  ;;  %8984 = vst [vmem:[#allocation15_spill] sm:$0xff] %v7376_v25  ;;  %v1645_v5 = vmax.f32 %v7376_v25, %v7371_v8  ;;  %8988 = vst [vmem:[#allocation22_spill] sm:$0xff] %v7393_v58  ;;  %v1500_v11 = vsel %vm1372_vm0, %v1308_v45, %v1436_v35  ;;  %v7400_v62 = vadd.f32 %v1501_v16, %v8742_v55  ;;  %v8992_v45 = vld [vmem:[#allocation40_spill] sm:$0xff]  ;;  %v8993_v16 = vld [vmem:[#allocation43_spill] sm:$0xff] }
 0x32c   : > { %8987 = vst [vmem:[#allocation21_spill] sm:$0xff] %v7388_v43  ;;  %v1651_v27 = vmax.f32 %v7393_v58, %v7388_v43  ;;  %v7404_v13 = vadd.f32 %v1500_v11, %v8747_v22 }
 0x32d   : > { %8989 = vst [vmem:[#allocation19_spill] sm:$0xff] %v7400_v62 }
 0x32e   : > { %1646 = vmax.xlane.f32.xlu0 %v1645_v5  ;;  %8990 = vst [vmem:[#allocation23_spill] sm:$0xff] %v7404_v13  ;;  %v1657_v53 = vmax.f32 %v7404_v13, %v7400_v62 }
 0x332   : > { %1652 = vmax.xlane.f32.xlu0 %v1651_v27  ;;  %v8994_v27 = vld [vmem:[#allocation44_spill] sm:$0xff] }
 0x336   : > { %1658 = vmax.xlane.f32.xlu0 %v1657_v53 }
 0x34d   : > { %v1575_v32 = vpop.xlane.xlu1 %1574 }
 0x34e   : > { %v1668_v5 = vsub.f32 %v8991_v6, %v1575_v32  ;;  %v1669_v35 = vsub.f32 %v8992_v45, %v1575_v32  ;;  %v8997_v32 = vld [vmem:[#allocation47_spill] sm:$0xff]  ;;  %v8998_v45 = vld [vmem:[#allocation48_spill] sm:$0xff] }
 0x350   : > { %v1734_v19 = vmul.f32 1.442695, %v1668_v5  ;;  %v1736_v57 = vmul.f32 1.442695, %v1669_v35 }
 0x352   : > { %5707 = vpow2.f32 %v1734_v19 }
 0x353   : > { %5709 = vpow2.f32 %v1736_v57  ;;  %v9001_v57 = vld [vmem:[#allocation49_spill] sm:$0xff] }
 0x354   : > { %v1572_v49 = vpop.xlane.xlu0 %1571  ;;  %v1581_v51 = vpop.xlane.xlu1 %1580 }
 0x355   : > { %v1666_v55 = vsub.f32 %v8993_v16, %v1572_v49  ;;  %v1667_v61 = vsub.f32 %v8994_v27, %v1572_v49  ;;  %v1673_v11 = vsub.f32 %v8995_v3, %v1581_v51  ;;  %v1672_v53 = vsub.f32 %v8996_v23, %v1581_v51  ;;  %v8999_v16 = vld [vmem:[#allocation50_spill] sm:$0xff]  ;;  %v9000_v23 = vld [vmem:[#allocation52_spill] sm:$0xff] }
 0x357   : > { %v1730_v22 = vmul.f32 1.442695, %v1666_v55  ;;  %v1732_v29 = vmul.f32 1.442695, %v1667_v61  ;;  %v1744_v31 = vmul.f32 1.442695, %v1673_v11 }
 0x358   : > { %v1578_v6 = vpop.xlane.xlu0 %1577  ;;  %v1587_v20 = vpop.xlane.xlu1 %1586  ;;  %v1742_v49 = vmul.f32 1.442695, %v1672_v53 }
 0x359   : > { %5711 = vpow2.f32 %v1730_v22  ;;  %v1670_v5 = vsub.f32 %v8997_v32, %v1578_v6  ;;  %v1671_v35 = vsub.f32 %v8998_v45, %v1578_v6  ;;  %v1677_v21 = vsub.f32 %v8999_v16, %v1587_v20  ;;  %v9002_v32 = vld [vmem:[#allocation51_spill] sm:$0xff] }
 0x35a   : > { %5713 = vpow2.f32 %v1732_v29  ;;  %v1676_v22 = vsub.f32 %v9001_v57, %v1587_v20 }
 0x35b   : > { %v1740_v27 = vmul.f32 1.442695, %v1671_v35  ;;  %5715 = vpow2.f32 %v1744_v31  ;;  %v1738_v3 = vmul.f32 1.442695, %v1670_v5  ;;  %v1752_v19 = vmul.f32 1.442695, %v1677_v21 }
 0x35c   : > { %v1584_v55 = vpop.xlane.xlu0 %1583  ;;  %v7422_v53 = vpop.eup %5707  ;;  %v9003_v31 = vld [vmem:[#allocation54_spill] sm:$0xff]  ;;  %v9004_v21 = vld [vmem:[#allocation56_spill] sm:$0xff]  ;;  %v1750_v20 = vmul.f32 1.442695, %v1676_v22 }
 0x35d   : > { %v1593_v61 = vpop.xlane.xlu1 %1592  ;;  %v1675_v51 = vsub.f32 %v9000_v23, %v1584_v55  ;;  %5717 = vpow2.f32 %v1740_v27  ;;  %v1674_v6 = vsub.f32 %v9002_v32, %v1584_v55  ;;  %v7425_v35 = vpop.eup %5709 }
 0x35e   : > { %5719 = vpow2.f32 %v1742_v49  ;;  %v1681_v5 = vsub.f32 %v9003_v31, %v1593_v61  ;;  %v9005_v31 = vld [vmem:[#allocation53_spill] sm:$0xff] }
 0x35f   : > { %v1748_v11 = vmul.f32 1.442695, %v1675_v51  ;;  %5721 = vpow2.f32 %v1738_v3  ;;  %v1746_v3 = vmul.f32 1.442695, %v1674_v6  ;;  %v1680_v22 = vsub.f32 %v9005_v31, %v1593_v61 }
 0x360   : > { %v1590_v29 = vpop.xlane.xlu0 %1589  ;;  %5723 = vpow2.f32 %v1752_v19  ;;  %v1760_v51 = vmul.f32 1.442695, %v1681_v5  ;;  %v7449_v5 = vld [vmem:[%s8630_s1 + $0xf8] sm:$0xff] }
 0x361   : > { %v7420_v45 = vpop.xlane.xlu1 %1598  ;;  %5725 = vpow2.f32 %v1748_v11  ;;  %v1679_v16 = vsub.f32 %v9004_v21, %v1590_v29  ;;  %v9006_v21 = vld [vmem:[#allocation55_spill] sm:$0xff]  ;;  %9007 = vst [vmem:[#allocation10_spill] sm:$0xff] %v7449_v5  ;;  %v1758_v12 = vmul.f32 1.442695, %v1680_v22  ;;  %v9012_v26 = vunpack.c.l.bf16 %v7449_v5 }
 0x362   : > { %5727 = vpow2.f32 %v1750_v20  ;;  %v1678_v28 = vsub.f32 %v9006_v21, %v1590_v29 }
 0x363   : > { %v7428_v49 = vpop.eup %5711  ;;  %v1756_v11 = vmul.f32 1.442695, %v1679_v16  ;;  %5729 = vpow2.f32 %v1746_v3  ;;  %v9008_v16 = vld [vmem:[#allocation58_spill] sm:$0xff]  ;;  %v9009_v3 = vld [vmem:[#allocation59_spill] sm:$0xff] }
 0x364   : > { %v7430_v27 = vpop.eup %5713  ;;  %v1954_v55 = vpack.c.bf16 %v7422_v53, %v7428_v49  ;;  %5731 = vpow2.f32 %v1760_v51  ;;  %v1685_v20 = vsub.f32 %v9008_v16, %v7420_v45  ;;  %v1754_v51 = vmul.f32 1.442695, %v1678_v28  ;;  %v7476_v28 = vld [vmem:[%s8630_s1 + $0xf0] sm:$0xff] }
 0x365   : > { %v1955_v19 = vpack.c.bf16 %v7425_v35, %v7430_v27  ;;  %v7438_v57 = vpop.eup %5715  ;;  %5733 = vpow2.f32 %v1756_v11  ;;  %9011 = vst [vmem:[#allocation20_spill] sm:$0xff] %v7476_v28 }
 0x366   : > { %v7434_v23 = vpop.xlane.xlu1 %1604  ;;  %v7440_v32 = vpop.xlane.xlu0 %1595  ;;  %5735 = vpow2.f32 %v1758_v12 }
 0x367   : > { %2018 = vmatprep.mubr.bf16.mxu0 %v1955_v19  ;;  %v7444_v6 = vpop.eup %5717  ;;  %5737 = vpow2.f32 %v1754_v51 }
 0x368   : > { %2019 = vmatmul.mubr.bf16.vlgmr.msra.gmra.mrb[32].mxu0 %v1954_v55  ;;  %v7451_v34 = vpop.eup %5719  ;;  %v1957_v61 = vpack.c.bf16 %v7438_v57, %v7444_v6  ;;  %v1683_v55 = vsub.f32 %v9009_v3, %v7440_v32  ;;  %v9010_v3 = vld [vmem:[#allocation57_spill] sm:$0xff] }
 0x369   : > { %v7457_v29 = vpop.eup %5721  ;;  %v1684_v8 = vsub.f32 %v9010_v3, %v7420_v45 }
 0x36a   : > { %v1240_v7 = vpop.permute.xlu1 %1239  ;;  %v7463_v21 = vpop.eup %5723  ;;  %2026 = vmatprep.mubr.bf16.mxu0 %v1957_v61  ;;  %v1764_v22 = vmul.f32 1.442695, %v1683_v55  ;;  %v1956_v61 = vpack.c.bf16 %v7451_v34, %v7457_v29  ;;  %v9016_v55 = vld [vmem:[#allocation61_spill] sm:$0xff] }
 0x36b   : > { %v1312_v19 = vadd.f32 %v8964_v15, %v1240_v7  ;;  %v1313_v31 = vadd.f32 %v8974_v56, %v1240_v7  ;;  %v7467_v13 = vpop.eup %5725  ;;  %v7469_v43 = vpop.xlane.xlu0 %1601  ;;  %v1768_v7 = vmul.f32 1.442695, %v1685_v20  ;;  %v9014_v20 = vunpack.c.h.bf16 %v7449_v5 }
 0x36c   : > { %v1959_v25 = vpack.c.bf16 %v7463_v21, %v7467_v13  ;;  %v1682_v54 = vsub.f32 %v9016_v55, %v7440_v32  ;;  %v9018_v32 = vld [vmem:[#allocation42_spill] sm:$0xff] }
 0x36d   : > { %v1440_v11 = vmul.f32 0.2, %v1312_v19  ;;  %v1441_v58 = vmul.f32 0.2, %v1313_v31  ;;  %vm1376_vm2 = vcmp.gt.f32.partialorder %v1312_v19, 0.0  ;;  %vm1377_vm3 = vcmp.gt.f32.partialorder %v1313_v31, 0.0 }
 0x36e   : > { %5739 = vpow2.f32 %v1768_v7 }
 0x36f   : > { %v1504_v62 = vsel %vm1376_vm2, %v1312_v19, %v1440_v11  ;;  %v1505_v16 = vsel %vm1377_vm3, %v1313_v31, %v1441_v58  ;;  %v1689_v19 = vsub.f32 %v9017_v10, %v7434_v23  ;;  %v5728_v31 = vpop.eup %5727  ;;  %v1766_v11 = vmul.f32 1.442695, %v1684_v8 }
 0x370   : > { %v7484_v45 = vadd.f32 %v1504_v62, %v9012_v26  ;;  %v7488_v3 = vadd.f32 %v1505_v16, %v9014_v20  ;;  %2027 = vmatmul.mubr.bf16.gmra.mrb[36].mxu0 %v1956_v61  ;;  %v5730_v16 = vpop.eup %5729  ;;  %5741 = vpow2.f32 %v1764_v22  ;;  %v1687_v10 = vsub.f32 %v9018_v32, %v7469_v43 }
 0x371   : > { %2034 = vmatprep.mubr.bf16.mxu0 %v1959_v25  ;;  %v5732_v20 = vpop.eup %5731  ;;  %v1762_v25 = vmul.f32 1.442695, %v1682_v54  ;;  %v1861_v8 = vadd.f32 %v7425_v35, %v7422_v53  ;;  %v9020_v61 = vunpack.c.l.bf16 %v7476_v28  ;;  %5743 = vpow2.f32 %v1766_v11 }
 0x372   : > { %9013 = vst [vmem:[#allocation27_spill] sm:$0xff] %v7484_v45  ;;  %9015 = vst [vmem:[#allocation9_spill] sm:$0xff] %v7488_v3  ;;  %v1235_v12 = vpop.permute.xlu0 %1234  ;;  %v1663_v51 = vmax.f32 %v7484_v45, %v7488_v3  ;;  %v1772_v32 = vmul.f32 1.442695, %v1687_v10  ;;  %v1958_v3 = vpack.c.bf16 %v5728_v31, %v5730_v16 }
 0x373   : > { %v1310_v62 = vadd.f32 %v8964_v15, %v1235_v12  ;;  %v1311_v26 = vadd.f32 %v8974_v56, %v1235_v12  ;;  %v5734_v15 = vpop.eup %5733  ;;  %v9019_v56 = vld [vmem:[#allocation62_spill] sm:$0xff]  ;;  %v1776_v12 = vmul.f32 1.442695, %v1689_v19  ;;  %5745 = vpow2.f32 %v1762_v25  ;;  %v9022_v19 = vld [vmem:[#allocation63_spill] sm:$0xff] }
 0x374   : > { %1664 = vmax.xlane.f32.xlu0 %v1663_v51  ;;  %v1688_v7 = vsub.f32 %v9019_v56, %v7434_v23  ;;  %v9021_v51 = vunpack.c.h.bf16 %v7476_v28  ;;  %v1961_v54 = vpack.c.bf16 %v5732_v20, %v5734_v15  ;;  %v5736_v35 = vpop.eup %5735 }
 0x375   : > { %v1438_v55 = vmul.f32 0.2, %v1310_v62  ;;  %v1439_v58 = vmul.f32 0.2, %v1311_v26  ;;  %vm1374_vm4 = vcmp.gt.f32.partialorder %v1310_v62, 0.0  ;;  %vm1375_vm5 = vcmp.gt.f32.partialorder %v1311_v26, 0.0 }
 0x376   : > { %v1774_v23 = vmul.f32 1.442695, %v1688_v7  ;;  %5747 = vpow2.f32 %v1776_v12  ;;  %v1879_v25 = vadd.f32 %v5736_v35, %v5732_v20 }
 0x377   : > { %v1502_v22 = vsel %vm1374_vm4, %v1310_v62, %v1438_v55  ;;  %v1503_v5 = vsel %vm1375_vm5, %v1311_v26, %v1439_v58  ;;  %v1686_v58 = vsub.f32 %v9022_v19, %v7469_v43  ;;  %v1867_v62 = vadd.f32 %v7451_v34, %v7438_v57 }
 0x378   : > { %v7508_v45 = vadd.f32 %v1502_v22, %v9020_v61  ;;  %v7512_v59 = vadd.f32 %v1503_v5, %v9021_v51  ;;  %1862 = vadd.xlane.f32.xlu0 %v1861_v8  ;;  %2035 = vmatmul.mubr.bf16.gmra.mrb[40].mxu0 %v1958_v3  ;;  %v5738_v5 = vpop.eup %5737  ;;  %5749 = vpow2.f32 %v1772_v32  ;;  %v1858_v3 = vadd.f32 %v7430_v27, %v7428_v49 }
 0x379   : > { %2042 = vmatprep.mubr.bf16.mxu0 %v1961_v54  ;;  %v5740_v26 = vpop.eup %5739  ;;  %5751 = vpow2.f32 %v1774_v23  ;;  %v1770_v10 = vmul.f32 1.442695, %v1686_v58  ;;  %v1873_v61 = vadd.f32 %v5728_v31, %v7463_v21  ;;  %v1960_v55 = vpack.c.bf16 %v5736_v35, %v5738_v5 }
 0x37a   : > { %v1660_v53 = vmax.f32 %v7508_v45, %v7512_v59  ;;  %v5742_v11 = vpop.eup %5741  ;;  %v1864_v34 = vadd.f32 %v7457_v29, %v7444_v6  ;;  %v1870_v27 = vadd.f32 %v5730_v16, %v7467_v13  ;;  %v1876_v22 = vadd.f32 %v5738_v5, %v5734_v15 }
 0x37b   : > { %v1963_v43 = vpack.c.bf16 %v5740_v26, %v5742_v11  ;;  %v5744_v57 = vpop.eup %5743  ;;  %5753 = vpow2.f32 %v1770_v10 }
 0x37c   : > { %1661 = vmax.xlane.f32.xlu1 %v1660_v53  ;;  %1868 = vadd.xlane.f32.xlu0 %v1867_v62  ;;  %v1885_v21 = vadd.f32 %v5744_v57, %v5740_v26 }
 0x37d   : > { %v5746_v56 = vpop.eup %5745 }
 0x37e   : > { %v1962_v12 = vpack.c.bf16 %v5744_v57, %v5746_v56  ;;  %v1882_v20 = vadd.f32 %v5746_v56, %v5742_v11 }
 0x380   : > { %1859 = vadd.xlane.f32.xlu1 %v1858_v3  ;;  %1874 = vadd.xlane.f32.xlu0 %v1873_v61  ;;  %v5748_v7 = vpop.eup %5747 }
 0x381   : > { %2043 = vmatmul.mubr.bf16.gmra.mrb[44].mxu0 %v1960_v55 }
 0x382   : > { %2050 = vmatprep.mubr.bf16.mxu0 %v1963_v43  ;;  %v5750_v49 = vpop.eup %5749 }
 0x383   : > { %v5752_v31 = vpop.eup %5751  ;;  %v1965_v8 = vpack.c.bf16 %v5748_v7, %v5750_v49 }
 0x384   : > { %1865 = vadd.xlane.f32.xlu1 %v1864_v34  ;;  %1880 = vadd.xlane.f32.xlu0 %v1879_v25  ;;  %v1891_v6 = vadd.f32 %v5752_v31, %v5748_v7 }
 0x385   : > { %v5754_v29 = vpop.eup %5753 }
 0x386   : > { %v1964_v32 = vpack.c.bf16 %v5752_v31, %v5754_v29  ;;  %v1888_v51 = vadd.f32 %v5754_v29, %v5750_v49 }
 0x388   : > { %1871 = vadd.xlane.f32.xlu1 %v1870_v27  ;;  %1886 = vadd.xlane.f32.xlu0 %v1885_v21 }
 0x389   : > { %2051 = vmatmul.mubr.bf16.gmra.mrb[48].mxu0 %v1962_v12 }
 0x38a   : > { %2058 = vmatprep.mubr.bf16.mxu0 %v1965_v8 }
 0x38c   : > { %1877 = vadd.xlane.f32.xlu1 %v1876_v22  ;;  %1892 = vadd.xlane.f32.xlu0 %v1891_v6 }
 0x390   : > { %1883 = vadd.xlane.f32.xlu1 %v1882_v20 }
 0x391   : > { %2059 = vmatmul.mubr.bf16.gmra.mrb[52].mxu0 %v1964_v32 }
 0x394   : > { %1889 = vadd.xlane.f32.xlu1 %v1888_v51 }
 0x39b   : > { %v1611_v13 = vpop.xlane.xlu1 %1610 }
 0x39c   : > { %v1692_v16 = vsub.f32 %v7132_v17, %v1611_v13  ;;  %v1693_v54 = vsub.f32 %v7121_v0, %v1611_v13 }
 0x39e   : > { %v1782_v23 = vmul.f32 1.442695, %v1692_v16  ;;  %v1784_v53 = vmul.f32 1.442695, %v1693_v54 }
 0x39f   : > { %v1608_v35 = vpop.xlane.xlu0 %1607  ;;  %v1620_v15 = vpop.xlane.xlu1 %1619 }
 0x3a0   : > { %5755 = vpow2.f32 %v1782_v23  ;;  %v1690_v19 = vsub.f32 %v7152_v38, %v1608_v35  ;;  %v1691_v58 = vsub.f32 %v7138_v44, %v1608_v35  ;;  %v1698_v62 = vsub.f32 %v7158_v47, %v1620_v15 }
 0x3a1   : > { %5757 = vpow2.f32 %v1784_v53  ;;  %v1699_v5 = vsub.f32 %v7146_v63, %v1620_v15 }
 0x3a2   : > { %v1778_v26 = vmul.f32 1.442695, %v1690_v19  ;;  %v1780_v11 = vmul.f32 1.442695, %v1691_v58  ;;  %v1794_v3 = vmul.f32 1.442695, %v1698_v62 }
 0x3a3   : > { %v1796_v17 = vmul.f32 1.442695, %v1699_v5  ;;  %v1614_v10 = vpop.xlane.xlu0 %1613  ;;  %v1626_v0 = vpop.xlane.xlu1 %1625 }
 0x3a4   : > { %5759 = vpow2.f32 %v1778_v26  ;;  %v1694_v61 = vsub.f32 %v7182_v1, %v1614_v10  ;;  %v1695_v55 = vsub.f32 %v7167_v39, %v1614_v10  ;;  %v1702_v38 = vsub.f32 %v7189_v36, %v1626_v0 }
 0x3a5   : > { %5761 = vpow2.f32 %v1780_v11  ;;  %v1703_v44 = vsub.f32 %v7175_v18, %v1626_v0 }
 0x3a6   : > { %5763 = vpow2.f32 %v1794_v3  ;;  %v1786_v47 = vmul.f32 1.442695, %v1694_v61  ;;  %v1788_v43 = vmul.f32 1.442695, %v1695_v55  ;;  %v1802_v63 = vmul.f32 1.442695, %v1702_v38 }
 0x3a7   : > { %5765 = vpow2.f32 %v1796_v17  ;;  %v1804_v34 = vmul.f32 1.442695, %v1703_v44  ;;  %v1617_v57 = vpop.xlane.xlu0 %1616  ;;  %v1632_v25 = vpop.xlane.xlu1 %1631 }
 0x3a8   : > { %5767 = vpow2.f32 %v1786_v47  ;;  %v1696_v56 = vsub.f32 %v7213_v2, %v1617_v57  ;;  %v1697_v1 = vsub.f32 %v7198_v40, %v1617_v57  ;;  %v1706_v39 = vsub.f32 %v7220_v30, %v1632_v25 }
 0x3a9   : > { %5769 = vpow2.f32 %v1788_v43  ;;  %v1707_v49 = vsub.f32 %v7206_v33, %v1632_v25  ;;  %v9024_v25 = vld [vmem:[#allocation13_spill] sm:$0xff] }
 0x3aa   : > { %v5756_v36 = vpop.eup %5755  ;;  %5771 = vpow2.f32 %v1802_v63  ;;  %v1790_v7 = vmul.f32 1.442695, %v1696_v56  ;;  %v1792_v18 = vmul.f32 1.442695, %v1697_v1  ;;  %v1810_v21 = vmul.f32 1.442695, %v1706_v39 }
 0x3ab   : > { %v5758_v27 = vpop.eup %5757  ;;  %5773 = vpow2.f32 %v1804_v34  ;;  %v1623_v31 = vpop.xlane.xlu0 %1622  ;;  %v1812_v6 = vmul.f32 1.442695, %v1707_v49 }
 0x3ac   : > { %v1638_v12 = vpop.xlane.xlu1 %1637  ;;  %5775 = vpow2.f32 %v1790_v7  ;;  %v1700_v8 = vsub.f32 %v7245_v60, %v1623_v31  ;;  %v1701_v2 = vsub.f32 %v7229_v46, %v1623_v31  ;;  %v1897_v30 = vadd.f32 %v5758_v27, %v5756_v36 }
 0x3ad   : > { %v1710_v40 = vsub.f32 %v7252_v4, %v1638_v12  ;;  %5777 = vpow2.f32 %v1792_v18  ;;  %v1711_v33 = vsub.f32 %v7238_v9, %v1638_v12 }
 0x3ae   : > { %v5760_v22 = vpop.eup %5759  ;;  %v1798_v29 = vmul.f32 1.442695, %v1700_v8  ;;  %v1800_v20 = vmul.f32 1.442695, %v1701_v2  ;;  %5779 = vpow2.f32 %v1810_v21  ;;  %1898 = vadd.xlane.f32.xlu0 %v1897_v30  ;;  %v9026_v8 = vld [vmem:[#allocation14_spill] sm:$0xff] }
 0x3af   : > { %v5762_v32 = vpop.eup %5761  ;;  %v1818_v51 = vmul.f32 1.442695, %v1710_v40  ;;  %v1629_v13 = vpop.xlane.xlu0 %1628  ;;  %v1966_v16 = vpack.c.bf16 %v5756_v36, %v5760_v22  ;;  %v1820_v19 = vmul.f32 1.442695, %v1711_v33 }
 0x3b0   : > { %v1644_v54 = vpop.xlane.xlu1 %1643  ;;  %v7544_v60 = vpop.eup %5763  ;;  %5781 = vpow2.f32 %v1798_v29  ;;  %v1704_v46 = vsub.f32 %v7278_v41, %v1629_v13  ;;  %v1705_v4 = vsub.f32 %v7261_v37, %v1629_v13  ;;  %v1967_v23 = vpack.c.bf16 %v5758_v27, %v5762_v32  ;;  %v9025_v27 = vld [vmem:[#allocation12_spill] sm:$0xff]  ;;  %v9028_v29 = vld [vmem:[#allocation18_spill] sm:$0xff] }
 0x3b1   : > { %v7548_v53 = vpop.eup %5765  ;;  %5783 = vpow2.f32 %v1800_v20  ;;  %v1894_v35 = vadd.f32 %v5762_v32, %v5760_v22  ;;  %v1714_v9 = vsub.f32 %v7283_v24, %v1644_v54  ;;  %v1715_v41 = vsub.f32 %v7270_v14, %v1644_v54  ;;  %v9027_v22 = vld [vmem:[#allocation15_spill] sm:$0xff] }
 0x3b2   : > { %v5768_v15 = vpop.eup %5767  ;;  %5785 = vpow2.f32 %v1812_v6  ;;  %v1806_v58 = vmul.f32 1.442695, %v1704_v46  ;;  %v1808_v62 = vmul.f32 1.442695, %v1705_v4  ;;  %2066 = vmatprep.mubr.bf16.mxu0 %v1967_v23 }
 0x3b3   : > { %v5770_v5 = vpop.eup %5769  ;;  %5787 = vpow2.f32 %v1818_v51  ;;  %1895 = vadd.xlane.f32.xlu1 %v1894_v35  ;;  %2067 = vmatmul.mubr.bf16.gmra.mrb[56].mxu0 %v1966_v16  ;;  %v1826_v37 = vmul.f32 1.442695, %v1714_v9  ;;  %v1635_v26 = vpop.xlane.xlu0 %1634  ;;  %v1828_v47 = vmul.f32 1.442695, %v1715_v41 }
 0x3b4   : > { %v1650_v11 = vpop.xlane.xlu1 %1649  ;;  %v7552_v3 = vpop.eup %5771  ;;  %5789 = vpow2.f32 %v1806_v58  ;;  %v1708_v24 = vsub.f32 %v7308_v42, %v1635_v26  ;;  %v1709_v17 = vsub.f32 %v7294_v50, %v1635_v26  ;;  %v1900_v10 = vadd.f32 %v5770_v5, %v5768_v15  ;;  %v9023_v50 = vld [vmem:[#allocation11_spill] sm:$0xff]  ;;  %v9030_v58 = vld [vmem:[#allocation21_spill] sm:$0xff] }
 0x3b5   : > { %v7556_v0 = vpop.eup %5773  ;;  %5791 = vpow2.f32 %v1808_v62  ;;  %v1718_v14 = vsub.f32 %v7321_v52, %v1650_v11  ;;  %v1719_v43 = vsub.f32 %v7301_v48, %v1650_v11  ;;  %v1906_v52 = vadd.f32 %v7548_v53, %v7544_v60 }
 0x3b6   : > { %v5776_v61 = vpop.eup %5775  ;;  %5793 = vpow2.f32 %v1820_v19  ;;  %v1814_v55 = vmul.f32 1.442695, %v1708_v24  ;;  %v1816_v38 = vmul.f32 1.442695, %v1709_v17  ;;  %v1912_v51 = vadd.f32 %v7556_v0, %v7552_v3 }
 0x3b7   : > { %v5778_v44 = vpop.eup %5777  ;;  %5795 = vpow2.f32 %v1826_v37  ;;  %1901 = vadd.xlane.f32.xlu1 %v1900_v10  ;;  %v1641_v63 = vpop.xlane.xlu0 %1640  ;;  %v1968_v42 = vpack.c.bf16 %v5776_v61, %v5768_v15  ;;  %v1834_v18 = vmul.f32 1.442695, %v1718_v14  ;;  %v1836_v12 = vmul.f32 1.442695, %v1719_v43  ;;  %v9029_v15 = vld [vmem:[#allocation22_spill] sm:$0xff] }
 0x3b8   : > { %v1656_v34 = vpop.xlane.xlu1 %1655  ;;  %5797 = vpow2.f32 %v1814_v55  ;;  %v1712_v57 = vsub.f32 %v9023_v50, %v1641_v63  ;;  %v1713_v56 = vsub.f32 %v9024_v25, %v1641_v63  ;;  %v1969_v1 = vpack.c.bf16 %v5778_v44, %v5770_v5  ;;  %v7562_v39 = vpop.eup %5779 }
 0x3b9   : > { %5799 = vpow2.f32 %v1816_v38  ;;  %v1903_v36 = vadd.f32 %v5778_v44, %v5776_v61  ;;  %v1722_v21 = vsub.f32 %v9025_v27, %v1656_v34  ;;  %v1723_v2 = vsub.f32 %v9026_v8, %v1656_v34  ;;  %v9031_v38 = vld [vmem:[#allocation23_spill] sm:$0xff] }
 0x3ba   : > { %v5782_v7 = vpop.eup %5781  ;;  %v1822_v49 = vmul.f32 1.442695, %v1712_v57  ;;  %v1824_v48 = vmul.f32 1.442695, %v1713_v56  ;;  %2074 = vmatprep.mubr.bf16.mxu0 %v1969_v1  ;;  %5801 = vpow2.f32 %v1828_v47  ;;  %v9032_v44 = vld [vmem:[#allocation19_spill] sm:$0xff] }
 0x3bb   : > { %v5784_v31 = vpop.eup %5783  ;;  %1907 = vadd.xlane.f32.xlu1 %v1906_v52  ;;  %1904 = vadd.xlane.f32.xlu0 %v1903_v36  ;;  %v1647_v40 = vpop.xlane.xlu0 %1646  ;;  %v1842_v54 = vmul.f32 1.442695, %v1722_v21  ;;  %v1844_v35 = vmul.f32 1.442695, %v1723_v2  ;;  %v1970_v17 = vpack.c.bf16 %v5782_v7, %v7544_v60 }
 0x3bc   : > { %v7568_v30 = vpop.eup %5785  ;;  %5803 = vpow2.f32 %v1822_v49  ;;  %2075 = vmatmul.mubr.bf16.gmra.mrb[60].mxu0 %v1968_v42  ;;  %v1716_v6 = vsub.f32 %v9027_v22, %v1647_v40  ;;  %v1717_v20 = vsub.f32 %v9028_v29, %v1647_v40  ;;  %v1971_v33 = vpack.c.bf16 %v5784_v31, %v7548_v53  ;;  %v5699_v22 = vld [vmem:[%s8634_s5] sm:$0xff]  }
 0x3bd   : > { %v7573_v32 = vpop.eup %5787  ;;  %5805 = vpow2.f32 %v1824_v48  ;;  %v1909_v13 = vadd.f32 %v5784_v31, %v5782_v7  ;;  %v1918_v37 = vadd.f32 %v7568_v30, %v7562_v39  ;;  %5508 = vmatprep.subr.bf16.mxu1 %v5699_v22 }
 0x3be   : > { %v5790_v16 = vpop.eup %5789  ;;  %5807 = vpow2.f32 %v1834_v18  ;;  %v1830_v46 = vmul.f32 1.442695, %v1716_v6  ;;  %v1832_v4 = vmul.f32 1.442695, %v1717_v20  ;;  %2082 = vmatprep.mubr.bf16.mxu0 %v1971_v33  ;;  %5509 = vmatpush3.bf16.msra.mxu1 %v5699_v22  ;;  %v5700_v20 = vld [vmem:[%s8634_s5 + $0x8] sm:$0xff]  }
 0x3bf   : > { %v5792_v23 = vpop.eup %5791  ;;  %5809 = vpow2.f32 %v1836_v12  ;;  %1913 = vadd.xlane.f32.xlu1 %v1912_v51  ;;  %1910 = vadd.xlane.f32.xlu0 %v1909_v13  ;;  %v1653_v9 = vpop.xlane.xlu0 %1652  ;;  %v1972_v36 = vpack.c.bf16 %v5790_v16, %v7552_v3 }
 0x3c0   : > { %v7577_v53 = vpop.eup %5793  ;;  %5811 = vpow2.f32 %v1830_v46  ;;  %v1720_v19 = vsub.f32 %v9029_v15, %v1653_v9  ;;  %v1721_v62 = vsub.f32 %v9030_v58, %v1653_v9  ;;  %v1915_v5 = vadd.f32 %v5792_v23, %v5790_v16  ;;  %5510 = vmatprep.subr.bf16.mxu1 %v5700_v20  ;;  %v9034_v9 = vld [vmem:[#allocation9_spill] sm:$0xff] }
 0x3c1   : > { %v7581_v41 = vpop.eup %5795  ;;  %5813 = vpow2.f32 %v1832_v4  ;;  %v1973_v61 = vpack.c.bf16 %v5792_v23, %v7556_v0  ;;  %v1924_v60 = vadd.f32 %v7577_v53, %v7573_v32  ;;  %v9033_v23 = vld [vmem:[#allocation27_spill] sm:$0xff] }
 0x3c2   : > { %v5798_v26 = vpop.eup %5797  ;;  %5815 = vpow2.f32 %v1842_v54  ;;  %v1838_v11 = vmul.f32 1.442695, %v1720_v19  ;;  %v1840_v24 = vmul.f32 1.442695, %v1721_v62  ;;  %5511 = vmatpush3.bf16.msra.mxu1 %v5700_v20 }
 0x3c3   : > { %v5800_v10 = vpop.eup %5799  ;;  %5817 = vpow2.f32 %v1844_v35  ;;  %1919 = vadd.xlane.f32.xlu1 %v1918_v37  ;;  %1916 = vadd.xlane.f32.xlu0 %v1915_v5  ;;  %v1659_v55 = vpop.xlane.xlu0 %1658  ;;  %v1974_v3 = vpack.c.bf16 %v5798_v26, %v7562_v39 }
 0x3c4   : > { %5819 = vpow2.f32 %v1838_v11  ;;  %2083 = vmatmul.mubr.bf16.gmra.mrb[64].mxu0 %v1970_v17  ;;  %v1724_v14 = vsub.f32 %v9031_v38, %v1659_v55  ;;  %v1725_v47 = vsub.f32 %v9032_v44, %v1659_v55  ;;  %v1921_v43 = vadd.f32 %v5800_v10, %v5798_v26  ;;  %v5802_v63 = vpop.eup %5801 }
 0x3c5   : > { %5821 = vpow2.f32 %v1840_v24  ;;  %2090 = vmatprep.mubr.bf16.mxu0 %v1973_v61  ;;  %v1930_v1 = vadd.f32 %v5802_v63, %v7581_v41  ;;  %v1975_v18 = vpack.c.bf16 %v5800_v10, %v7568_v30 }
 0x3c6   : > { %v5804_v42 = vpop.eup %5803  ;;  %v1846_v34 = vmul.f32 1.442695, %v1724_v14  ;;  %v1848_v50 = vmul.f32 1.442695, %v1725_v47 }
 0x3c7   : > { %v5806_v57 = vpop.eup %5805  ;;  %1925 = vadd.xlane.f32.xlu1 %v1924_v60  ;;  %1922 = vadd.xlane.f32.xlu0 %v1921_v43  ;;  %v1976_v39 = vpack.c.bf16 %v5804_v42, %v7573_v32 }
 0x3c8   : > { %v5808_v0 = vpop.eup %5807  ;;  %5823 = vpow2.f32 %v1846_v34  ;;  %v1927_v25 = vadd.f32 %v5806_v57, %v5804_v42  ;;  %v1977_v6 = vpack.c.bf16 %v5806_v57, %v7577_v53  ;;  %v7611_v42 = vld [vmem:[%s8633_s4] ss:$0 sm:$0xff] }
 0x3c9   : > { %v5810_v56 = vpop.eup %5809  ;;  %5825 = vpow2.f32 %v1848_v50 }
 0x3ca   : > { %v5812_v52 = vpop.eup %5811  ;;  %v1936_v21 = vadd.f32 %v5810_v56, %v5808_v0 }
 0x3cb   : > { %v5814_v7 = vpop.eup %5813  ;;  %1931 = vadd.xlane.f32.xlu1 %v1930_v1  ;;  %1928 = vadd.xlane.f32.xlu0 %v1927_v25  ;;  %v1978_v51 = vpack.c.bf16 %v5812_v52, %v7581_v41 }
 0x3cc   : > { %v5816_v49 = vpop.eup %5815  ;;  %2091 = vmatmul.mubr.bf16.gmra.mrb[68].mxu0 %v1972_v36  ;;  %v1933_v48 = vadd.f32 %v5814_v7, %v5812_v52  ;;  %v1979_v33 = vpack.c.bf16 %v5814_v7, %v5802_v63 }
 0x3cd   : > { %v5818_v27 = vpop.eup %5817  ;;  %2098 = vmatprep.mubr.bf16.mxu0 %v1975_v18 }
 0x3ce   : > { %v5820_v31 = vpop.eup %5819  ;;  %v1942_v2 = vadd.f32 %v5818_v27, %v5816_v49 }
 0x3cf   : > { %v5822_v12 = vpop.eup %5821  ;;  %1937 = vadd.xlane.f32.xlu1 %v1936_v21  ;;  %1934 = vadd.xlane.f32.xlu0 %v1933_v48  ;;  %v1980_v16 = vpack.c.bf16 %v5820_v31, %v5808_v0 }
 0x3d0   : > { %v1939_v8 = vadd.f32 %v5822_v12, %v5820_v31  ;;  %v1981_v13 = vpack.c.bf16 %v5822_v12, %v5810_v56 }
 0x3d2   : > { %v5824_v40 = vpop.eup %5823 }
 0x3d3   : > { %v5826_v30 = vpop.eup %5825  ;;  %1943 = vadd.xlane.f32.xlu1 %v1942_v2  ;;  %1940 = vadd.xlane.f32.xlu0 %v1939_v8  ;;  %v1982_v46 = vpack.c.bf16 %v5824_v40, %v5816_v49 }
 0x3d4   : > { %2099 = vmatmul.mubr.bf16.gmra.mrb[72].mxu0 %v1974_v3  ;;  %v1945_v29 = vadd.f32 %v5826_v30, %v5824_v40  ;;  %v1983_v54 = vpack.c.bf16 %v5826_v30, %v5818_v27 }
 0x3d5   : > { %2106 = vmatprep.mubr.bf16.mxu0 %v1977_v6 }
 0x3d7   : > { %1946 = vadd.xlane.f32.xlu0 %v1945_v29 }
 0x3dc   : > { %2107 = vmatmul.mubr.bf16.gmra.mrb[76].mxu0 %v1976_v39 }
 0x3dd   : > { %2114 = vmatprep.mubr.bf16.mxu0 %v1979_v33 }
 0x3e4   : > { %2115 = vmatmul.mubr.bf16.gmra.mrb[80].mxu0 %v1978_v51 }
 0x3e5   : > { %2122 = vmatprep.mubr.bf16.mxu0 %v1981_v13 }
 0x3ec   : > { %2123 = vmatmul.mubr.bf16.gmra.mrb[84].mxu0 %v1980_v16 }
 0x3ed   : > { %2130 = vmatprep.mubr.bf16.mxu0 %v1983_v54 }
 0x3f4   : > { %2131 = vmatmul.mubr.bf16.gmra.mrb[88].mxu0 %v1982_v46 }
 0x401   : > { %v1665_v4 = vpop.xlane.xlu0 %1664 }
 0x402   : > { %v1728_v35 = vsub.f32 %v9033_v23, %v1665_v4  ;;  %v1729_v53 = vsub.f32 %v9034_v9, %v1665_v4 }
 0x404   : > { %v1854_v32 = vmul.f32 1.442695, %v1728_v35  ;;  %v1856_v15 = vmul.f32 1.442695, %v1729_v53 }
 0x406   : > { %5827 = vpow2.f32 %v1854_v32 }
 0x407   : > { %5829 = vpow2.f32 %v1856_v15 }
 0x409   : > { %v1662_v19 = vpop.xlane.xlu1 %1661 }
 0x40a   : > { %v1726_v58 = vsub.f32 %v7508_v45, %v1662_v19  ;;  %v1727_v62 = vsub.f32 %v7512_v59, %v1662_v19  ;;  %v1863_v45 = vpop.xlane.xlu0 %1862 }
 0x40c   : > { %v1850_v5 = vmul.f32 1.442695, %v1726_v58  ;;  %v1852_v41 = vmul.f32 1.442695, %v1727_v62 }
 0x40d   : > { %v1860_v38 = vpop.xlane.xlu1 %1859 }
 0x40e   : > { %5831 = vpow2.f32 %v1850_v5  ;;  %v1869_v44 = vpop.xlane.xlu0 %1868 }
 0x40f   : > { %5833 = vpow2.f32 %v1852_v41 }
 0x410   : > { %v5828_v37 = vpop.eup %5827  ;;  %5835 = vrcp.f32 %v1860_v38 }
 0x411   : > { %v5830_v26 = vpop.eup %5829  ;;  %5837 = vrcp.f32 %v1863_v45  ;;  %v1866_v59 = vpop.xlane.xlu1 %1865 }
 0x412   : > { %v1951_v11 = vadd.f32 %v5830_v26, %v5828_v37  ;;  %5839 = vrcp.f32 %v1866_v59  ;;  %v1875_v7 = vpop.xlane.xlu0 %1874 }
 0x413   : > { %5841 = vrcp.f32 %v1869_v44 }
 0x414   : > { %1952 = vadd.xlane.f32.xlu0 %v1951_v11 }
 0x415   : > { %v1872_v25 = vpop.xlane.xlu1 %1871 }
 0x416   : > { %5843 = vrcp.f32 %v1872_v25  ;;  %v1881_v20 = vpop.xlane.xlu0 %1880 }
 0x417   : > { %5845 = vrcp.f32 %v1875_v7 }
 0x418   : > { %v5832_v24 = vpop.eup %5831 }
 0x419   : > { %v5834_v17 = vpop.eup %5833  ;;  %v1984_v10 = vpack.c.bf16 %v5828_v37, %v5832_v24  ;;  %v1878_v22 = vpop.xlane.xlu1 %1877 }
 0x41a   : > { %v1948_v61 = vadd.f32 %v5834_v17, %v5832_v24  ;;  %v1985_v55 = vpack.c.bf16 %v5830_v26, %v5834_v17  ;;  %v5836_v60 = vpop.eup %5835  ;;  %5847 = vrcp.f32 %v1878_v22  ;;  %v1887_v62 = vpop.xlane.xlu0 %1886 }
 0x41b   : > { %v5838_v0 = vpop.eup %5837  ;;  %5849 = vrcp.f32 %v1881_v20 }
 0x41c   : > { %1949 = vadd.xlane.f32.xlu1 %v1948_v61  ;;  %2138 = vmatprep.mubr.bf16.mxu0 %v1985_v55  ;;  %v5840_v31 = vpop.eup %5839 }
 0x41d   : > { %2139 = vmatmul.mubr.bf16.gmra.mrb[92].mxu0 %v1984_v10  ;;  %v5842_v3 = vpop.eup %5841  ;;  %v1884_v32 = vpop.xlane.xlu1 %1883 }
 0x41e   : > { %5851 = vrcp.f32 %v1884_v32 }
 0x41f   : > { %5853 = vrcp.f32 %v1887_v62 }
 0x420   : > { %v5844_v16 = vpop.eup %5843 }
 0x421   : > { %v5846_v53 = vpop.eup %5845  ;;  %v1890_v59 = vpop.xlane.xlu1 %1889 }
 0x422   : > { %5855 = vrcp.f32 %v1890_v59 }
 0x424   : > { %v5848_v11 = vpop.eup %5847 }
 0x425   : > { %v5850_v45 = vpop.eup %5849 }
 0x43b   : > { %v5158_v14 = vpop.f32.mrb[32].mxu0 }
 0x43c   : > { %v5159_v47 = vpop.f32.mrb[33].mxu0 }
 0x43d   : > { %v5160_v43 = vadd.f32 %v5159_v47, %v5158_v14  ;;  %v5161_v63 = vpop.f32.mrb[34].mxu0  ;;  %v1893_v47 = vpop.xlane.xlu0 %1892 }
 0x43e   : > { %v5162_v34 = vpop.f32.mrb[35].mxu0  ;;  %5857 = vrcp.f32 %v1893_v47 }
 0x43f   : > { %v2179_v50 = vmul.f32 %v5836_v60, %v5160_v43  ;;  %v5163_v57 = vadd.f32 %v5162_v34, %v5161_v63 }
 0x441   : > { %v2217_v56 = vadd.f32 %v7611_v42, %v2179_v50  ;;  %v2180_v1 = vmul.f32 %v5838_v0, %v5163_v57  ;;  %v5852_v57 = vpop.eup %5851 }
 0x442   : > { %v5854_v7 = vpop.eup %5853 }
 0x443   : > { %v2218_v52 = vadd.f32 %v7611_v42, %v2180_v1  ;;  %v5164_v36 = vpop.f32.mrb[36].mxu0  ;;  %v2249_v49 = vmax.f32 %v2217_v56, 0.0 }
 0x444   : > { %v5165_v18 = vpop.f32.mrb[37].mxu0 }
 0x445   : > { %v2250_v48 = vmax.f32 %v2218_v52, 0.0  ;;  %v5166_v27 = vadd.f32 %v5165_v18, %v5164_v36  ;;  %v5167_v21 = vpop.f32.mrb[38].mxu0 }
 0x446   : > { %v5168_v2 = vpop.f32.mrb[39].mxu0 }
 0x447   : > { %v2281_v12 = vpack.c.bf16 %v2250_v48, %v2249_v49  ;;  %v2181_v8 = vmul.f32 %v5840_v31, %v5166_v27  ;;  %v5169_v40 = vadd.f32 %v5168_v2, %v5167_v21 }
 0x449   : > { %5512 = vmatprep.mubr.msk.bf16.mxu1 %vm808_vm1, %v2281_v12  ;;  %v2219_v30 = vadd.f32 %v7611_v42, %v2181_v8  ;;  %v2182_v6 = vmul.f32 %v5842_v3, %v5169_v40  ;;  %v5856_v8 = vpop.eup %5855 }
 0x44b   : > { %v5170_v29 = vpop.f32.mrb[40].mxu0  ;;  %v2220_v39 = vadd.f32 %v7611_v42, %v2182_v6  ;;  %v2251_v54 = vmax.f32 %v2219_v30, 0.0  ;;  %v5858_v6 = vpop.eup %5857 }
 0x44c   : > { %v5171_v33 = vpop.f32.mrb[41].mxu0 }
 0x44d   : > { %v5172_v51 = vadd.f32 %v5171_v33, %v5170_v29  ;;  %v5173_v13 = vpop.f32.mrb[42].mxu0  ;;  %v2252_v46 = vmax.f32 %v2220_v39, 0.0 }
 0x44e   : > { %v5174_v23 = vpop.f32.mrb[43].mxu0 }
 0x44f   : > { %v2183_v4 = vmul.f32 %v5844_v16, %v5172_v51  ;;  %v2282_v35 = vpack.c.bf16 %v2252_v46, %v2251_v54  ;;  %v5175_v9 = vadd.f32 %v5174_v23, %v5173_v13  ;;  %v1896_v54 = vpop.xlane.xlu1 %1895  ;;  %v1899_v46 = vpop.xlane.xlu0 %1898 }
 0x450   : > { %5859 = vrcp.f32 %v1896_v54 }
 0x451   : > { %v2221_v15 = vadd.f32 %v7611_v42, %v2183_v4  ;;  %v2184_v19 = vmul.f32 %v5846_v53, %v5175_v9  ;;  %5513 = vmatmul.mubr.msk.bf16.vlgmr.msra.gmra.mrb[32].mxu1 %vm808_vm1, %v2282_v35  ;;  %v5701_v4 = vld [vmem:[%s8635_s6] sm:$0xff]   ;;  %5861 = vrcp.f32 %v1899_v46 }
 0x452   : > { %5544 = vmatprep.subr.bf16.mxu1 %v5701_v4 }
 0x453   : > { %v2222_v5 = vadd.f32 %v7611_v42, %v2184_v19  ;;  %v2253_v24 = vmax.f32 %v2221_v15, 0.0  ;;  %5545 = vmatpush3.bf16.msra.mxu1 %v5701_v4  ;;  %v1902_v23 = vpop.xlane.xlu1 %1901  ;;  %v1905_v9 = vpop.xlane.xlu0 %1904 }
 0x454   : > { %v5176_v58 = vpop.f32.mrb[44].mxu0  ;;  %5863 = vrcp.f32 %v1902_v23 }
 0x455   : > { %v5177_v41 = vpop.f32.mrb[45].mxu0  ;;  %v2254_v17 = vmax.f32 %v2222_v5, 0.0  ;;  %5865 = vrcp.f32 %v1905_v9 }
 0x456   : > { %v5178_v37 = vadd.f32 %v5177_v41, %v5176_v58  ;;  %v5179_v26 = vpop.f32.mrb[46].mxu0 }
 0x457   : > { %v5180_v61 = vpop.f32.mrb[47].mxu0  ;;  %v2283_v55 = vpack.c.bf16 %v2254_v17, %v2253_v24  ;;  %v1911_v17 = vpop.xlane.xlu0 %1910 }
 0x458   : > { %v2185_v10 = vmul.f32 %v5848_v11, %v5178_v37  ;;  %v5181_v38 = vadd.f32 %v5180_v61, %v5179_v26  ;;  %v1908_v11 = vpop.xlane.xlu1 %1907 }
 0x459   : > { %5516 = vmatprep.mubr.msk.bf16.mxu1 %vm808_vm1, %v2283_v55  ;;  %5867 = vrcp.f32 %v1908_v11 }
 0x45a   : > { %v2223_v14 = vadd.f32 %v7611_v42, %v2185_v10  ;;  %v2186_v44 = vmul.f32 %v5850_v45, %v5181_v38  ;;  %v5860_v19 = vpop.eup %5859  ;;  %5869 = vrcp.f32 %v1911_v17 }
 0x45b   : > { %v5862_v41 = vpop.eup %5861 }
 0x45c   : > { %v5182_v43 = vpop.f32.mrb[48].mxu0  ;;  %v2224_v63 = vadd.f32 %v7611_v42, %v2186_v44  ;;  %v2255_v0 = vmax.f32 %v2223_v14, 0.0 }
 0x45d   : > { %v5183_v60 = vpop.f32.mrb[49].mxu0 }
 0x45e   : > { %v5184_v34 = vadd.f32 %v5183_v60, %v5182_v43  ;;  %v5185_v50 = vpop.f32.mrb[50].mxu0  ;;  %v2256_v25 = vmax.f32 %v2224_v63, 0.0  ;;  %v5864_v14 = vpop.eup %5863 }
 0x45f   : > { %v5186_v1 = vpop.f32.mrb[51].mxu0  ;;  %v5866_v60 = vpop.eup %5865 }
 0x460   : > { %v2187_v56 = vmul.f32 %v5852_v57, %v5184_v34  ;;  %v2284_v52 = vpack.c.bf16 %v2256_v25, %v2255_v0  ;;  %v5187_v36 = vadd.f32 %v5186_v1, %v5185_v50  ;;  %v1914_v34 = vpop.xlane.xlu1 %1913  ;;  %v1917_v0 = vpop.xlane.xlu0 %1916 }
 0x461   : > { %5871 = vrcp.f32 %v1914_v34 }
 0x462   : > { %v2225_v18 = vadd.f32 %v7611_v42, %v2187_v56  ;;  %v2188_v49 = vmul.f32 %v5854_v7, %v5187_v36  ;;  %5517 = vmatmul.mubr.msk.bf16.gmra.mrb[36].mxu1 %vm808_vm1, %v2284_v52  ;;  %5873 = vrcp.f32 %v1917_v0 }
 0x464   : > { %v5188_v48 = vpop.f32.mrb[52].mxu0  ;;  %v2226_v27 = vadd.f32 %v7611_v42, %v2188_v49  ;;  %v2257_v2 = vmax.f32 %v2225_v18, 0.0  ;;  %v5868_v49 = vpop.eup %5867 }
 0x465   : > { %v5189_v21 = vpop.f32.mrb[53].mxu0 }
 0x466   : > { %v5190_v31 = vadd.f32 %v5189_v21, %v5188_v48  ;;  %v5191_v12 = vpop.f32.mrb[54].mxu0  ;;  %v2258_v40 = vmax.f32 %v2226_v27, 0.0 }
 0x467   : > { %v5192_v3 = vpop.f32.mrb[55].mxu0 }
 0x468   : > { %v2189_v22 = vmul.f32 %v5856_v8, %v5190_v31  ;;  %v5193_v30 = vadd.f32 %v5192_v3, %v5191_v12  ;;  %v2285_v29 = vpack.c.bf16 %v2258_v40, %v2257_v2  ;;  %v5870_v12 = vpop.eup %5869  ;;  %v1920_v8 = vpop.xlane.xlu1 %1919 }
 0x469   : > { %v1923_v3 = vpop.xlane.xlu0 %1922  ;;  %5875 = vrcp.f32 %v1920_v8 }
 0x46a   : > { %v2227_v20 = vadd.f32 %v7611_v42, %v2189_v22  ;;  %v2190_v39 = vmul.f32 %v5858_v6, %v5193_v30  ;;  %5520 = vmatprep.mubr.msk.bf16.mxu1 %vm808_vm1, %v2285_v29  ;;  %5877 = vrcp.f32 %v1923_v3 }
 0x46c   : > { %v2228_v33 = vadd.f32 %v7611_v42, %v2190_v39  ;;  %v2259_v51 = vmax.f32 %v2227_v20, 0.0  ;;  %v1926_v23 = vpop.xlane.xlu1 %1925 }
 0x46d   : > { %5879 = vrcp.f32 %v1926_v23 }
 0x46e   : > { %v2260_v13 = vmax.f32 %v2228_v33, 0.0 }
 0x470   : > { %v2286_v16 = vpack.c.bf16 %v2260_v13, %v2259_v51  ;;  %v5872_v51 = vpop.eup %5871 }
 0x471   : > { %v5874_v4 = vpop.eup %5873 }
 0x472   : > { %5521 = vmatmul.mubr.msk.bf16.gmra.mrb[40].mxu1 %vm808_vm1, %v2286_v16 }
 0x486   : > { %v5194_v35 = vpop.f32.mrb[56].mxu0 }
 0x487   : > { %v5195_v53 = vpop.f32.mrb[57].mxu0 }
 0x488   : > { %v5196_v32 = vadd.f32 %v5195_v53, %v5194_v35  ;;  %v5197_v15 = vpop.f32.mrb[58].mxu0  ;;  %v1929_v53 = vpop.xlane.xlu0 %1928 }
 0x489   : > { %v5198_v58 = vpop.f32.mrb[59].mxu0  ;;  %5881 = vrcp.f32 %v1929_v53 }
 0x48a   : > { %v2191_v62 = vmul.f32 %v5860_v19, %v5196_v32  ;;  %v5199_v5 = vadd.f32 %v5198_v58, %v5197_v15 }
 0x48c   : > { %v2229_v37 = vadd.f32 %v7611_v42, %v2191_v62  ;;  %v2192_v26 = vmul.f32 %v5862_v41, %v5199_v5 }
 0x48e   : > { %v2230_v24 = vadd.f32 %v7611_v42, %v2192_v26  ;;  %v2261_v61 = vmax.f32 %v2229_v37, 0.0  ;;  %v5876_v37 = vpop.eup %5875 }
 0x48f   : > { %v5200_v10 = vpop.f32.mrb[60].mxu0 }
 0x490   : > { %v2262_v55 = vmax.f32 %v2230_v24, 0.0  ;;  %v5201_v38 = vpop.f32.mrb[61].mxu0 }
 0x491   : > { %v5202_v45 = vadd.f32 %v5201_v38, %v5200_v10  ;;  %v5203_v59 = vpop.f32.mrb[62].mxu0  ;;  %v5702_v10 = vld [vmem:[%s8635_s6 + $0x8] sm:$0xff]  }
 0x492   : > { %v2287_v44 = vpack.c.bf16 %v2262_v55, %v2261_v61  ;;  %v5204_v47 = vpop.f32.mrb[63].mxu0  ;;  %v5878_v61 = vpop.eup %5877  ;;  %5546 = vmatprep.subr.bf16.mxu1 %v5702_v10 }
 0x493   : > { %v2193_v43 = vmul.f32 %v5864_v14, %v5202_v45  ;;  %v5205_v63 = vadd.f32 %v5204_v47, %v5203_v59  ;;  %v1932_v55 = vpop.xlane.xlu1 %1931  ;;  %5547 = vmatpush3.bf16.msra.mxu1 %v5702_v10  ;;  %v1935_v59 = vpop.xlane.xlu0 %1934 }
 0x494   : > { %5524 = vmatprep.mubr.msk.bf16.mxu1 %vm808_vm1, %v2287_v44  ;;  %5883 = vrcp.f32 %v1932_v55 }
 0x495   : > { %v2231_v50 = vadd.f32 %v7611_v42, %v2193_v43  ;;  %v2194_v57 = vmul.f32 %v5866_v60, %v5205_v63  ;;  %5885 = vrcp.f32 %v1935_v59 }
 0x497   : > { %v2232_v25 = vadd.f32 %v7611_v42, %v2194_v57  ;;  %v5206_v56 = vpop.f32.mrb[64].mxu0  ;;  %v2263_v52 = vmax.f32 %v2231_v50, 0.0  ;;  %v5880_v50 = vpop.eup %5879 }
 0x498   : > { %v5207_v1 = vpop.f32.mrb[65].mxu0 }
 0x499   : > { %v2264_v36 = vmax.f32 %v2232_v25, 0.0  ;;  %v5208_v7 = vadd.f32 %v5207_v1, %v5206_v56  ;;  %v5209_v18 = vpop.f32.mrb[66].mxu0  ;;  %v5882_v1 = vpop.eup %5881 }
 0x49a   : > { %v5210_v48 = vpop.f32.mrb[67].mxu0 }
 0x49b   : > { %v2288_v27 = vpack.c.bf16 %v2264_v36, %v2263_v52  ;;  %v2195_v21 = vmul.f32 %v5868_v49, %v5208_v7  ;;  %v5211_v31 = vadd.f32 %v5210_v48, %v5209_v18  ;;  %v1938_v52 = vpop.xlane.xlu1 %1937  ;;  %v1941_v18 = vpop.xlane.xlu0 %1940 }
 0x49c   : > { %5887 = vrcp.f32 %v1938_v52 }
 0x49d   : > { %v2233_v2 = vadd.f32 %v7611_v42, %v2195_v21  ;;  %v2196_v40 = vmul.f32 %v5870_v12, %v5211_v31  ;;  %5525 = vmatmul.mubr.msk.bf16.gmra.mrb[44].mxu1 %vm808_vm1, %v2288_v27  ;;  %5889 = vrcp.f32 %v1941_v18 }
 0x49f   : > { %v2234_v22 = vadd.f32 %v7611_v42, %v2196_v40  ;;  %v5212_v30 = vpop.f32.mrb[68].mxu0  ;;  %v2265_v29 = vmax.f32 %v2233_v2, 0.0  ;;  %v5884_v2 = vpop.eup %5883 }
 0x4a0   : > { %v5213_v6 = vpop.f32.mrb[69].mxu0 }
 0x4a1   : > { %v2266_v20 = vmax.f32 %v2234_v22, 0.0  ;;  %v5214_v39 = vadd.f32 %v5213_v6, %v5212_v30  ;;  %v5215_v33 = vpop.f32.mrb[70].mxu0  ;;  %v5886_v6 = vpop.eup %5885 }
 0x4a2   : > { %v5216_v13 = vpop.f32.mrb[71].mxu0 }
 0x4a3   : > { %v2289_v16 = vpack.c.bf16 %v2266_v20, %v2265_v29  ;;  %v2197_v54 = vmul.f32 %v5872_v51, %v5214_v39  ;;  %v5217_v46 = vadd.f32 %v5216_v13, %v5215_v33  ;;  %v1944_v29 = vpop.xlane.xlu1 %1943  ;;  %v1947_v33 = vpop.xlane.xlu0 %1946 }
 0x4a4   : > { %5891 = vrcp.f32 %v1944_v29 }
 0x4a5   : > { %v2235_v35 = vadd.f32 %v7611_v42, %v2197_v54  ;;  %v2198_v9 = vmul.f32 %v5874_v4, %v5217_v46  ;;  %5528 = vmatprep.mubr.msk.bf16.mxu1 %vm808_vm1, %v2289_v16  ;;  %5893 = vrcp.f32 %v1947_v33 }
 0x4a7   : > { %v2236_v32 = vadd.f32 %v7611_v42, %v2198_v9  ;;  %v5218_v15 = vpop.f32.mrb[72].mxu0  ;;  %v2267_v58 = vmax.f32 %v2235_v35, 0.0  ;;  %v5888_v35 = vpop.eup %5887 }
 0x4a8   : > { %v5219_v19 = vpop.f32.mrb[73].mxu0 }
 0x4a9   : > { %v2268_v62 = vmax.f32 %v2236_v32, 0.0  ;;  %v5220_v5 = vadd.f32 %v5219_v19, %v5218_v15  ;;  %v5221_v41 = vpop.f32.mrb[74].mxu0  ;;  %v5890_v19 = vpop.eup %5889 }
 0x4aa   : > { %v5222_v26 = vpop.f32.mrb[75].mxu0 }
 0x4ab   : > { %v2290_v11 = vpack.c.bf16 %v2268_v62, %v2267_v58  ;;  %v2199_v24 = vmul.f32 %v5876_v37, %v5220_v5  ;;  %v5223_v17 = vadd.f32 %v5222_v26, %v5221_v41 }
 0x4ad   : > { %v2237_v38 = vadd.f32 %v7611_v42, %v2199_v24  ;;  %v2200_v45 = vmul.f32 %v5878_v61, %v5223_v17  ;;  %5529 = vmatmul.mubr.msk.bf16.gmra.mrb[48].mxu1 %vm808_vm1, %v2290_v11 }
 0x4ae   : > { %v5892_v10 = vpop.eup %5891 }
 0x4af   : > { %v2238_v14 = vadd.f32 %v7611_v42, %v2200_v45  ;;  %v5224_v44 = vpop.f32.mrb[76].mxu0  ;;  %v2269_v43 = vmax.f32 %v2237_v38, 0.0  ;;  %v5894_v59 = vpop.eup %5893 }
 0x4b0   : > { %v5225_v47 = vpop.f32.mrb[77].mxu0 }
 0x4b1   : > { %v2270_v63 = vmax.f32 %v2238_v14, 0.0  ;;  %v5226_v60 = vadd.f32 %v5225_v47, %v5224_v44  ;;  %v5227_v34 = vpop.f32.mrb[78].mxu0 }
 0x4b2   : > { %v5228_v57 = vpop.f32.mrb[79].mxu0 }
 0x4b3   : > { %v2291_v0 = vpack.c.bf16 %v2270_v63, %v2269_v43  ;;  %v2201_v25 = vmul.f32 %v5880_v50, %v5226_v60  ;;  %v5229_v56 = vadd.f32 %v5228_v57, %v5227_v34  ;;  %v1950_v34 = vpop.xlane.xlu1 %1949  ;;  %v1953_v50 = vpop.xlane.xlu0 %1952 }
 0x4b4   : > { %5895 = vrcp.f32 %v1950_v34 }
 0x4b5   : > { %v2239_v36 = vadd.f32 %v7611_v42, %v2201_v25  ;;  %v2202_v7 = vmul.f32 %v5882_v1, %v5229_v56  ;;  %5532 = vmatprep.mubr.msk.bf16.mxu1 %vm808_vm1, %v2291_v0  ;;  %5897 = vrcp.f32 %v1953_v50 }
 0x4b7   : > { %v2240_v49 = vadd.f32 %v7611_v42, %v2202_v7  ;;  %v5230_v48 = vpop.f32.mrb[80].mxu0  ;;  %v2271_v21 = vmax.f32 %v2239_v36, 0.0 }
 0x4b8   : > { %v5231_v27 = vpop.f32.mrb[81].mxu0 }
 0x4b9   : > { %v2272_v31 = vmax.f32 %v2240_v49, 0.0  ;;  %v5232_v12 = vadd.f32 %v5231_v27, %v5230_v48  ;;  %v5233_v8 = vpop.f32.mrb[82].mxu0 }
 0x4ba   : > { %v5234_v40 = vpop.f32.mrb[83].mxu0 }
 0x4bb   : > { %v2292_v3 = vpack.c.bf16 %v2272_v31, %v2271_v21  ;;  %v2203_v22 = vmul.f32 %v5884_v2, %v5232_v12  ;;  %v5235_v30 = vadd.f32 %v5234_v40, %v5233_v8 }
 0x4bd   : > { %v2241_v20 = vadd.f32 %v7611_v42, %v2203_v22  ;;  %v2204_v39 = vmul.f32 %v5886_v6, %v5235_v30  ;;  %5533 = vmatmul.mubr.msk.bf16.gmra.mrb[52].mxu1 %vm808_vm1, %v2292_v3 }
 0x4be   : > { %v5896_v1 = vpop.eup %5895 }
 0x4bf   : > { %v2242_v51 = vadd.f32 %v7611_v42, %v2204_v39  ;;  %v5236_v13 = vpop.f32.mrb[84].mxu0  ;;  %v2273_v54 = vmax.f32 %v2241_v20, 0.0  ;;  %v5898_v18 = vpop.eup %5897 }
 0x4c0   : > { %v5237_v16 = vpop.f32.mrb[85].mxu0 }
 0x4c1   : > { %v2274_v46 = vmax.f32 %v2242_v51, 0.0  ;;  %v5238_v4 = vadd.f32 %v5237_v16, %v5236_v13  ;;  %v5239_v23 = vpop.f32.mrb[86].mxu0 }
 0x4c2   : > { %v5240_v9 = vpop.f32.mrb[87].mxu0 }
 0x4c3   : > { %v2293_v53 = vpack.c.bf16 %v2274_v46, %v2273_v54  ;;  %v2205_v32 = vmul.f32 %v5888_v35, %v5238_v4  ;;  %v5241_v15 = vadd.f32 %v5240_v9, %v5239_v23 }
 0x4c5   : > { %v2243_v58 = vadd.f32 %v7611_v42, %v2205_v32  ;;  %v2206_v62 = vmul.f32 %v5890_v19, %v5241_v15  ;;  %5536 = vmatprep.mubr.msk.bf16.mxu1 %vm808_vm1, %v2293_v53 }
 0x4c7   : > { %v2244_v5 = vadd.f32 %v7611_v42, %v2206_v62  ;;  %v5242_v41 = vpop.f32.mrb[88].mxu0  ;;  %v2275_v26 = vmax.f32 %v2243_v58, 0.0 }
 0x4c8   : > { %v5243_v37 = vpop.f32.mrb[89].mxu0 }
 0x4c9   : > { %v2276_v11 = vmax.f32 %v2244_v5, 0.0  ;;  %v5244_v24 = vadd.f32 %v5243_v37, %v5242_v41  ;;  %v5245_v17 = vpop.f32.mrb[90].mxu0 }
 0x4ca   : > { %v5246_v61 = vpop.f32.mrb[91].mxu0 }
 0x4cb   : > { %v2294_v55 = vpack.c.bf16 %v2276_v11, %v2275_v26  ;;  %v2207_v38 = vmul.f32 %v5892_v10, %v5244_v24  ;;  %v5247_v45 = vadd.f32 %v5246_v61, %v5245_v17 }
 0x4cd   : > { %v2245_v14 = vadd.f32 %v7611_v42, %v2207_v38  ;;  %v2208_v44 = vmul.f32 %v5894_v59, %v5247_v45  ;;  %5537 = vmatmul.mubr.msk.bf16.gmra.mrb[56].mxu1 %vm808_vm1, %v2294_v55 }
 0x4cf   : > { %v2246_v47 = vadd.f32 %v7611_v42, %v2208_v44  ;;  %v2277_v43 = vmax.f32 %v2245_v14, 0.0 }
 0x4d1   : > { %v2278_v63 = vmax.f32 %v2246_v47, 0.0 }
 0x4d3   : > { %v2295_v60 = vpack.c.bf16 %v2278_v63, %v2277_v43 }
 0x4d5   : > { %5540 = vmatprep.mubr.msk.bf16.mxu1 %vm808_vm1, %v2295_v60 }
 0x4f0   : > { %v5248_v57 = vpop.f32.mrb[92].mxu0 }
 0x4f1   : > { %v5249_v0 = vpop.f32.mrb[93].mxu0 }
 0x4f2   : > { %v5250_v25 = vadd.f32 %v5249_v0, %v5248_v57  ;;  %v5251_v56 = vpop.f32.mrb[94].mxu0 }
 0x4f3   : > { %v5252_v52 = vpop.f32.mrb[95].mxu0 }
 0x4f4   : > { %v2209_v36 = vmul.f32 %v5896_v1, %v5250_v25  ;;  %v5253_v7 = vadd.f32 %v5252_v52, %v5251_v56 }
 0x4f6   : > { %v2247_v49 = vadd.f32 %v7611_v42, %v2209_v36  ;;  %v2210_v48 = vmul.f32 %v5898_v18, %v5253_v7 }
 0x4f8   : > { %v2248_v27 = vadd.f32 %v7611_v42, %v2210_v48  ;;  %v2279_v21 = vmax.f32 %v2247_v49, 0.0 }
 0x4fa   : > { %v2280_v31 = vmax.f32 %v2248_v27, 0.0 }
 0x4fc   : > { %v2296_v12 = vpack.c.bf16 %v2280_v31, %v2279_v21 }
 0x4fe   : > { %5541 = vmatmul.mubr.msk.bf16.gmra.mrb[60].mxu1 %vm808_vm1, %v2296_v12 }
 0x524   : > { %v5514_v8 = vpop.f32.mrb[32].mxu1 }
 0x525   : > { %v2400_v2 = vpop.f32.mrb[33].mxu1 }
 0x526   : > { %v5515_v40 = vpop.f32.mrb[34].mxu1 }
 0x527   : > { %v2528_v3 = vpack.c.bf16 %v5515_v40, %v5514_v8  ;;  %v2403_v22 = vpop.f32.mrb[35].mxu1 }
 0x528   : > { %v2527_v30 = vpack.c.bf16 %v2403_v22, %v2400_v2 }
 0x52a   : > { %5548 = vmatprep.mubr.msk.bf16.mxu1 %vm808_vm1, %v2527_v30 }
 0x52b   : > { %5549 = vmatmul.mubr.msk.bf16.vlgmr.msra.gmra.mrb[64].mxu1 %vm808_vm1, %v2528_v3 }
 0x535   : > { %v5518_v6 = vpop.f32.mrb[36].mxu1 }
 0x536   : > { %v2416_v29 = vpop.f32.mrb[37].mxu1 }
 0x537   : > { %v5519_v20 = vpop.f32.mrb[38].mxu1 }
 0x538   : > { %v2530_v39 = vpack.c.bf16 %v5519_v20, %v5518_v6  ;;  %v2419_v42 = vpop.f32.mrb[39].mxu1 }
 0x539   : > { %v2529_v33 = vpack.c.bf16 %v2419_v42, %v2416_v29 }
 0x53b   : > { %5552 = vmatprep.mubr.msk.bf16.mxu1 %vm808_vm1, %v2529_v33 }
 0x53c   : > { %5553 = vmatmul.mubr.msk.bf16.gmra.mrb[68].mxu1 %vm808_vm1, %v2530_v39 }
 0x545   : > { %v5522_v51 = vpop.f32.mrb[40].mxu1 }
 0x546   : > { %v2432_v13 = vpop.f32.mrb[41].mxu1 }
 0x547   : > { %v5523_v16 = vpop.f32.mrb[42].mxu1 }
 0x548   : > { %v2532_v54 = vpack.c.bf16 %v5523_v16, %v5522_v51  ;;  %v2435_v46 = vpop.f32.mrb[43].mxu1 }
 0x549   : > { %v2531_v4 = vpack.c.bf16 %v2435_v46, %v2432_v13 }
 0x54b   : > { %5556 = vmatprep.mubr.msk.bf16.mxu1 %vm808_vm1, %v2531_v4 }
 0x54c   : > { %5557 = vmatmul.mubr.msk.bf16.gmra.mrb[72].mxu1 %vm808_vm1, %v2532_v54 }
 0x570   : > { %v5526_v23 = vpop.f32.mrb[44].mxu1 }
 0x571   : > { %v2448_v35 = vpop.f32.mrb[45].mxu1 }
 0x572   : > { %v5527_v9 = vpop.f32.mrb[46].mxu1 }
 0x573   : > { %v2534_v53 = vpack.c.bf16 %v5527_v9, %v5526_v23  ;;  %v2451_v32 = vpop.f32.mrb[47].mxu1 }
 0x574   : > { %v2533_v15 = vpack.c.bf16 %v2451_v32, %v2448_v35 }
 0x576   : > { %5560 = vmatprep.mubr.msk.bf16.mxu1 %vm808_vm1, %v2533_v15 }
 0x577   : > { %5561 = vmatmul.mubr.msk.bf16.gmra.mrb[76].mxu1 %vm808_vm1, %v2534_v53 }
 0x580   : > { %v5530_v19 = vpop.f32.mrb[48].mxu1 }
 0x581   : > { %v2464_v58 = vpop.f32.mrb[49].mxu1 }
 0x582   : > { %v5531_v62 = vpop.f32.mrb[50].mxu1 }
 0x583   : > { %v2536_v5 = vpack.c.bf16 %v5531_v62, %v5530_v19  ;;  %v2467_v41 = vpop.f32.mrb[51].mxu1 }
 0x584   : > { %v2535_v37 = vpack.c.bf16 %v2467_v41, %v2464_v58 }
 0x586   : > { %5564 = vmatprep.mubr.msk.bf16.mxu1 %vm808_vm1, %v2535_v37  ;;  %5290 = vmatprep.subr.bf16.mxu0 %v2535_v37 }
 0x587   : > { %5565 = vmatmul.mubr.msk.bf16.gmra.mrb[80].mxu1 %vm808_vm1, %v2536_v5  ;;  %5291 = vmatpush3.bf16.msra.mxu0 %v2527_v30 }
 0x588   : > { %5292 = vmatprep.subr.bf16.mxu0 %v2536_v5 }
 0x58b   : > { %5293 = vmatpush3.bf16.msra.mxu0 %v2528_v3 }
 0x590   : > { %v5534_v26 = vpop.f32.mrb[52].mxu1 }
 0x591   : > { %v2480_v11 = vpop.f32.mrb[53].mxu1 }
 0x592   : > { %v5535_v24 = vpop.f32.mrb[54].mxu1 }
 0x593   : > { %v2538_v17 = vpack.c.bf16 %v5535_v24, %v5534_v26  ;;  %v2483_v10 = vpop.f32.mrb[55].mxu1 }
 0x594   : > { %v2537_v61 = vpack.c.bf16 %v2483_v10, %v2480_v11 }
 0x596   : > { %5568 = vmatprep.mubr.msk.bf16.mxu1 %vm808_vm1, %v2537_v61  ;;  %5294 = vmatprep.subr.bf16.mxu0 %v2537_v61 }
 0x597   : > { %5569 = vmatmul.mubr.msk.bf16.gmra.mrb[84].mxu1 %vm808_vm1, %v2538_v17  ;;  %5295 = vmatpush3.bf16.msra.mxu0 %v2529_v33 }
 0x598   : > { %5296 = vmatprep.subr.bf16.mxu0 %v2538_v17 }
 0x59b   : > { %5297 = vmatpush3.bf16.msra.mxu0 %v2530_v39 }
 0x5a0   : > { %v5538_v55 = vpop.f32.mrb[56].mxu1 }
 0x5a1   : > { %v2496_v38 = vpop.f32.mrb[57].mxu1 }
 0x5a2   : > { %v5539_v45 = vpop.f32.mrb[58].mxu1 }
 0x5a3   : > { %v2540_v59 = vpack.c.bf16 %v5539_v45, %v5538_v55  ;;  %v2499_v14 = vpop.f32.mrb[59].mxu1 }
 0x5a4   : > { %v2539_v44 = vpack.c.bf16 %v2499_v14, %v2496_v38 }
 0x5a6   : > { %5572 = vmatprep.mubr.msk.bf16.mxu1 %vm808_vm1, %v2539_v44  ;;  %5298 = vmatprep.subr.bf16.mxu0 %v2539_v44 }
 0x5a7   : > { %5573 = vmatmul.mubr.msk.bf16.gmra.mrb[88].mxu1 %vm808_vm1, %v2540_v59  ;;  %5299 = vmatpush3.bf16.msra.mxu0 %v2531_v4 }
 0x5a8   : > { %5300 = vmatprep.subr.bf16.mxu0 %v2540_v59 }
 0x5ab   : > { %5301 = vmatpush3.bf16.msra.mxu0 %v2532_v54 }
 0x5d1   : > { %v5542_v47 = vpop.f32.mrb[60].mxu1 }
 0x5d2   : > { %v2512_v43 = vpop.f32.mrb[61].mxu1 }
 0x5d3   : > { %v5543_v63 = vpop.f32.mrb[62].mxu1 }
 0x5d4   : > { %v2542_v60 = vpack.c.bf16 %v5543_v63, %v5542_v47  ;;  %v2515_v34 = vpop.f32.mrb[63].mxu1  ;;  %v9035_v47 = vld [vmem:[#allocation25_spill] sm:$0xff] }
 0x5d5   : > { %v2541_v50 = vpack.c.bf16 %v2515_v34, %v2512_v43 }
 0x5d7   : > { %5576 = vmatprep.mubr.msk.bf16.mxu1 %vm808_vm1, %v2541_v50  ;;  %5302 = vmatprep.subr.bf16.mxu0 %v2541_v50 }
 0x5d8   : > { %5577 = vmatmul.mubr.msk.bf16.gmra.mrb[92].mxu1 %vm808_vm1, %v2542_v60  ;;  %5303 = vmatpush3.bf16.msra.mxu0 %v2533_v15 }
 0x5d9   : > { %5304 = vmatprep.subr.bf16.mxu0 %v2542_v60 }
 0x5dc   : > { %5305 = vmatpush3.bf16.msra.mxu0 %v2534_v53 }
 0x5fe   : > { %v5550_v57 = vpop.f32.mrb[64].mxu1 }
 0x5ff   : > { %2840 = vperm.xlu1 %5694, %v5550_v57   ;;  %v2637_v0 = vpop.f32.mrb[65].mxu1 }
 0x600   : > { %v5551_v25 = vpop.f32.mrb[66].mxu1 }
 0x601   : > { %v2640_v56 = vpop.f32.mrb[67].mxu1 }
 0x602   : > { %2835 = vperm.xlu0 %5695, %v2640_v56  }
 0x603   : > { %2830 = vperm.xlu1 %5694, %v2637_v0  }
 0x607   : > { %2845 = vperm.xlu1 %5694, %v5551_v25  }
 0x60f   : > { %v5554_v1 = vpop.f32.mrb[68].mxu1 }
 0x610   : > { %2860 = vperm.xlu0 %5695, %v5554_v1   ;;  %v2653_v52 = vpop.f32.mrb[69].mxu1 }
 0x611   : > { %v5555_v36 = vpop.f32.mrb[70].mxu1 }
 0x612   : > { %2865 = vperm.xlu1 %5694, %v5555_v36   ;;  %v2656_v7 = vpop.f32.mrb[71].mxu1 }
 0x614   : > { %2850 = vperm.xlu0 %5695, %v2653_v52  }
 0x616   : > { %2855 = vperm.xlu1 %5694, %v2656_v7  }
 0x61f   : > { %v5558_v18 = vpop.f32.mrb[72].mxu1 }
 0x620   : > { %2880 = vperm.xlu0 %5695, %v5558_v18   ;;  %v2669_v49 = vpop.f32.mrb[73].mxu1 }
 0x621   : > { %v5559_v48 = vpop.f32.mrb[74].mxu1 }
 0x622   : > { %2885 = vperm.xlu1 %5694, %v5559_v48   ;;  %v2672_v27 = vpop.f32.mrb[75].mxu1 }
 0x624   : > { %2870 = vperm.xlu0 %5695, %v2669_v49  }
 0x626   : > { %2875 = vperm.xlu1 %5694, %v2672_v27  }
 0x64a   : > { %v5562_v21 = vpop.f32.mrb[76].mxu1 }
 0x64b   : > { %2900 = vperm.xlu0 %5695, %v5562_v21   ;;  %v2685_v31 = vpop.f32.mrb[77].mxu1 }
 0x64c   : > { %v5563_v12 = vpop.f32.mrb[78].mxu1 }
 0x64d   : > { %2905 = vperm.xlu1 %5694, %v5563_v12   ;;  %v2688_v8 = vpop.f32.mrb[79].mxu1 }
 0x64f   : > { %2890 = vperm.xlu0 %5695, %v2685_v31  }
 0x651   : > { %2895 = vperm.xlu1 %5694, %v2688_v8  }
 0x65a   : > { %v5566_v2 = vpop.f32.mrb[80].mxu1 }
 0x65b   : > { %v2701_v40 = vpop.f32.mrb[81].mxu1 }
 0x65c   : > { %v5567_v3 = vpop.f32.mrb[82].mxu1 }
 0x65d   : > { %2925 = vperm.xlu1 %5694, %v5567_v3   ;;  %v2704_v22 = vpop.f32.mrb[83].mxu1 }
 0x661   : > { %2915 = vperm.xlu1 %5694, %v2704_v22  }
 0x66a   : > { %v5570_v30 = vpop.f32.mrb[84].mxu1 }
 0x66b   : > { %v2717_v6 = vpop.f32.mrb[85].mxu1 }
 0x66c   : > { %v5571_v29 = vpop.f32.mrb[86].mxu1 }
 0x66d   : > { %2764 = vxpose.xlu0.b32.start [1/16] (narrow) %v2637_v0, 8  ;;  %2945 = vperm.xlu1 %5694, %v5571_v29   ;;  %v2720_v20 = vpop.f32.mrb[87].mxu1 }
 0x671   : > { %2765 = vxpose.xlu0.b32.cont [2/16] (narrow) %v2640_v56, 8  ;;  %2935 = vperm.xlu1 %5694, %v2720_v20  }
 0x675   : > { %2766 = vxpose.xlu0.b32.cont [3/16] (narrow) %v5550_v57, 8 }
 0x679   : > { %2767 = vxpose.xlu0.b32.cont [4/16] (narrow) %v5551_v25, 8 }
 0x67a   : > { %v5574_v39 = vpop.f32.mrb[88].mxu1 }
 0x67b   : > { %v2733_v42 = vpop.f32.mrb[89].mxu1 }
 0x67c   : > { %v5575_v33 = vpop.f32.mrb[90].mxu1 }
 0x67d   : > { %2768 = vxpose.xlu0.b32.cont [5/16] (narrow) %v2653_v52, 8  ;;  %2965 = vperm.xlu1 %5694, %v5575_v33   ;;  %v2736_v51 = vpop.f32.mrb[91].mxu1 }
 0x67e   : > { %v2841_v4 = vpop.permute.xlu1 %2840 }
 0x681   : > { %2769 = vxpose.xlu0.b32.cont [6/16] (narrow) %v2656_v7, 8  ;;  %2955 = vperm.xlu1 %5694, %v2736_v51   ;;  %v2836_v62 = vpop.permute.xlu0 %2835 }
 0x682   : > { %v2831_v23 = vpop.permute.xlu1 %2830 }
 0x685   : > { %2770 = vxpose.xlu0.b32.cont [7/16] (narrow) %v5554_v1, 8 }
 0x686   : > { %v2846_v35 = vpop.permute.xlu1 %2845 }
 0x689   : > { %2771 = vxpose.xlu0.b32.cont [8/16] (narrow) %v5555_v36, 8 }
 0x68d   : > { %2772 = vxpose.xlu0.b32.cont [9/16] (narrow) %v2669_v49, 8 }
 0x68f   : > { %v2861_v41 = vpop.permute.xlu0 %2860 }
 0x691   : > { %2773 = vxpose.xlu0.b32.cont [10/16] (narrow) %v2672_v27, 8  ;;  %v7689_v9 = vpop.permute.xlu1 %2865 }
 0x693   : > { %v2851_v26 = vpop.permute.xlu0 %2850 }
 0x695   : > { %2774 = vxpose.xlu0.b32.cont [11/16] (narrow) %v5558_v18, 8  ;;  %v2856_v53 = vpop.permute.xlu1 %2855 }
 0x699   : > { %2775 = vxpose.xlu0.b32.cont [12/16] (narrow) %v5559_v48, 8 }
 0x69d   : > { %2776 = vxpose.xlu0.b32.cont [13/16] (narrow) %v2685_v31, 8 }
 0x69f   : > { %v7705_v24 = vpop.permute.xlu0 %2880 }
 0x6a1   : > { %2777 = vxpose.xlu0.b32.cont [14/16] (narrow) %v2688_v8, 8  ;;  %v7691_v32 = vpop.permute.xlu1 %2885 }
 0x6a3   : > { %v7709_v10 = vpop.permute.xlu0 %2870 }
 0x6a5   : > { %2778 = vxpose.xlu0.b32.cont [15/16] (narrow) %v5562_v21, 8  ;;  %v7693_v15 = vpop.permute.xlu1 %2875 }
 0x6a9   : > { %2779 = vxpose.xlu0.b32.end [16/16] (narrow) %v5563_v12, 8 }
 0x6ab   : > { %v7683_v13 = vpop.f32.mrb[92].mxu1 }
 0x6ac   : > { %v2749_v16 = vpop.f32.mrb[93].mxu1 }
 0x6ad   : > { %v7685_v54 = vpop.f32.mrb[94].mxu1 }
 0x6ae   : > { %v2752_v46 = vpop.f32.mrb[95].mxu1 }
 0x6af   : > { %2975 = vperm.xlu1 %5694, %v2752_v46  }
 0x6ca   : > { %v7713_v55 = vpop.permute.xlu0 %2900 }
 0x6cc   : > { %v7695_v19 = vpop.permute.xlu1 %2905 }
 0x6ce   : > { %v7717_v45 = vpop.permute.xlu0 %2890 }
 0x6d0   : > { %v7697_v58 = vpop.permute.xlu1 %2895 }
 0x6d2   : > { %2920 = vperm.xlu0 %5695, %v5566_v2  }
 0x6d6   : > { %2910 = vperm.xlu0 %5695, %v2701_v40  }
 0x6d8   : > { %2796 = vxpose.xlu1.b32.start [1/16] (narrow) %v2701_v40, 8 }
 0x6da   : > { %2940 = vperm.xlu0 %5695, %v5570_v30  }
 0x6dc   : > { %2797 = vxpose.xlu1.b32.cont [2/16] (narrow) %v2704_v22, 8  ;;  %v7699_v5 = vpop.permute.xlu1 %2925 }
 0x6de   : > { %2930 = vperm.xlu0 %5695, %v2717_v6  }
 0x6e0   : > { %2798 = vxpose.xlu1.b32.cont [3/16] (narrow) %v5566_v2, 8  ;;  %v7701_v37 = vpop.permute.xlu1 %2915 }
 0x6e2   : > { %2960 = vperm.xlu0 %5695, %v5574_v39  }
 0x6e4   : > { %2799 = vxpose.xlu1.b32.cont [4/16] (narrow) %v5567_v3, 8 }
 0x6e6   : > { %2950 = vperm.xlu0 %5695, %v2733_v42  }
 0x6e8   : > { %2800 = vxpose.xlu1.b32.cont [5/16] (narrow) %v2717_v6, 8 }
 0x6ea   : > { %2970 = vperm.xlu0 %5695, %v2749_v16  }
 0x6ec   : > { %2801 = vxpose.xlu1.b32.cont [6/16] (narrow) %v2720_v20, 8  ;;  %v7703_v11 = vpop.permute.xlu1 %2945 }
 0x6ed   : > { %v2780_v14 = vpop.trf.xlu0 }
 0x6ee   : > { %v7722_v43 = vrot.slane %v2780_v14, %v9035_v47 }
 0x6f0   : > { %2802 = vxpose.xlu1.b32.cont [7/16] (narrow) %v5570_v30, 8  ;;  %v7707_v17 = vpop.permute.xlu1 %2935  ;;  %v2996_v60 = vadd.f32 %v7722_v43, %v2831_v23  ;;  %v2998_v34 = vadd.f32 %v7722_v43, %v2836_v62  ;;  %v3000_v50 = vadd.f32 %v7722_v43, %v2841_v4  ;;  %v3002_v57 = vadd.f32 %v7722_v43, %v2846_v35 }
 0x6f1   : > { %v7732_v0 = vadd.f32 %v7722_v43, %v2851_v26  ;;  %v7735_v25 = vadd.f32 %v7722_v43, %v2856_v53  ;;  %v7739_v1 = vadd.f32 %v7722_v43, %v2861_v41  ;;  %v7743_v52 = vadd.f32 %v7722_v43, %v7689_v9 }
 0x6f2   : > { %v7747_v36 = vadd.f32 %v7722_v43, %v7709_v10  ;;  %v7752_v18 = vadd.f32 %v7722_v43, %v7693_v15  ;;  %v7756_v49 = vadd.f32 %v7722_v43, %v7705_v24  ;;  %vm3060_vm6 = vcmp.gt.f32.partialorder %v2996_v60, 0.0 }
 0x6f3   : > { %vm3062_vm7 = vcmp.gt.f32.partialorder %v2998_v34, 0.0  ;;  %vm3064_vm8 = vcmp.gt.f32.partialorder %v3000_v50, 0.0  ;;  %vm3066_vm9 = vcmp.gt.f32.partialorder %v3002_v57, 0.0  ;;  %v3126_v48 = vmul.f32 0.2, %v2998_v34 }
 0x6f4   : > { %2803 = vxpose.xlu1.b32.cont [8/16] (narrow) %v5571_v29, 8  ;;  %v7761_v21 = vadd.f32 %v7722_v43, %v7691_v32  ;;  %v3124_v31 = vmul.f32 0.2, %v2996_v60  ;;  %v3128_v12 = vmul.f32 0.2, %v3000_v50  ;;  %vm3068_vm11 = vcmp.gt.f32.partialorder %v7732_v0, 0.0 }
 0x6f5   : > { %v3130_v2 = vmul.f32 0.2, %v3002_v57  ;;  %vm3070_vm12 = vcmp.gt.f32.partialorder %v7735_v25, 0.0  ;;  %v3132_v22 = vmul.f32 0.2, %v7732_v0  ;;  %v3190_v6 = vsel %vm3062_vm7, %v2998_v34, %v3126_v48 }
 0x6f6   : > { %v3134_v30 = vmul.f32 0.2, %v7735_v25  ;;  %vm3072_vm15 = vcmp.gt.f32.partialorder %v7739_v1, 0.0  ;;  %vm3074_vm0 = vcmp.gt.f32.partialorder %v7743_v52, 0.0  ;;  %vm3076_vm5 = vcmp.gt.f32.partialorder %v7747_v36, 0.0 }
 0x6f8   : > { %2804 = vxpose.xlu1.b32.cont [9/16] (narrow) %v2733_v42, 8  ;;  %v7772_v42 = vmul.f32 0.2, %v7739_v1 }
 0x6fc   : > { %2805 = vxpose.xlu1.b32.cont [10/16] (narrow) %v2736_v51, 8  ;;  %v7711_v61 = vpop.permute.xlu1 %2965 }
 0x700   : > { %2806 = vxpose.xlu1.b32.cont [11/16] (narrow) %v5574_v39, 8  ;;  %v7715_v38 = vpop.permute.xlu1 %2955 }
 0x704   : > { %2807 = vxpose.xlu1.b32.cont [12/16] (narrow) %v5575_v33, 8  ;;  %v7775_v33 = vmul.f32 0.2, %v7743_v52 }
 0x708   : > { %2808 = vxpose.xlu1.b32.cont [13/16] (narrow) %v2749_v16, 8  ;;  %v3188_v16 = vsel %vm3060_vm6, %v2996_v60, %v3124_v31  ;;  %v3192_v31 = vsel %vm3064_vm8, %v3000_v50, %v3128_v12  ;;  %vm3078_vm6 = vcmp.gt.f32.partialorder %v7752_v18, 0.0 }
 0x70c   : > { %2809 = vxpose.xlu1.b32.cont [14/16] (narrow) %v2752_v46, 8  ;;  %v3194_v46 = vsel %vm3066_vm9, %v3002_v57, %v3130_v2  ;;  %v9042_v2 = vld [vmem:[#allocation29_spill] sm:$0xff]  ;;  %vm3080_vm9 = vcmp.gt.f32.partialorder %v7756_v49, 0.0 }
 0x710   : > { %2810 = vxpose.xlu1.b32.cont [15/16] (narrow) %v7683_v13, 8 }
 0x714   : > { %2811 = vxpose.xlu1.b32.end [16/16] (narrow) %v7685_v54, 8 }
 0x72e   : > { %v7719_v59 = vpop.permute.xlu1 %2975 }
 0x758   : > { %v2812_v44 = vpop.trf.xlu1 }
 0x759   : > { %v7725_v63 = vrot.slane %v2812_v44, %v9035_v47 }
 0x75b   : > { %v2999_v56 = vadd.f32 %v7725_v63, %v2836_v62  ;;  %v2997_v7 = vadd.f32 %v7725_v63, %v2831_v23  ;;  %v3003_v27 = vadd.f32 %v7725_v63, %v2846_v35  ;;  %v3001_v40 = vadd.f32 %v7725_v63, %v2841_v4  ;;  %v9036_v62 = vld [vmem:[#allocation26_spill] sm:$0xff] }
 0x75c   : > { %v3005_v29 = vadd.f32 %v7725_v63, %v2851_v26  ;;  %v3007_v20 = vadd.f32 %v7725_v63, %v2856_v53  ;;  %v3009_v35 = vadd.f32 %v7725_v63, %v2861_v41  ;;  %v3011_v53 = vadd.f32 %v7725_v63, %v7689_v9 }
 0x75d   : > { %v3127_v8 = vmul.f32 0.2, %v2999_v56  ;;  %vm3063_vm10 = vcmp.gt.f32.partialorder %v2999_v56, 0.0  ;;  %v3125_v3 = vmul.f32 0.2, %v2997_v7  ;;  %vm3061_vm13 = vcmp.gt.f32.partialorder %v2997_v7, 0.0 }
 0x75e   : > { %v3131_v39 = vmul.f32 0.2, %v3003_v27  ;;  %vm3067_vm14 = vcmp.gt.f32.partialorder %v3003_v27, 0.0  ;;  %v3129_v4 = vmul.f32 0.2, %v3001_v40  ;;  %vm3065_vm2 = vcmp.gt.f32.partialorder %v3001_v40, 0.0 }
 0x75f   : > { %v3191_v51 = vsel %vm3063_vm10, %v2999_v56, %v3127_v8  ;;  %v3189_v23 = vsel %vm3061_vm13, %v2997_v7, %v3125_v3  ;;  %v9037_v26 = vunpack.c.l.bf16 %v9036_v62  ;;  %v3133_v44 = vmul.f32 0.2, %v3005_v29  ;;  %v9039_v56 = vld [vmem:[#allocation28_spill] sm:$0xff] }
 0x760   : > { %v3135_v47 = vmul.f32 0.2, %v3007_v20  ;;  %v3195_v60 = vsel %vm3067_vm14, %v3003_v27, %v3131_v39  ;;  %v9038_v34 = vunpack.c.h.bf16 %v9036_v62  ;;  %vm3069_vm3 = vcmp.gt.f32.partialorder %v3005_v29, 0.0 }
 0x761   : > { %v7786_v14 = vadd.f32 %v3190_v6, %v9037_v26  ;;  %vm3071_vm4 = vcmp.gt.f32.partialorder %v3007_v20, 0.0  ;;  %v9040_v7 = vunpack.c.l.bf16 %v9039_v56  ;;  %v9041_v9 = vunpack.c.h.bf16 %v9039_v56 }
 0x762   : > { %v7790_v57 = vadd.f32 %v3191_v51, %v9038_v34  ;;  %v3013_v8 = vadd.f32 %v7725_v63, %v7709_v10  ;;  %v3193_v27 = vsel %vm3065_vm2, %v3001_v40, %v3129_v4  ;;  %v9043_v3 = vunpack.c.l.bf16 %v9042_v2 }
 0x763   : > { %v7794_v41 = vadd.f32 %v3188_v16, %v9040_v7  ;;  %v7798_v48 = vadd.f32 %v3189_v23, %v9041_v9  ;;  %v3015_v39 = vadd.f32 %v7725_v63, %v7693_v15  ;;  %v9044_v10 = vunpack.c.h.bf16 %v9042_v2  ;;  %v9045_v15 = vld [vmem:[#allocation30_spill] sm:$0xff] }
 0x764   : > { %v7805_v6 = vadd.f32 %v3194_v46, %v9043_v3  ;;  %v3319_v51 = vmax.f32 %v7786_v14, %v7790_v57  ;;  %v3137_v40 = vmul.f32 0.2, %v3009_v35  ;;  %v3139_v16 = vmul.f32 0.2, %v3011_v53 }
 0x765   : > { %v3316_v50 = vmax.f32 %v7794_v41, %v7798_v48  ;;  %v7817_v12 = vadd.f32 %v3195_v60, %v9044_v10  ;;  %v3197_v46 = vsel %vm3069_vm3, %v3005_v29, %v3133_v44  ;;  %v3199_v4 = vsel %vm3071_vm4, %v3007_v20, %v3135_v47 }
 0x766   : > { %vm3073_vm7 = vcmp.gt.f32.partialorder %v3009_v35, 0.0  ;;  %vm3075_vm8 = vcmp.gt.f32.partialorder %v3011_v53, 0.0  ;;  %3320 = vmax.xlane.f32.xlu1 %v3319_v51  ;;  %v9046_v23 = vunpack.c.l.bf16 %v9045_v15  ;;  %v9047_v26 = vunpack.c.h.bf16 %v9045_v15 }
 0x767   : > { %3317 = vmax.xlane.f32.xlu0 %v3316_v50  ;;  %v3196_v60 = vsel %vm3068_vm11, %v7732_v0, %v3132_v22  ;;  %v3198_v29 = vsel %vm3070_vm12, %v7735_v25, %v3134_v30  ;;  %v3017_v20 = vadd.f32 %v7725_v63, %v7705_v24  ;;  %v3019_v44 = vadd.f32 %v7725_v63, %v7691_v32  ;;  %v9048_v22 = vld [vmem:[#allocation31_spill] sm:$0xff]  ;;  %v9050_v25 = vld [vmem:[#allocation32_spill] sm:$0xff] }
 0x768   : > { %v7823_v62 = vadd.f32 %v3192_v31, %v9046_v23  ;;  %v7827_v34 = vadd.f32 %v3193_v27, %v9047_v26  ;;  %vm3082_vm10 = vcmp.gt.f32.partialorder %v7761_v21, 0.0  ;;  %v3325_v47 = vmax.f32 %v7805_v6, %v7817_v12  ;;  %v9058_v26 = vld [vmem:[#allocation34_spill] sm:$0xff] }
 0x769   : > { %v9049_v56 = vunpack.c.h.bf16 %v9048_v22  ;;  %v9051_v30 = vunpack.c.h.bf16 %v9050_v25  ;;  %v3141_v9 = vmul.f32 0.2, %v3013_v8  ;;  %v3143_v32 = vmul.f32 0.2, %v3015_v39 }
 0x76a   : > { %v3322_v0 = vmax.f32 %v7823_v62, %v7827_v34  ;;  %v3201_v31 = vsel %vm3073_vm7, %v3009_v35, %v3137_v40  ;;  %v3203_v27 = vsel %vm3075_vm8, %v3011_v53, %v3139_v16  ;;  %vm3077_vm11 = vcmp.gt.f32.partialorder %v3013_v8, 0.0  ;;  %3326 = vmax.xlane.f32.xlu1 %v3325_v47 }
 0x76b   : > { %v7847_v7 = vadd.f32 %v3199_v4, %v9049_v56  ;;  %v7851_v24 = vadd.f32 %v3197_v46, %v9051_v30  ;;  %vm3079_vm12 = vcmp.gt.f32.partialorder %v3015_v39, 0.0  ;;  %v9052_v2 = vunpack.c.l.bf16 %v9048_v22  ;;  %v9055_v4 = vld [vmem:[#allocation33_spill] sm:$0xff] }
 0x76c   : > { %3323 = vmax.xlane.f32.xlu0 %v3322_v0  ;;  %v9053_v51 = vunpack.c.l.bf16 %v9050_v25  ;;  %v3140_v10 = vmul.f32 0.2, %v7747_v36  ;;  %v3142_v46 = vmul.f32 0.2, %v7752_v18  ;;  %v3200_v35 = vsel %vm3072_vm15, %v7739_v1, %v7772_v42 }
 0x76d   : > { %v7857_v3 = vadd.f32 %v3198_v29, %v9052_v2  ;;  %v3202_v53 = vsel %vm3074_vm0, %v7743_v52, %v7775_v33  ;;  %v9056_v15 = vunpack.c.h.bf16 %v9055_v4  ;;  %v3145_v1 = vmul.f32 0.2, %v3017_v20 }
 0x76e   : > { %v7861_v50 = vadd.f32 %v3196_v60, %v9053_v51  ;;  %v9059_v60 = vunpack.c.h.bf16 %v9058_v26  ;;  %v3147_v42 = vmul.f32 0.2, %v3019_v44  ;;  %v3205_v47 = vsel %vm3077_vm11, %v3013_v8, %v3141_v9  ;;  %v9068_v51 = vld [vmem:[#allocation37_spill] sm:$0xff] }
 0x76f   : > { %v3331_v40 = vmax.f32 %v7857_v3, %v7847_v7  ;;  %v7879_v23 = vadd.f32 %v3203_v27, %v9056_v15  ;;  %v3207_v52 = vsel %vm3079_vm12, %v3015_v39, %v3143_v32  ;;  %vm3081_vm13 = vcmp.gt.f32.partialorder %v3017_v20, 0.0 }
 0x770   : > { %9054 = vst [vmem:[#allocation24_spill] sm:$0xff] %v7861_v50  ;;  %v3328_v16 = vmax.f32 %v7861_v50, %v7851_v24  ;;  %v7883_v29 = vadd.f32 %v3201_v31, %v9059_v60  ;;  %vm3083_vm14 = vcmp.gt.f32.partialorder %v3019_v44, 0.0  ;;  %v9061_v33 = vunpack.c.l.bf16 %v9055_v4  ;;  %v9065_v31 = vld [vmem:[#allocation36_spill] sm:$0xff] }
 0x771   : > { %9057 = vst [vmem:[#allocation35_spill] sm:$0xff] %v7879_v23  ;;  %3332 = vmax.xlane.f32.xlu1 %v3331_v40  ;;  %v9063_v22 = vunpack.c.l.bf16 %v9058_v26  ;;  %v3144_v25 = vmul.f32 0.2, %v7756_v49  ;;  %v3146_v30 = vmul.f32 0.2, %v7761_v21  ;;  %v3204_v8 = vsel %vm3076_vm5, %v7747_v36, %v3140_v10  ;;  %v9075_v26 = vld [vmem:[#allocation38_spill] sm:$0xff] }
 0x772   : > { %9060 = vst [vmem:[#allocation7_spill] sm:$0xff] %v7883_v29  ;;  %3329 = vmax.xlane.f32.xlu0 %v3328_v16  ;;  %v7889_v0 = vadd.f32 %v3202_v53, %v9061_v33  ;;  %v3206_v39 = vsel %vm3078_vm6, %v7752_v18, %v3142_v46  ;;  %v9066_v27 = vunpack.c.h.bf16 %v9065_v31  ;;  %v3209_v40 = vsel %vm3081_vm13, %v3017_v20, %v3145_v1 }
 0x773   : > { %v7893_v56 = vadd.f32 %v3200_v35, %v9063_v22  ;;  %v9069_v35 = vunpack.c.h.bf16 %v9068_v51  ;;  %v3211_v36 = vsel %vm3083_vm14, %v3019_v44, %v3147_v42  ;;  %v9071_v18 = vunpack.c.l.bf16 %v9065_v31  ;;  %v9078_v42 = vld [vmem:[#allocation41_spill] sm:$0xff] }
 0x774   : > { %9062 = vst [vmem:[#allocation39_spill] sm:$0xff] %v7889_v0  ;;  %v3337_v9 = vmax.f32 %v7889_v0, %v7879_v23  ;;  %v7909_v2 = vadd.f32 %v3207_v52, %v9066_v27  ;;  %v9073_v46 = vunpack.c.l.bf16 %v9068_v51  ;;  %v3208_v4 = vsel %vm3080_vm9, %v7756_v49, %v3144_v25 }
 0x775   : > { %9064 = vst [vmem:[#allocation40_spill] sm:$0xff] %v7893_v56  ;;  %v3334_v32 = vmax.f32 %v7893_v56, %v7883_v29  ;;  %v7913_v53 = vadd.f32 %v3205_v47, %v9069_v35  ;;  %v7917_v10 = vadd.f32 %v3206_v39, %v9071_v18  ;;  %v3210_v15 = vsel %vm3082_vm10, %v7761_v21, %v3146_v30 }
 0x776   : > { %9067 = vst [vmem:[#allocation43_spill] sm:$0xff] %v7909_v2  ;;  %3338 = vmax.xlane.f32.xlu1 %v3337_v9  ;;  %v7921_v16 = vadd.f32 %v3204_v8, %v9073_v46  ;;  %v9076_v60 = vunpack.c.h.bf16 %v9075_v26  ;;  %v9079_v47 = vunpack.c.h.bf16 %v9078_v42  ;;  %v9081_v49 = vunpack.c.l.bf16 %v9075_v26  ;;  %v2921_v8 = vpop.permute.xlu0 %2920 }
 0x777   : > { %9070 = vst [vmem:[#allocation44_spill] sm:$0xff] %v7913_v53  ;;  %3335 = vmax.xlane.f32.xlu0 %v3334_v32  ;;  %9072 = vst [vmem:[#allocation46_spill] sm:$0xff] %v7917_v10  ;;  %v3343_v20 = vmax.f32 %v7917_v10, %v7909_v2  ;;  %v9083_v21 = vunpack.c.l.bf16 %v9078_v42  ;;  %v3020_v9 = vadd.f32 %v7722_v43, %v7717_v45 }
 0x778   : > { %9074 = vst [vmem:[#allocation45_spill] sm:$0xff] %v7921_v16  ;;  %v3340_v44 = vmax.f32 %v7921_v16, %v7913_v53  ;;  %v7935_v1 = vadd.f32 %v3211_v36, %v9076_v60  ;;  %v7939_v52 = vadd.f32 %v3209_v40, %v9079_v47  ;;  %v7943_v33 = vadd.f32 %v3210_v15, %v9081_v49  ;;  %v9094_v53 = vld [vmem:[#allocation70_spill] sm:$0xff] }
 0x779   : > { %v7947_v22 = vadd.f32 %v3208_v4, %v9083_v21  ;;  %v3022_v32 = vadd.f32 %v7722_v43, %v7697_v58  ;;  %v3024_v31 = vadd.f32 %v7722_v43, %v7713_v55  ;;  %v3038_v27 = vadd.f32 %v7722_v43, %v7707_v17 }
 0x77a   : > { %9077 = vst [vmem:[#allocation47_spill] sm:$0xff] %v7935_v1  ;;  %9080 = vst [vmem:[#allocation48_spill] sm:$0xff] %v7939_v52  ;;  %3344 = vmax.xlane.f32.xlu1 %v3343_v20  ;;  %v3349_v25 = vmax.f32 %v7943_v33, %v7935_v1  ;;  %v2911_v39 = vpop.permute.xlu0 %2910  ;;  %v3026_v51 = vadd.f32 %v7722_v43, %v7695_v19  ;;  %v3042_v35 = vadd.f32 %v7722_v43, %v7703_v11 }
 0x77b   : > { %3341 = vmax.xlane.f32.xlu0 %v3340_v44  ;;  %9082 = vst [vmem:[#allocation50_spill] sm:$0xff] %v7943_v33  ;;  %9084 = vst [vmem:[#allocation52_spill] sm:$0xff] %v7947_v22  ;;  %v3346_v30 = vmax.f32 %v7947_v22, %v7939_v52  ;;  %vm3084_vm15 = vcmp.gt.f32.partialorder %v3020_v9, 0.0  ;;  %vm3086_vm0 = vcmp.gt.f32.partialorder %v3022_v32, 0.0  ;;  %vm3088_vm2 = vcmp.gt.f32.partialorder %v3024_v31, 0.0 }
 0x77c   : > { %v3150_v40 = vmul.f32 0.2, %v3022_v32  ;;  %v3148_v36 = vmul.f32 0.2, %v3020_v9  ;;  %v3152_v18 = vmul.f32 0.2, %v3024_v31  ;;  %v3021_v42 = vadd.f32 %v7725_v63, %v7717_v45 }
 0x77d   : > { %v3166_v46 = vmul.f32 0.2, %v3038_v27  ;;  %vm3090_vm3 = vcmp.gt.f32.partialorder %v3026_v51, 0.0  ;;  %v3154_v15 = vmul.f32 0.2, %v3026_v51  ;;  %vm3102_vm4 = vcmp.gt.f32.partialorder %v3038_v27, 0.0 }
 0x77e   : > { %3350 = vmax.xlane.f32.xlu1 %v3349_v25  ;;  %v7971_v4 = vpop.permute.xlu0 %2940  ;;  %v3170_v26 = vmul.f32 0.2, %v3042_v35  ;;  %vm3106_vm7 = vcmp.gt.f32.partialorder %v3042_v35, 0.0  ;;  %v3214_v60 = vsel %vm3086_vm0, %v3022_v32, %v3150_v40  ;;  %v3023_v47 = vadd.f32 %v7725_v63, %v7697_v58 }
 0x77f   : > { %3347 = vmax.xlane.f32.xlu0 %v3346_v30  ;;  %v7978_v49 = vsel %vm3102_vm4, %v3038_v27, %v3166_v46  ;;  %v3212_v21 = vsel %vm3084_vm15, %v3020_v9, %v3148_v36  ;;  %v3216_v25 = vsel %vm3088_vm2, %v3024_v31, %v3152_v18  ;;  %v3218_v30 = vsel %vm3090_vm3, %v3026_v51, %v3154_v15  ;;  %v9085_v27 = vld [vmem:[#allocation6_spill] sm:$0xff] }
 0x780   : > { %v3032_v33 = vadd.f32 %v7722_v43, %v2921_v8  ;;  %v3028_v28 = vadd.f32 %v7722_v43, %v2911_v39  ;;  %v7984_v32 = vsel %vm3106_vm7, %v3042_v35, %v3170_v26  ;;  %v7988_v45 = vadd.f32 %v7722_v43, %v7715_v38  ;;  %v9090_v18 = vld [vmem:[#allocation66_spill] sm:$0xff] }
 0x781   : > { %v9086_v40 = vunpack.c.l.bf16 %v9085_v27  ;;  %v3025_v9 = vadd.f32 %v7725_v63, %v7713_v55  ;;  %v3029_v31 = vadd.f32 %v7725_v63, %v2911_v39  ;;  %v3149_v51 = vmul.f32 0.2, %v3021_v42 }
 0x782   : > { %v2931_v58 = vpop.permute.xlu0 %2930  ;;  %vm3085_vm8 = vcmp.gt.f32.partialorder %v3021_v42, 0.0  ;;  %vm3087_vm9 = vcmp.gt.f32.partialorder %v3023_v47, 0.0  ;;  %v9091_v15 = vunpack.c.l.bf16 %v9090_v18  ;;  %vm3096_vm10 = vcmp.gt.f32.partialorder %v3032_v33, 0.0 }
 0x783   : > { %v7992_v46 = vadd.f32 %v3214_v60, %v9086_v40  ;;  %v3156_v26 = vmul.f32 0.2, %v3028_v28  ;;  %v9092_v60 = vld [vmem:[#allocation68_spill] sm:$0xff]  ;;  %vm3092_vm11 = vcmp.gt.f32.partialorder %v3028_v28, 0.0  ;;  %v3040_v39 = vadd.f32 %v7722_v43, %v7971_v4 }
 0x784   : > { %v9093_v40 = vunpack.c.l.bf16 %v9092_v60  ;;  %v3027_v1 = vadd.f32 %v7725_v63, %v7695_v19  ;;  %v3157_v16 = vmul.f32 0.2, %v3029_v31  ;;  %vm3089_vm12 = vcmp.gt.f32.partialorder %v3025_v9, 0.0 }
 0x785   : > { %vm3093_vm13 = vcmp.gt.f32.partialorder %v3029_v31, 0.0  ;;  %v9095_v2 = vunpack.c.l.bf16 %v9094_v53  ;;  %v3220_v19 = vsel %vm3092_vm11, %v3028_v28, %v3156_v26  ;;  %v3037_v23 = vadd.f32 %v7725_v63, %v2931_v58 }
 0x786   : > { %v8007_v55 = vadd.f32 %v3218_v30, %v9093_v40  ;;  %v2961_v10 = vpop.permute.xlu0 %2960  ;;  %v9096_v40 = vld [vmem:[#allocation72_spill] sm:$0xff]  ;;  %vm3104_vm14 = vcmp.gt.f32.partialorder %v3040_v39, 0.0  ;;  %v3221_v28 = vsel %vm3093_vm13, %v3029_v31, %v3157_v16  ;;  %vm3091_vm15 = vcmp.gt.f32.partialorder %v3027_v1, 0.0 }
 0x787   : > { %v9097_v56 = vunpack.c.l.bf16 %v9096_v40  ;;  %vm3101_vm3 = vcmp.gt.f32.partialorder %v3037_v23, 0.0  ;;  %v9103_v31 = vunpack.c.h.bf16 %v9090_v18 }
 0x78f   : > { %2985 = vperm.xlu1 %5694, %v7685_v54   ;;  %v3030_v54 = vadd.f32 %v7722_v43, %v7701_v37 }
 0x791   : > { %v3158_v20 = vmul.f32 0.2, %v3030_v54  ;;  %vm3094_vm5 = vcmp.gt.f32.partialorder %v3030_v54, 0.0 }
 0x793   : > { %v3222_v22 = vsel %vm3094_vm5, %v3030_v54, %v3158_v20  ;;  %v3151_v54 = vmul.f32 0.2, %v3023_v47  ;;  %v8003_v20 = vadd.f32 %v3216_v25, %v9091_v15  ;;  %v3213_v25 = vsel %vm3085_vm8, %v3021_v42, %v3149_v51 }
 0x794   : > { %v8016_v30 = vadd.f32 %v3222_v22, %v9095_v2  ;;  %v3031_v42 = vadd.f32 %v7725_v63, %v7701_v37 }
 0x795   : > { %2980 = vperm.xlu0 %5695, %v7683_v13   ;;  %v3034_v13 = vadd.f32 %v7722_v43, %v7699_v5  ;;  %v3215_v15 = vsel %vm3087_vm9, %v3023_v47, %v3151_v54  ;;  %v9098_v47 = vunpack.c.h.bf16 %v9085_v27  ;;  %v3168_v54 = vmul.f32 0.2, %v3040_v39 }
 0x796   : > { %v3165_v27 = vmul.f32 0.2, %v3037_v23  ;;  %vm3095_vm4 = vcmp.gt.f32.partialorder %v3031_v42, 0.0 }
 0x797   : > { %vm3098_vm6 = vcmp.gt.f32.partialorder %v3034_v13, 0.0  ;;  %v3162_v44 = vmul.f32 0.2, %v3034_v13  ;;  %v8029_v51 = vadd.f32 %v3215_v15, %v9098_v47  ;;  %v3159_v15 = vmul.f32 0.2, %v3031_v42 }
 0x798   : > { %v3232_v50 = vsel %vm3104_vm14, %v3040_v39, %v3168_v54 }
 0x799   : > { %v3226_v52 = vsel %vm3098_vm6, %v3034_v13, %v3162_v44  ;;  %v9087_v13 = vld [vmem:[#allocation64_spill] sm:$0xff]  ;;  %v3160_v44 = vmul.f32 0.2, %v3032_v33  ;;  %v3223_v54 = vsel %vm3095_vm4, %v3031_v42, %v3159_v15 }
 0x79a   : > { %v9088_v35 = vunpack.c.l.bf16 %v9087_v13  ;;  %v8020_v0 = vadd.f32 %v3226_v52, %v9097_v56  ;;  %v9099_v2 = vunpack.c.h.bf16 %v9087_v13  ;;  %v3155_v56 = vmul.f32 0.2, %v3027_v1 }
 0x79b   : > { %v3224_v29 = vsel %vm3096_vm10, %v3032_v33, %v3160_v44  ;;  %v2951_v44 = vpop.permute.xlu0 %2950  ;;  %v3355_v13 = vmax.f32 %v7992_v46, %v8029_v51 }
 0x79c   : > { %v7999_v36 = vadd.f32 %v3212_v21, %v9088_v35  ;;  %v3033_v21 = vadd.f32 %v7725_v63, %v2921_v8  ;;  %v3153_v35 = vmul.f32 0.2, %v3025_v9  ;;  %v3036_v8 = vadd.f32 %v7722_v43, %v2931_v58 }
 0x79d   : > { %v8033_v22 = vadd.f32 %v3213_v25, %v9099_v2  ;;  %v3035_v58 = vadd.f32 %v7725_v63, %v7699_v5  ;;  %v9101_v25 = vld [vmem:[#allocation65_spill] sm:$0xff]  ;;  %v3219_v47 = vsel %vm3091_vm15, %v3027_v1, %v3155_v56  ;;  %v3229_v1 = vsel %vm3101_vm3, %v3037_v23, %v3165_v27 }
 0x79e   : > { %9089 = vst [vmem:[#allocation49_spill] sm:$0xff] %v7999_v36  ;;  %v3161_v52 = vmul.f32 0.2, %v3033_v21  ;;  %v3217_v33 = vsel %vm3089_vm12, %v3025_v9, %v3153_v35  ;;  %vm3097_vm0 = vcmp.gt.f32.partialorder %v3033_v21, 0.0  ;;  %vm3100_vm2 = vcmp.gt.f32.partialorder %v3036_v8, 0.0 }
 0x79f   : > { %9100 = vst [vmem:[#allocation51_spill] sm:$0xff] %v8033_v22  ;;  %v3164_v37 = vmul.f32 0.2, %v3036_v8  ;;  %v3352_v26 = vmax.f32 %v7999_v36, %v8033_v22  ;;  %v9102_v9 = vunpack.c.h.bf16 %v9101_v25  ;;  %v8047_v5 = vadd.f32 %v3217_v33, %v9103_v31  ;;  %v2971_v42 = vpop.permute.xlu0 %2970 }
 0x7a0   : > { %v3041_v35 = vadd.f32 %v7725_v63, %v7971_v4  ;;  %v3225_v2 = vsel %vm3097_vm0, %v3033_v21, %v3161_v52  ;;  %v9104_v22 = vunpack.c.l.bf16 %v9101_v25  ;;  %v3039_v33 = vadd.f32 %v7725_v63, %v7707_v17 }
 0x7a1   : > { %v8043_v16 = vadd.f32 %v3221_v28, %v9102_v9  ;;  %v9105_v28 = vld [vmem:[#allocation67_spill] sm:$0xff]  ;;  %v3228_v4 = vsel %vm3100_vm2, %v3036_v8, %v3164_v37  ;;  %v3044_v39 = vadd.f32 %v7722_v43, %v2951_v44  ;;  %v3163_v17 = vmul.f32 0.2, %v3035_v58 }
 0x7a2   : > { %v8054_v36 = vadd.f32 %v3220_v19, %v9104_v22  ;;  %v9106_v9 = vunpack.c.l.bf16 %v9105_v28  ;;  %v3358_v19 = vmax.f32 %v8003_v20, %v8047_v5  ;;  %v9107_v22 = vunpack.c.h.bf16 %v9105_v28 }
 0x7a3   : > { %v3169_v8 = vmul.f32 0.2, %v3041_v35  ;;  %v3045_v23 = vadd.f32 %v7725_v63, %v2951_v44  ;;  %v3043_v37 = vadd.f32 %v7725_v63, %v7703_v11  ;;  %vm3099_vm5 = vcmp.gt.f32.partialorder %v3035_v58, 0.0 }
 0x7a4   : > { %v8058_v18 = vadd.f32 %v3224_v29, %v9106_v9  ;;  %v3364_v21 = vmax.f32 %v8054_v36, %v8043_v16  ;;  %v8071_v56 = vadd.f32 %v3225_v2, %v9107_v22  ;;  %v9108_v29 = vunpack.c.h.bf16 %v9092_v60 }
 0x7a5   : > { %vm3105_vm6 = vcmp.gt.f32.partialorder %v3041_v35, 0.0  ;;  %v3048_v27 = vadd.f32 %v7722_v43, %v2961_v10  ;;  %vm3108_vm7 = vcmp.gt.f32.partialorder %v3044_v39, 0.0  ;;  %v3172_v60 = vmul.f32 0.2, %v3044_v39 }
 0x7a6   : > { %v8075_v52 = vadd.f32 %v3219_v47, %v9108_v29  ;;  %v3370_v44 = vmax.f32 %v8058_v18, %v8071_v56  ;;  %v9112_v2 = vunpack.c.h.bf16 %v9094_v53  ;;  %v3167_v28 = vmul.f32 0.2, %v3039_v33 }
 0x7a7   : > { %v3227_v9 = vsel %vm3099_vm5, %v3035_v58, %v3163_v17  ;;  %vm3103_vm8 = vcmp.gt.f32.partialorder %v3039_v33, 0.0  ;;  %v3171_v22 = vmul.f32 0.2, %v3043_v37  ;;  %vm3109_vm9 = vcmp.gt.f32.partialorder %v3045_v23, 0.0 }
 0x7a8   : > { %v3361_v11 = vmax.f32 %v8007_v55, %v8075_v52  ;;  %vm3112_vm10 = vcmp.gt.f32.partialorder %v3048_v27, 0.0  ;;  %v3176_v29 = vmul.f32 0.2, %v3048_v27  ;;  %v3052_v53 = vadd.f32 %v7722_v43, %v2971_v42 }
 0x7a9   : > { %vm3107_vm11 = vcmp.gt.f32.partialorder %v3043_v37, 0.0  ;;  %vm3110_vm0 = vcmp.gt.f32.partialorder %v7988_v45, 0.0 }
 0x7aa   : > { %vm3116_vm13 = vcmp.gt.f32.partialorder %v3052_v53, 0.0 }
 0x7b3   : > { %3356 = vmax.xlane.f32.xlu1 %v3355_v13  ;;  %v3049_v13 = vadd.f32 %v7725_v63, %v2961_v10  ;;  %v8096_v10 = vadd.f32 %v3223_v54, %v9112_v2 }
 0x7b4   : > { %3353 = vmax.xlane.f32.xlu0 %v3352_v26  ;;  %v9109_v26 = vld [vmem:[#allocation69_spill] sm:$0xff] }
 0x7b5   : > { %v9110_v25 = vunpack.c.l.bf16 %v9109_v26  ;;  %v9111_v15 = vunpack.c.h.bf16 %v9109_v26  ;;  %v3367_v58 = vmax.f32 %v8016_v30, %v8096_v10  ;;  %vm3113_vm12 = vcmp.gt.f32.partialorder %v3049_v13, 0.0 }
 0x7b7   : > { %3365 = vmax.xlane.f32.xlu1 %v3364_v21  ;;  %v8084_v31 = vadd.f32 %v3228_v4, %v9110_v25  ;;  %v8092_v47 = vadd.f32 %v3229_v1, %v9111_v15  ;;  %v3233_v21 = vsel %vm3105_vm6, %v3041_v35, %v3169_v8  ;;  %v3173_v4 = vmul.f32 0.2, %v3045_v23  ;;  %v9113_v35 = vld [vmem:[#allocation71_spill] sm:$0xff] }
 0x7b8   : > { %3359 = vmax.xlane.f32.xlu0 %v3358_v19  ;;  %v3047_v19 = vadd.f32 %v7725_v63, %v7715_v38  ;;  %v3236_v1 = vsel %vm3108_vm7, %v3044_v39, %v3172_v60  ;;  %v9114_v17 = vunpack.c.h.bf16 %v9113_v35  ;;  %v9115_v8 = vunpack.c.h.bf16 %v9096_v40 }
 0x7b9   : > { %v3376_v54 = vmax.f32 %v8084_v31, %v8092_v47  ;;  %v3177_v25 = vmul.f32 0.2, %v3049_v13  ;;  %v3053_v39 = vadd.f32 %v7725_v63, %v2971_v42  ;;  %v3051_v60 = vadd.f32 %v7725_v63, %v7711_v61 }
 0x7ba   : > { %v8108_v38 = vadd.f32 %v3233_v21, %v9114_v17  ;;  %v8112_v26 = vadd.f32 %v3227_v9, %v9115_v8  ;;  %v9116_v15 = vunpack.c.l.bf16 %v9113_v35  ;;  %v3240_v40 = vsel %vm3112_vm10, %v3048_v27, %v3176_v29  ;;  %v9117_v21 = vld [vmem:[#allocation5_spill] sm:$0xff] }
 0x7bb   : > { %3371 = vmax.xlane.f32.xlu1 %v3370_v44  ;;  %v3231_v44 = vsel %vm3103_vm8, %v3039_v33, %v3167_v28  ;;  %v3180_v9 = vmul.f32 0.2, %v3052_v53  ;;  %v9118_v33 = vunpack.c.l.bf16 %v9117_v21  ;;  %v3175_v27 = vmul.f32 0.2, %v3047_v19 }
 0x7bc   : > { %3362 = vmax.xlane.f32.xlu0 %v3361_v11  ;;  %v3237_v11 = vsel %vm3109_vm9, %v3045_v23, %v3173_v4  ;;  %v8119_v2 = vadd.f32 %v3232_v50, %v9116_v15  ;;  %v3373_v28 = vmax.f32 %v8020_v0, %v8112_v26  ;;  %v9119_v4 = vunpack.c.h.bf16 %v9117_v21  ;;  %v9120_v50 = vld [vmem:[#allocation73_spill] sm:$0xff] }
 0x7bd   : > { %v8124_v23 = vadd.f32 %v3236_v1, %v9118_v33  ;;  %v3241_v29 = vsel %vm3113_vm12, %v3049_v13, %v3177_v25  ;;  %v3235_v17 = vsel %vm3107_vm11, %v3043_v37, %v3171_v22  ;;  %v3181_v8 = vmul.f32 0.2, %v3053_v39  ;;  %v9123_v37 = vld [vmem:[#allocation74_spill] sm:$0xff] }
 0x7be   : > { %v3382_v42 = vmax.f32 %v8119_v2, %v8108_v38  ;;  %v3050_v1 = vadd.f32 %v7722_v43, %v7711_v61  ;;  %vm3111_vm14 = vcmp.gt.f32.partialorder %v3047_v19, 0.0  ;;  %vm3117_vm15 = vcmp.gt.f32.partialorder %v3053_v39, 0.0 }
 0x7bf   : > { %3377 = vmax.xlane.f32.xlu1 %v3376_v54  ;;  %v8132_v54 = vadd.f32 %v3237_v11, %v9119_v4  ;;  %v9122_v15 = vunpack.c.l.bf16 %v9120_v50  ;;  %v3244_v13 = vsel %vm3116_vm13, %v3052_v53, %v3180_v9  ;;  %v9124_v22 = vunpack.c.l.bf16 %v9123_v37 }
 0x7c0   : > { %3368 = vmax.xlane.f32.xlu0 %v3367_v58  ;;  %v9121_v58 = vunpack.c.h.bf16 %v9120_v50  ;;  %v9125_v33 = vunpack.c.h.bf16 %v9123_v37  ;;  %v3055_v53 = vadd.f32 %v7725_v63, %v7719_v59  ;;  %v3179_v9 = vmul.f32 0.2, %v3051_v60 }
 0x7c1   : > { %v8143_v11 = vadd.f32 %v7978_v49, %v9122_v15  ;;  %v8150_v25 = vadd.f32 %v3240_v40, %v9124_v22  ;;  %v3388_v61 = vmax.f32 %v8124_v23, %v8132_v54  ;;  %v3239_v40 = vsel %vm3111_vm14, %v3047_v19, %v3175_v27  ;;  %v9130_v22 = vld [vmem:[#allocation76_spill] sm:$0xff] }
 0x7c2   : > { %v8136_v35 = vadd.f32 %v3231_v44, %v9121_v58  ;;  %v3174_v44 = vmul.f32 0.2, %v7988_v45  ;;  %v8158_v49 = vadd.f32 %v3241_v29, %v9125_v33  ;;  %v3245_v50 = vsel %vm3117_vm15, %v3053_v39, %v3181_v8 }
 0x7c3   : > { %3383 = vmax.xlane.f32.xlu1 %v3382_v42  ;;  %v9126_v42 = vld [vmem:[#allocation75_spill] sm:$0xff]  ;;  %vm3114_vm2 = vcmp.gt.f32.partialorder %v3050_v1, 0.0  ;;  %vm3115_vm3 = vcmp.gt.f32.partialorder %v3051_v60, 0.0  ;;  %v3178_v29 = vmul.f32 0.2, %v3050_v1  ;;  %v3054_v37 = vadd.f32 %v7722_v43, %v7719_v59 }
 0x7c4   : > { %3374 = vmax.xlane.f32.xlu0 %v3373_v28  ;;  %v3379_v21 = vmax.f32 %v8143_v11, %v8136_v35  ;;  %v9127_v28 = vunpack.c.h.bf16 %v9126_v42  ;;  %v9129_v58 = vunpack.c.l.bf16 %v9126_v42  ;;  %v9131_v19 = vunpack.c.l.bf16 %v9130_v22 }
 0x7c5   : > { %v3394_v27 = vmax.f32 %v8150_v25, %v8158_v49  ;;  %v3243_v59 = vsel %vm3115_vm3, %v3051_v60, %v3179_v9  ;;  %vm3119_vm4 = vcmp.gt.f32.partialorder %v3055_v53, 0.0  ;;  %vm3118_vm5 = vcmp.gt.f32.partialorder %v3054_v37, 0.0 }
 0x7c6   : > { %v8162_v4 = vadd.f32 %v3235_v17, %v9127_v28  ;;  %v8169_v15 = vadd.f32 %v7984_v32, %v9129_v58  ;;  %v3238_v17 = vsel %vm3110_vm0, %v7988_v45, %v3174_v44  ;;  %v8178_v39 = vadd.f32 %v3244_v13, %v9131_v19 }
 0x7c7   : > { %3389 = vmax.xlane.f32.xlu1 %v3388_v61  ;;  %v9133_v32 = vunpack.c.h.bf16 %v9130_v22  ;;  %v3183_v44 = vmul.f32 0.2, %v3055_v53  ;;  %v3242_v28 = vsel %vm3114_vm2, %v3050_v1, %v3178_v29  ;;  %v3182_v58 = vmul.f32 0.2, %v3054_v37  ;;  %v9140_v22 = vld [vmem:[#allocation17_spill] sm:$0xff] }
 0x7c8   : > { %9128 = vst [vmem:[#allocation54_spill] sm:$0xff] %v8162_v4  ;;  %3380 = vmax.xlane.f32.xlu0 %v3379_v21  ;;  %9132 = vst [vmem:[#allocation56_spill] sm:$0xff] %v8178_v39  ;;  %v3385_v8 = vmax.f32 %v8169_v15, %v8162_v4  ;;  %v9135_v21 = vld [vmem:[#allocation8_spill] sm:$0xff]  ;;  %v9141_v19 = vunpack.c.h.bf16 %v9140_v22 }
 0x7c9   : > { %v8186_v61 = vadd.f32 %v3245_v50, %v9133_v32  ;;  %v9136_v33 = vunpack.c.h.bf16 %v9135_v21  ;;  %v9138_v13 = vunpack.c.l.bf16 %v9135_v21  ;;  %v3247_v9 = vsel %vm3119_vm4, %v3055_v53, %v3183_v44 }
 0x7ca   : > { %v8203_v60 = vadd.f32 %v3243_v59, %v9141_v19  ;;  %v3246_v1 = vsel %vm3118_vm5, %v3054_v37, %v3182_v58 }
 0x7cb   : > { %9134 = vst [vmem:[#allocation53_spill] sm:$0xff] %v8186_v61  ;;  %v8190_v45 = vadd.f32 %v3239_v40, %v9136_v33  ;;  %3395 = vmax.xlane.f32.xlu1 %v3394_v27  ;;  %v8194_v42 = vadd.f32 %v3238_v17, %v9138_v13  ;;  %v3400_v50 = vmax.f32 %v8178_v39, %v8186_v61  ;;  %v9143_v17 = vunpack.c.l.bf16 %v9140_v22 }
 0x7cc   : > { %3386 = vmax.xlane.f32.xlu0 %v3385_v8  ;;  %9142 = vst [vmem:[#allocation59_spill] sm:$0xff] %v8203_v60  ;;  %v9145_v8 = vld [vmem:[#allocation16_spill] sm:$0xff] }
 0x7cd   : > { %9137 = vst [vmem:[#allocation55_spill] sm:$0xff] %v8190_v45  ;;  %9139 = vst [vmem:[#allocation58_spill] sm:$0xff] %v8194_v42  ;;  %v3391_v40 = vmax.f32 %v8194_v42, %v8190_v45  ;;  %v8207_v27 = vadd.f32 %v3242_v28, %v9143_v17  ;;  %v9146_v32 = vunpack.c.h.bf16 %v9145_v8  ;;  %v9148_v33 = vunpack.c.l.bf16 %v9145_v8  ;;  %v9164_v42 = vld [vmem:[#allocation20_spill] sm:$0xff] }
 0x7ce   : > { %v9165_v39 = vunpack.c.l.bf16 %v9164_v42 }
 0x7cf   : > { %3401 = vmax.xlane.f32.xlu1 %v3400_v50  ;;  %9144 = vst [vmem:[#allocation57_spill] sm:$0xff] %v8207_v27  ;;  %v3397_v29 = vmax.f32 %v8207_v27, %v8203_v60  ;;  %v8213_v21 = vadd.f32 %v3247_v9, %v9146_v32  ;;  %v8217_v59 = vadd.f32 %v3246_v1, %v9148_v33 }
 0x7d0   : > { %3392 = vmax.xlane.f32.xlu0 %v3391_v40 }
 0x7d1   : > { %9147 = vst [vmem:[#allocation61_spill] sm:$0xff] %v8213_v21  ;;  %9149 = vst [vmem:[#allocation60_spill] sm:$0xff] %v8217_v59  ;;  %v3403_v53 = vmax.f32 %v8217_v59, %v8213_v21 }
 0x7d4   : > { %3398 = vmax.xlane.f32.xlu0 %v3397_v29 }
 0x7d8   : > { %3404 = vmax.xlane.f32.xlu0 %v3403_v53 }
 0x7f3   : > { %v3321_v44 = vpop.xlane.xlu1 %3320 }
 0x7f4   : > { %v3318_v13 = vpop.xlane.xlu0 %3317  ;;  %v3414_v37 = vsub.f32 %v7786_v14, %v3321_v44  ;;  %v3415_v28 = vsub.f32 %v7790_v57, %v3321_v44 }
 0x7f5   : > { %v3412_v58 = vsub.f32 %v7794_v41, %v3318_v13  ;;  %v3413_v50 = vsub.f32 %v7798_v48, %v3318_v13 }
 0x7f6   : > { %v3480_v40 = vmul.f32 1.442695, %v3414_v37  ;;  %v3482_v22 = vmul.f32 1.442695, %v3415_v28 }
 0x7f7   : > { %v3476_v19 = vmul.f32 1.442695, %v3412_v58  ;;  %v3478_v9 = vmul.f32 1.442695, %v3413_v50  ;;  %v3327_v17 = vpop.xlane.xlu1 %3326  ;;  %v9150_v50 = vld [vmem:[#allocation24_spill] sm:$0xff] }
 0x7f8   : > { %5899 = vpow2.f32 %v3480_v40  ;;  %v3419_v29 = vsub.f32 %v7817_v12, %v3327_v17  ;;  %v3418_v8 = vsub.f32 %v7805_v6, %v3327_v17  ;;  %v9152_v17 = vld [vmem:[#allocation7_spill] sm:$0xff] }
 0x7f9   : > { %v3324_v1 = vpop.xlane.xlu0 %3323  ;;  %5901 = vpow2.f32 %v3482_v22 }
 0x7fa   : > { %v3417_v14 = vsub.f32 %v7827_v34, %v3324_v1  ;;  %5903 = vpow2.f32 %v3476_v19  ;;  %v3490_v57 = vmul.f32 1.442695, %v3419_v29  ;;  %v3416_v41 = vsub.f32 %v7823_v62, %v3324_v1 }
 0x7fb   : > { %5905 = vpow2.f32 %v3478_v9  ;;  %v3488_v44 = vmul.f32 1.442695, %v3418_v8  ;;  %v9153_v8 = vld [vmem:[#allocation39_spill] sm:$0xff] }
 0x7fc   : > { %v3486_v48 = vmul.f32 1.442695, %v3417_v14  ;;  %5907 = vpow2.f32 %v3490_v57  ;;  %v3484_v12 = vmul.f32 1.442695, %v3416_v41 }
 0x7fe   : > { %v3333_v32 = vpop.xlane.xlu1 %3332  ;;  %5909 = vpow2.f32 %v3486_v48 }
 0x7ff   : > { %v3330_v33 = vpop.xlane.xlu0 %3329  ;;  %v3423_v53 = vsub.f32 %v7847_v7, %v3333_v32  ;;  %5911 = vpow2.f32 %v3488_v44  ;;  %v3422_v58 = vsub.f32 %v7857_v3, %v3333_v32  ;;  %v9151_v7 = vld [vmem:[#allocation35_spill] sm:$0xff] }
 0x800   : > { %v3421_v13 = vsub.f32 %v7851_v24, %v3330_v33  ;;  %5913 = vpow2.f32 %v3484_v12  ;;  %v3420_v40 = vsub.f32 %v9150_v50, %v3330_v33  ;;  %v9155_v50 = vld [vmem:[#allocation43_spill] sm:$0xff] }
 0x801   : > { %v3498_v37 = vmul.f32 1.442695, %v3423_v53  ;;  %v3496_v3 = vmul.f32 1.442695, %v3422_v58 }
 0x802   : > { %v3494_v34 = vmul.f32 1.442695, %v3421_v13  ;;  %v8232_v62 = vpop.eup %5899  ;;  %v3492_v41 = vmul.f32 1.442695, %v3420_v40 }
 0x803   : > { %v3339_v6 = vpop.xlane.xlu1 %3338  ;;  %v8235_v22 = vpop.eup %5901  ;;  %5915 = vpow2.f32 %v3498_v37 }
 0x804   : > { %v3336_v28 = vpop.xlane.xlu0 %3335  ;;  %v3427_v24 = vsub.f32 %v9151_v7, %v3339_v6  ;;  %v8240_v9 = vpop.eup %5903  ;;  %5917 = vpow2.f32 %v3494_v34  ;;  %v3426_v14 = vsub.f32 %v9153_v8, %v3339_v6  ;;  %v9154_v6 = vld [vmem:[#allocation40_spill] sm:$0xff] }
 0x805   : > { %v3425_v1 = vsub.f32 %v9152_v17, %v3336_v28  ;;  %v8243_v29 = vpop.eup %5905  ;;  %v3700_v48 = vpack.c.bf16 %v8232_v62, %v8240_v9  ;;  %5919 = vpow2.f32 %v3496_v3  ;;  %v3424_v34 = vsub.f32 %v9154_v6, %v3336_v28  ;;  %v9156_v7 = vld [vmem:[#allocation44_spill] sm:$0xff] }
 0x806   : > { %v3506_v32 = vmul.f32 1.442695, %v3427_v24  ;;  %v3701_v33 = vpack.c.bf16 %v8235_v22, %v8243_v29  ;;  %v8254_v44 = vpop.eup %5907  ;;  %v3504_v37 = vmul.f32 1.442695, %v3426_v14  ;;  %5921 = vpow2.f32 %v3492_v41 }
 0x807   : > { %v8238_v19 = vpop.xlane.xlu1 %3344  ;;  %v3502_v13 = vmul.f32 1.442695, %v3425_v1 }
 0x808   : > { %v8246_v57 = vpop.xlane.xlu0 %3341  ;;  %v8256_v12 = vpop.eup %5909  ;;  %3764 = vmatprep.mubr.bf16.mxu0 %v3701_v33  ;;  %5923 = vpow2.f32 %v3506_v32  ;;  %v3431_v40 = vsub.f32 %v9155_v50, %v8238_v19  ;;  %v9157_v33 = vld [vmem:[#allocation46_spill] sm:$0xff] }
 0x809   : > { %3765 = vmatmul.mubr.bf16.vlgmr.msra.gmra.mrb[96].mxu0 %v3700_v48  ;;  %v8259_v58 = vpop.eup %5911  ;;  %v3429_v24 = vsub.f32 %v9156_v7, %v8246_v57  ;;  %v3703_v1 = vpack.c.bf16 %v8254_v44, %v8256_v12  ;;  %5925 = vpow2.f32 %v3502_v13  ;;  %v3500_v48 = vmul.f32 1.442695, %v3424_v34  ;;  %v9158_v13 = vld [vmem:[#allocation45_spill] sm:$0xff] }
 0x80a   : > { %v8269_v8 = vpop.eup %5913  ;;  %5927 = vpow2.f32 %v3504_v37  ;;  %v3430_v6 = vsub.f32 %v9157_v33, %v8238_v19  ;;  %v3514_v7 = vmul.f32 1.442695, %v3431_v40  ;;  %v3428_v21 = vsub.f32 %v9158_v13, %v8246_v57  ;;  %v9159_v40 = vld [vmem:[#allocation10_spill] sm:$0xff] }
 0x80b   : > { %v8252_v53 = vpop.xlane.xlu1 %3350  ;;  %3772 = vmatprep.mubr.bf16.mxu0 %v3703_v1  ;;  %v3510_v59 = vmul.f32 1.442695, %v3429_v24  ;;  %v3702_v37 = vpack.c.bf16 %v8259_v58, %v8269_v8  ;;  %5929 = vpow2.f32 %v3500_v48  ;;  %v9160_v45 = vunpack.c.l.bf16 %v9159_v40 }
 0x80c   : > { %v8265_v17 = vpop.xlane.xlu0 %3347  ;;  %5931 = vpow2.f32 %v3514_v7 }
 0x80d   : > { %v8273_v41 = vpop.eup %5915  ;;  %5933 = vpow2.f32 %v3510_v59  ;;  %v3508_v59 = vmul.f32 1.442695, %v3428_v21  ;;  %v9168_v21 = vld [vmem:[#allocation52_spill] sm:$0xff] }
 0x80e   : > { %v8275_v32 = vpop.eup %5917 }
 0x80f   : > { %v2986_v3 = vpop.permute.xlu1 %2985  ;;  %v3705_v33 = vpack.c.bf16 %v8273_v41, %v8275_v32 }
 0x810   : > { %v3058_v28 = vadd.f32 %v7722_v43, %v2986_v3  ;;  %v3059_v14 = vadd.f32 %v7725_v63, %v2986_v3 }
 0x811   : > { %3773 = vmatmul.mubr.bf16.gmra.mrb[100].mxu0 %v3702_v37  ;;  %v3512_v37 = vmul.f32 1.442695, %v3430_v6  ;;  %v9167_v6 = vld [vmem:[#allocation50_spill] sm:$0xff] }
 0x812   : > { %vm3122_vm6 = vcmp.gt.f32.partialorder %v3058_v28, 0.0  ;;  %vm3123_vm7 = vcmp.gt.f32.partialorder %v3059_v14, 0.0  ;;  %v3186_v50 = vmul.f32 0.2, %v3058_v28  ;;  %v3187_v60 = vmul.f32 0.2, %v3059_v14  ;;  %3780 = vmatprep.mubr.bf16.mxu0 %v3705_v33 }
 0x813   : > { %v9166_v33 = vunpack.c.h.bf16 %v9164_v42  ;;  %5935 = vpow2.f32 %v3512_v37  ;;  %v3607_v42 = vadd.f32 %v8235_v22, %v8232_v62 }
 0x814   : > { %v2981_v3 = vpop.permute.xlu0 %2980  ;;  %v3250_v27 = vsel %vm3122_vm6, %v3058_v28, %v3186_v50  ;;  %v3251_v19 = vsel %vm3123_vm7, %v3059_v14, %v3187_v60  ;;  %v5920_v28 = vpop.eup %5919  ;;  %5937 = vpow2.f32 %v3508_v59 }
 0x815   : > { %v3056_v34 = vadd.f32 %v7722_v43, %v2981_v3  ;;  %v3057_v1 = vadd.f32 %v7725_v63, %v2981_v3  ;;  %v8289_v61 = vadd.f32 %v3250_v27, %v9160_v45  ;;  %v9161_v43 = vld [vmem:[#allocation47_spill] sm:$0xff]  ;;  %v9162_v63 = vunpack.c.h.bf16 %v9159_v40  ;;  %v5922_v14 = vpop.eup %5921  ;;  %v9163_v45 = vld [vmem:[#allocation48_spill] sm:$0xff] }
 0x816   : > { %v3435_v50 = vsub.f32 %v9161_v43, %v8252_v53  ;;  %v3433_v27 = vsub.f32 %v9163_v45, %v8265_v17  ;;  %v5924_v3 = vpop.eup %5923  ;;  %v3432_v45 = vsub.f32 %v9168_v21, %v8265_v17  ;;  %v3610_v17 = vadd.f32 %v8269_v8, %v8256_v12  ;;  %v9170_v21 = vld [vmem:[#allocation51_spill] sm:$0xff] }
 0x817   : > { %vm3120_vm8 = vcmp.gt.f32.partialorder %v3056_v34, 0.0  ;;  %vm3121_vm9 = vcmp.gt.f32.partialorder %v3057_v1, 0.0  ;;  %v3184_v57 = vmul.f32 0.2, %v3056_v34  ;;  %v3185_v24 = vmul.f32 0.2, %v3057_v1  ;;  %v5926_v40 = vpop.eup %5925 }
 0x818   : > { %v8295_v60 = vadd.f32 %v3251_v19, %v9162_v63  ;;  %v5928_v63 = vpop.eup %5927  ;;  %v3522_v4 = vmul.f32 1.442695, %v3435_v50  ;;  %v3516_v22 = vmul.f32 1.442695, %v3432_v45 }
 0x819   : > { %v3248_v48 = vsel %vm3120_vm8, %v3056_v34, %v3184_v57  ;;  %v3249_v13 = vsel %vm3121_vm9, %v3057_v1, %v3185_v24  ;;  %v3434_v1 = vsub.f32 %v9167_v6, %v8252_v53  ;;  %v3518_v57 = vmul.f32 1.442695, %v3433_v27  ;;  %v5930_v50 = vpop.eup %5929 }
 0x81a   : > { %v3409_v7 = vmax.f32 %v8289_v61, %v8295_v60  ;;  %v8303_v43 = vadd.f32 %v3248_v48, %v9165_v39  ;;  %v8307_v19 = vadd.f32 %v3249_v13, %v9166_v33  ;;  %v3704_v24 = vpack.c.bf16 %v5920_v28, %v5922_v14  ;;  %v5932_v48 = vpop.eup %5931 }
 0x81b   : > { %v3707_v39 = vpack.c.bf16 %v5924_v3, %v5926_v40  ;;  %5939 = vpow2.f32 %v3522_v4  ;;  %v3604_v53 = vadd.f32 %v8243_v29, %v8240_v9  ;;  %v3520_v27 = vmul.f32 1.442695, %v3434_v1  ;;  %v5934_v62 = vpop.eup %5933 }
 0x81c   : > { %3410 = vmax.xlane.f32.xlu0 %v3409_v7  ;;  %v3406_v34 = vmax.f32 %v8303_v43, %v8307_v19  ;;  %3781 = vmatmul.mubr.bf16.gmra.mrb[104].mxu0 %v3704_v24  ;;  %5941 = vpow2.f32 %v3518_v57  ;;  %v3613_v13 = vadd.f32 %v8259_v58, %v8254_v44  ;;  %v3706_v4 = vpack.c.bf16 %v5928_v63, %v5930_v50 }
 0x81d   : > { %3788 = vmatprep.mubr.bf16.mxu0 %v3707_v39  ;;  %5943 = vpow2.f32 %v3520_v27  ;;  %v3709_v37 = vpack.c.bf16 %v5932_v48, %v5934_v62  ;;  %v3619_v7 = vadd.f32 %v5920_v28, %v8273_v41  ;;  %v5936_v9 = vpop.eup %5935  ;;  %v3616_v29 = vadd.f32 %v5922_v14, %v8275_v32  ;;  %v9169_v39 = vld [vmem:[#allocation49_spill] sm:$0xff] }
 0x81e   : > { %3407 = vmax.xlane.f32.xlu1 %v3406_v34  ;;  %5945 = vpow2.f32 %v3516_v22  ;;  %v5938_v44 = vpop.eup %5937  ;;  %v3625_v33 = vadd.f32 %v5928_v63, %v5924_v3  ;;  %v3622_v12 = vadd.f32 %v5930_v50, %v5926_v40  ;;  %v3631_v6 = vadd.f32 %v5936_v9, %v5932_v48 }
 0x81f   : > { %v3708_v8 = vpack.c.bf16 %v5936_v9, %v5938_v44  ;;  %v3628_v28 = vadd.f32 %v5938_v44, %v5934_v62 }
 0x820   : > { %3608 = vadd.xlane.f32.xlu0 %v3607_v42 }
 0x822   : > { %3605 = vadd.xlane.f32.xlu1 %v3604_v53 }
 0x824   : > { %3614 = vadd.xlane.f32.xlu0 %v3613_v13  ;;  %3789 = vmatmul.mubr.bf16.gmra.mrb[108].mxu0 %v3706_v4 }
 0x825   : > { %3796 = vmatprep.mubr.bf16.mxu0 %v3709_v37  ;;  %v5940_v58 = vpop.eup %5939 }
 0x826   : > { %3611 = vadd.xlane.f32.xlu1 %v3610_v17  ;;  %v5942_v59 = vpop.eup %5941 }
 0x827   : > { %v3711_v34 = vpack.c.bf16 %v5940_v58, %v5942_v59  ;;  %v5944_v41 = vpop.eup %5943 }
 0x828   : > { %3620 = vadd.xlane.f32.xlu0 %v3619_v7  ;;  %v5946_v1 = vpop.eup %5945  ;;  %v3637_v57 = vadd.f32 %v5944_v41, %v5940_v58 }
 0x829   : > { %v3634_v32 = vadd.f32 %v5946_v1, %v5942_v59  ;;  %v3710_v14 = vpack.c.bf16 %v5944_v41, %v5946_v1 }
 0x82a   : > { %3617 = vadd.xlane.f32.xlu1 %v3616_v29 }
 0x82c   : > { %3626 = vadd.xlane.f32.xlu0 %v3625_v33  ;;  %3797 = vmatmul.mubr.bf16.gmra.mrb[112].mxu0 %v3708_v8 }
 0x82d   : > { %3804 = vmatprep.mubr.bf16.mxu0 %v3711_v34 }
 0x82e   : > { %3623 = vadd.xlane.f32.xlu1 %v3622_v12 }
 0x830   : > { %3632 = vadd.xlane.f32.xlu0 %v3631_v6 }
 0x832   : > { %3629 = vadd.xlane.f32.xlu1 %v3628_v28 }
 0x834   : > { %3638 = vadd.xlane.f32.xlu0 %v3637_v57  ;;  %3805 = vmatmul.mubr.bf16.gmra.mrb[116].mxu0 %v3710_v14 }
 0x836   : > { %3635 = vadd.xlane.f32.xlu1 %v3634_v32 }
 0x840   : > { %v3357_v3 = vpop.xlane.xlu1 %3356 }
 0x841   : > { %v3354_v63 = vpop.xlane.xlu0 %3353  ;;  %v3438_v40 = vsub.f32 %v7992_v46, %v3357_v3  ;;  %v3439_v24 = vsub.f32 %v8029_v51, %v3357_v3 }
 0x842   : > { %v3436_v42 = vsub.f32 %v9169_v39, %v3354_v63  ;;  %v3437_v45 = vsub.f32 %v9170_v21, %v3354_v63 }
 0x843   : > { %v3528_v50 = vmul.f32 1.442695, %v3438_v40  ;;  %v3530_v53 = vmul.f32 1.442695, %v3439_v24 }
 0x844   : > { %v3524_v27 = vmul.f32 1.442695, %v3436_v42  ;;  %v3526_v48 = vmul.f32 1.442695, %v3437_v45  ;;  %v3366_v13 = vpop.xlane.xlu1 %3365 }
 0x845   : > { %v3360_v62 = vpop.xlane.xlu0 %3359  ;;  %5947 = vpow2.f32 %v3528_v50  ;;  %v3444_v22 = vsub.f32 %v8054_v36, %v3366_v13  ;;  %v3445_v17 = vsub.f32 %v8043_v16, %v3366_v13 }
 0x846   : > { %v3440_v4 = vsub.f32 %v8003_v20, %v3360_v62  ;;  %5949 = vpow2.f32 %v3530_v53  ;;  %v3441_v46 = vsub.f32 %v8047_v5, %v3360_v62 }
 0x847   : > { %5951 = vpow2.f32 %v3524_v27  ;;  %v3540_v51 = vmul.f32 1.442695, %v3444_v22  ;;  %v3542_v37 = vmul.f32 1.442695, %v3445_v17 }
 0x848   : > { %v3532_v7 = vmul.f32 1.442695, %v3440_v4  ;;  %5953 = vpow2.f32 %v3526_v48  ;;  %v3534_v9 = vmul.f32 1.442695, %v3441_v46  ;;  %v3372_v29 = vpop.xlane.xlu1 %3371 }
 0x849   : > { %v3363_v44 = vpop.xlane.xlu0 %3362  ;;  %5955 = vpow2.f32 %v3540_v51  ;;  %v3448_v58 = vsub.f32 %v8058_v18, %v3372_v29  ;;  %v3449_v36 = vsub.f32 %v8071_v56, %v3372_v29 }
 0x84a   : > { %v3442_v16 = vsub.f32 %v8007_v55, %v3363_v44  ;;  %5957 = vpow2.f32 %v3542_v37  ;;  %v3443_v20 = vsub.f32 %v8075_v52, %v3363_v44 }
 0x84b   : > { %5959 = vpow2.f32 %v3532_v7  ;;  %v3548_v5 = vmul.f32 1.442695, %v3448_v58  ;;  %v3550_v33 = vmul.f32 1.442695, %v3449_v36 }
 0x84c   : > { %v3536_v59 = vmul.f32 1.442695, %v3442_v16  ;;  %5961 = vpow2.f32 %v3534_v9  ;;  %v3538_v12 = vmul.f32 1.442695, %v3443_v20  ;;  %v3378_v8 = vpop.xlane.xlu1 %3377  ;;  %v9171_v20 = vld [vmem:[#allocation54_spill] sm:$0xff] }
 0x84d   : > { %v3369_v34 = vpop.xlane.xlu0 %3368  ;;  %5963 = vpow2.f32 %v3548_v5  ;;  %v3452_v6 = vsub.f32 %v8084_v31, %v3378_v8  ;;  %v3453_v18 = vsub.f32 %v8092_v47, %v3378_v8 }
 0x84e   : > { %v3446_v56 = vsub.f32 %v8016_v30, %v3369_v34  ;;  %5965 = vpow2.f32 %v3550_v33  ;;  %v3447_v55 = vsub.f32 %v8096_v10, %v3369_v34 }
 0x84f   : > { %v5948_v41 = vpop.eup %5947  ;;  %5967 = vpow2.f32 %v3536_v59  ;;  %v3556_v52 = vmul.f32 1.442695, %v3452_v6  ;;  %v3558_v28 = vmul.f32 1.442695, %v3453_v18 }
 0x850   : > { %v3544_v1 = vmul.f32 1.442695, %v3446_v56  ;;  %v5950_v57 = vpop.eup %5949  ;;  %5969 = vpow2.f32 %v3538_v12  ;;  %v3546_v32 = vmul.f32 1.442695, %v3447_v55  ;;  %v3384_v14 = vpop.xlane.xlu1 %3383 }
 0x851   : > { %v3375_v3 = vpop.xlane.xlu0 %3374  ;;  %v5952_v63 = vpop.eup %5951  ;;  %5971 = vpow2.f32 %v3556_v52  ;;  %v3456_v31 = vsub.f32 %v8119_v2, %v3384_v14  ;;  %v3457_v47 = vsub.f32 %v8108_v38, %v3384_v14  ;;  %v3643_v24 = vadd.f32 %v5950_v57, %v5948_v41  ;;  %v9172_v52 = vld [vmem:[#allocation56_spill] sm:$0xff]  ;;  %v9174_v14 = vld [vmem:[#allocation53_spill] sm:$0xff] }
 0x852   : > { %v3450_v30 = vsub.f32 %v8020_v0, %v3375_v3  ;;  %v5954_v40 = vpop.eup %5953  ;;  %5973 = vpow2.f32 %v3558_v28  ;;  %v3451_v10 = vsub.f32 %v8112_v26, %v3375_v3  ;;  %v3712_v39 = vpack.c.bf16 %v5948_v41, %v5952_v63 }
 0x853   : > { %v8345_v42 = vpop.eup %5955  ;;  %5975 = vpow2.f32 %v3544_v1  ;;  %v3564_v21 = vmul.f32 1.442695, %v3456_v31  ;;  %v3566_v45 = vmul.f32 1.442695, %v3457_v47  ;;  %3644 = vadd.xlane.f32.xlu0 %v3643_v24  ;;  %v3713_v38 = vpack.c.bf16 %v5950_v57, %v5954_v40  ;;  %v9173_v1 = vld [vmem:[#allocation58_spill] sm:$0xff] }
 0x854   : > { %v3552_v50 = vmul.f32 1.442695, %v3450_v30  ;;  %v8347_v53 = vpop.eup %5957  ;;  %5977 = vpow2.f32 %v3546_v32  ;;  %v3554_v2 = vmul.f32 1.442695, %v3451_v10  ;;  %v3640_v27 = vadd.f32 %v5954_v40, %v5952_v63  ;;  %v3390_v0 = vpop.xlane.xlu1 %3389  ;;  %v9175_v63 = vld [vmem:[#allocation55_spill] sm:$0xff] }
 0x855   : > { %v3381_v48 = vpop.xlane.xlu0 %3380  ;;  %v5960_v13 = vpop.eup %5959  ;;  %5979 = vpow2.f32 %v3564_v21  ;;  %v3460_v26 = vsub.f32 %v8124_v23, %v3390_v0  ;;  %v3461_v62 = vsub.f32 %v8132_v54, %v3390_v0  ;;  %3812 = vmatprep.mubr.bf16.mxu0 %v3713_v38  ;;  %v3652_v33 = vadd.f32 %v8347_v53, %v8345_v42  ;;  %v9176_v38 = vld [vmem:[#allocation57_spill] sm:$0xff]  ;;  %v9177_v0 = vld [vmem:[#allocation59_spill] sm:$0xff] }
 0x856   : > { %v3454_v22 = vsub.f32 %v8143_v11, %v3381_v48  ;;  %v5962_v17 = vpop.eup %5961  ;;  %5981 = vpow2.f32 %v3566_v45  ;;  %3641 = vadd.xlane.f32.xlu1 %v3640_v27  ;;  %v3455_v4 = vsub.f32 %v8136_v35, %v3381_v48  ;;  %3813 = vmatmul.mubr.bf16.gmra.mrb[120].mxu0 %v3712_v39 }
 0x857   : > { %v8353_v46 = vpop.eup %5963  ;;  %5983 = vpow2.f32 %v3552_v50  ;;  %v3572_v51 = vmul.f32 1.442695, %v3460_v26  ;;  %v3646_v9 = vadd.f32 %v5962_v17, %v5960_v13  ;;  %v3574_v44 = vmul.f32 1.442695, %v3461_v62 }
 0x858   : > { %v3560_v37 = vmul.f32 1.442695, %v3454_v22  ;;  %v8355_v7 = vpop.eup %5965  ;;  %5985 = vpow2.f32 %v3554_v2  ;;  %v3562_v23 = vmul.f32 1.442695, %v3455_v4  ;;  %v3396_v54 = vpop.xlane.xlu1 %3395 }
 0x859   : > { %v3387_v29 = vpop.xlane.xlu0 %3386  ;;  %v5968_v11 = vpop.eup %5967  ;;  %v3464_v58 = vsub.f32 %v8150_v25, %v3396_v54  ;;  %v3465_v36 = vsub.f32 %v8158_v49, %v3396_v54  ;;  %5987 = vpow2.f32 %v3572_v51  ;;  %v3658_v10 = vadd.f32 %v8355_v7, %v8353_v46 }
 0x85a   : > { %v3458_v35 = vsub.f32 %v8169_v15, %v3387_v29  ;;  %v5970_v16 = vpop.eup %5969  ;;  %3647 = vadd.xlane.f32.xlu1 %v3646_v9  ;;  %v3459_v5 = vsub.f32 %v9171_v20, %v3387_v29  ;;  %5989 = vpow2.f32 %v3560_v37  ;;  %v3714_v34 = vpack.c.bf16 %v5968_v11, %v5960_v13  ;;  %v9178_v9 = vld [vmem:[#allocation60_spill] sm:$0xff]  ;;  %v9179_v29 = vld [vmem:[#allocation61_spill] sm:$0xff] }
 0x85b   : > { %v8363_v59 = vpop.eup %5971  ;;  %v3580_v12 = vmul.f32 1.442695, %v3464_v58  ;;  %5991 = vpow2.f32 %v3562_v23  ;;  %v3715_v49 = vpack.c.bf16 %v5970_v16, %v5962_v17  ;;  %v3649_v15 = vadd.f32 %v5970_v16, %v5968_v11 }
 0x85c   : > { %v3568_v8 = vmul.f32 1.442695, %v3458_v35  ;;  %v8365_v6 = vpop.eup %5973  ;;  %v3570_v25 = vmul.f32 1.442695, %v3459_v5  ;;  %v3402_v18 = vpop.xlane.xlu1 %3401  ;;  %5993 = vpow2.f32 %v3574_v44  ;;  %v3582_v41 = vmul.f32 1.442695, %v3465_v36 }
 0x85d   : > { %v3393_v56 = vpop.xlane.xlu0 %3392  ;;  %v5976_v55 = vpop.eup %5975  ;;  %v3468_v28 = vsub.f32 %v9172_v52, %v3402_v18  ;;  %5995 = vpow2.f32 %v3580_v12  ;;  %3820 = vmatprep.mubr.bf16.mxu0 %v3715_v49  ;;  %v3469_v3 = vsub.f32 %v9174_v14, %v3402_v18  ;;  %3650 = vadd.xlane.f32.xlu0 %v3649_v15 }
 0x85e   : > { %v3462_v57 = vsub.f32 %v9173_v1, %v3393_v56  ;;  %v5978_v32 = vpop.eup %5977  ;;  %3653 = vadd.xlane.f32.xlu1 %v3652_v33  ;;  %v3463_v31 = vsub.f32 %v9175_v63, %v3393_v56  ;;  %5997 = vpow2.f32 %v3568_v8  ;;  %3821 = vmatmul.mubr.bf16.gmra.mrb[124].mxu0 %v3714_v34  ;;  %v3716_v23 = vpack.c.bf16 %v5976_v55, %v8345_v42 }
 0x85f   : > { %v8371_v47 = vpop.eup %5979  ;;  %v3588_v30 = vmul.f32 1.442695, %v3468_v28  ;;  %5999 = vpow2.f32 %v3570_v25  ;;  %v3717_v21 = vpack.c.bf16 %v5978_v32, %v8347_v53  ;;  %v3655_v45 = vadd.f32 %v5978_v32, %v5976_v55 }
 0x860   : > { %v3576_v40 = vmul.f32 1.442695, %v3462_v57  ;;  %v8375_v24 = vpop.eup %5981  ;;  %v3578_v39 = vmul.f32 1.442695, %v3463_v31  ;;  %6001 = vpow2.f32 %v3582_v41  ;;  %v3590_v26 = vmul.f32 1.442695, %v3469_v3 }
 0x861   : > { %v3399_v50 = vpop.xlane.xlu0 %3398  ;;  %v5984_v2 = vpop.eup %5983  ;;  %6003 = vpow2.f32 %v3588_v30  ;;  %3828 = vmatprep.mubr.bf16.mxu0 %v3717_v21  ;;  %3656 = vadd.xlane.f32.xlu0 %v3655_v45  ;;  %v3664_v53 = vadd.f32 %v8365_v6, %v8363_v59  ;;  %v3670_v42 = vadd.f32 %v8375_v24, %v8371_v47  ;;  %v5704_v30 = vld [vmem:[%s8637_s8 + $0x8] sm:$0xff]  }
 0x862   : > { %v3466_v27 = vsub.f32 %v9176_v38, %v3399_v50  ;;  %v3467_v48 = vsub.f32 %v9177_v0, %v3399_v50  ;;  %v5986_v13 = vpop.eup %5985  ;;  %3659 = vadd.xlane.f32.xlu1 %v3658_v10  ;;  %6005 = vpow2.f32 %v3576_v40  ;;  %v3718_v15 = vpack.c.bf16 %v5984_v2, %v8353_v46 }
 0x863   : > { %v3661_v17 = vadd.f32 %v5986_v13, %v5984_v2  ;;  %v8380_v4 = vpop.eup %5987  ;;  %6007 = vpow2.f32 %v3578_v39  ;;  %v3719_v58 = vpack.c.bf16 %v5986_v13, %v8355_v7 }
 0x864   : > { %v3584_v62 = vmul.f32 1.442695, %v3466_v27  ;;  %v3586_v22 = vmul.f32 1.442695, %v3467_v48  ;;  %v5990_v37 = vpop.eup %5989 }
 0x865   : > { %v3405_v51 = vpop.xlane.xlu0 %3404  ;;  %v5992_v44 = vpop.eup %5991  ;;  %3662 = vadd.xlane.f32.xlu0 %v3661_v17  ;;  %v3720_v46 = vpack.c.bf16 %v5990_v37, %v8363_v59 }
 0x866   : > { %6009 = vpow2.f32 %v3584_v62  ;;  %v3470_v54 = vsub.f32 %v9178_v9, %v3405_v51  ;;  %v3471_v11 = vsub.f32 %v9179_v29, %v3405_v51  ;;  %3665 = vadd.xlane.f32.xlu1 %v3664_v53  ;;  %v5994_v36 = vpop.eup %5993  ;;  %3829 = vmatmul.mubr.bf16.gmra.mrb[128].mxu0 %v3716_v23  ;;  %v3667_v20 = vadd.f32 %v5992_v44, %v5990_v37 }
 0x867   : > { %6011 = vpow2.f32 %v3586_v22  ;;  %v5996_v5 = vpop.eup %5995  ;;  %3836 = vmatprep.mubr.bf16.mxu0 %v3719_v58  ;;  %v3676_v25 = vadd.f32 %v5994_v36, %v8380_v4  ;;  %v3721_v56 = vpack.c.bf16 %v5992_v44, %v8365_v6  ;;  %v5703_v6 = vld [vmem:[%s8637_s8] sm:$0xff]  }
 0x868   : > { %6013 = vpow2.f32 %v3590_v26  ;;  %v3592_v35 = vmul.f32 1.442695, %v3470_v54  ;;  %v3594_v16 = vmul.f32 1.442695, %v3471_v11  ;;  %v5998_v33 = vpop.eup %5997  ;;  %5580 = vmatprep.subr.bf16.mxu1 %v5703_v6 }
 0x869   : > { %v6000_v12 = vpop.eup %5999  ;;  %3668 = vadd.xlane.f32.xlu0 %v3667_v20  ;;  %5581 = vmatpush3.bf16.msra.mxu1 %v5703_v6  ;;  %v3722_v59 = vpack.c.bf16 %v5998_v33, %v8371_v47 }
 0x86a   : > { %6015 = vpow2.f32 %v3592_v35  ;;  %3671 = vadd.xlane.f32.xlu1 %v3670_v42  ;;  %v6002_v8 = vpop.eup %6001  ;;  %v3673_v7 = vadd.f32 %v6000_v12, %v5998_v33  ;;  %v3723_v63 = vpack.c.bf16 %v6000_v12, %v8375_v24  ;;  %5582 = vmatprep.subr.bf16.mxu1 %v5704_v30 }
 0x86b   : > { %6017 = vpow2.f32 %v3594_v16  ;;  %v6004_v34 = vpop.eup %6003  ;;  %v3682_v28 = vadd.f32 %v6002_v8, %v5996_v5 }
 0x86c   : > { %v6006_v49 = vpop.eup %6005 }
 0x86d   : > { %v6008_v18 = vpop.eup %6007  ;;  %3674 = vadd.xlane.f32.xlu0 %v3673_v7  ;;  %5583 = vmatpush3.bf16.msra.mxu1 %v5704_v30  ;;  %v3724_v10 = vpack.c.bf16 %v6006_v49, %v8380_v4 }
 0x86e   : > { %3677 = vadd.xlane.f32.xlu1 %v3676_v25  ;;  %3837 = vmatmul.mubr.bf16.gmra.mrb[132].mxu0 %v3718_v15  ;;  %v3679_v41 = vadd.f32 %v6008_v18, %v6006_v49  ;;  %v3725_v40 = vpack.c.bf16 %v6008_v18, %v5994_v36  ;;  %v8410_v36 = vld [vmem:[%s8636_s7] ss:$0 sm:$0xff] }
 0x86f   : > { %3844 = vmatprep.mubr.bf16.mxu0 %v3721_v56 }
 0x870   : > { %v6010_v55 = vpop.eup %6009 }
 0x871   : > { %v6012_v52 = vpop.eup %6011  ;;  %3680 = vadd.xlane.f32.xlu0 %v3679_v41  ;;  %v3726_v39 = vpack.c.bf16 %v6010_v55, %v5996_v5 }
 0x872   : > { %v6014_v1 = vpop.eup %6013  ;;  %3683 = vadd.xlane.f32.xlu1 %v3682_v28  ;;  %v3685_v32 = vadd.f32 %v6012_v52, %v6010_v55  ;;  %v3727_v24 = vpack.c.bf16 %v6012_v52, %v6002_v8 }
 0x873   : > { %v3688_v3 = vadd.f32 %v6014_v1, %v6004_v34 }
 0x874   : > { %v6016_v57 = vpop.eup %6015 }
 0x875   : > { %v6018_v14 = vpop.eup %6017  ;;  %3686 = vadd.xlane.f32.xlu0 %v3685_v32  ;;  %v3728_v45 = vpack.c.bf16 %v6016_v57, %v6004_v34 }
 0x876   : > { %3689 = vadd.xlane.f32.xlu1 %v3688_v3  ;;  %3845 = vmatmul.mubr.bf16.gmra.mrb[136].mxu0 %v3720_v46  ;;  %v3691_v31 = vadd.f32 %v6018_v14, %v6016_v57  ;;  %v3729_v21 = vpack.c.bf16 %v6018_v14, %v6014_v1 }
 0x877   : > { %3852 = vmatprep.mubr.bf16.mxu0 %v3723_v63 }
 0x879   : > { %3692 = vadd.xlane.f32.xlu0 %v3691_v31 }
 0x87e   : > { %3853 = vmatmul.mubr.bf16.gmra.mrb[140].mxu0 %v3722_v59 }
 0x87f   : > { %3860 = vmatprep.mubr.bf16.mxu0 %v3725_v40 }
 0x886   : > { %3861 = vmatmul.mubr.bf16.gmra.mrb[144].mxu0 %v3724_v10 }
 0x887   : > { %3868 = vmatprep.mubr.bf16.mxu0 %v3727_v24 }
 0x88e   : > { %3869 = vmatmul.mubr.bf16.gmra.mrb[148].mxu0 %v3726_v39 }
 0x88f   : > { %3876 = vmatprep.mubr.bf16.mxu0 %v3729_v21 }
 0x896   : > { %3877 = vmatmul.mubr.bf16.gmra.mrb[152].mxu0 %v3728_v45 }
 0x8a9   : > { %v3411_v50 = vpop.xlane.xlu0 %3410 }
 0x8aa   : > { %v3474_v2 = vsub.f32 %v8289_v61, %v3411_v50  ;;  %v3475_v47 = vsub.f32 %v8295_v60, %v3411_v50 }
 0x8ab   : > { %v3408_v38 = vpop.xlane.xlu1 %3407 }
 0x8ac   : > { %v3600_v27 = vmul.f32 1.442695, %v3474_v2  ;;  %v3602_v0 = vmul.f32 1.442695, %v3475_v47  ;;  %v3472_v48 = vsub.f32 %v8303_v43, %v3408_v38  ;;  %v3473_v13 = vsub.f32 %v8307_v19, %v3408_v38 }
 0x8ad   : > { %v3609_v19 = vpop.xlane.xlu0 %3608 }
 0x8ae   : > { %6019 = vpow2.f32 %v3600_v27  ;;  %v3596_v26 = vmul.f32 1.442695, %v3472_v48  ;;  %v3598_v62 = vmul.f32 1.442695, %v3473_v13 }
 0x8af   : > { %6021 = vpow2.f32 %v3602_v0  ;;  %v3606_v43 = vpop.xlane.xlu1 %3605 }
 0x8b0   : > { %6023 = vpow2.f32 %v3596_v26 }
 0x8b1   : > { %6025 = vpow2.f32 %v3598_v62  ;;  %v3615_v9 = vpop.xlane.xlu0 %3614 }
 0x8b2   : > { %6027 = vrcp.f32 %v3606_v43 }
 0x8b3   : > { %6029 = vrcp.f32 %v3609_v19  ;;  %v3612_v23 = vpop.xlane.xlu1 %3611 }
 0x8b4   : > { %6031 = vrcp.f32 %v3612_v23 }
 0x8b5   : > { %6033 = vrcp.f32 %v3615_v9  ;;  %v3621_v8 = vpop.xlane.xlu0 %3620 }
 0x8b7   : > { %v3618_v42 = vpop.xlane.xlu1 %3617 }
 0x8b8   : > { %v6020_v22 = vpop.eup %6019  ;;  %6035 = vrcp.f32 %v3618_v42 }
 0x8b9   : > { %v6022_v17 = vpop.eup %6021  ;;  %6037 = vrcp.f32 %v3621_v8  ;;  %v3627_v46 = vpop.xlane.xlu0 %3626 }
 0x8ba   : > { %v6024_v4 = vpop.eup %6023  ;;  %v3697_v53 = vadd.f32 %v6022_v17, %v6020_v22 }
 0x8bb   : > { %v6026_v61 = vpop.eup %6025  ;;  %v3730_v51 = vpack.c.bf16 %v6020_v22, %v6024_v4  ;;  %v3624_v32 = vpop.xlane.xlu1 %3623 }
 0x8bc   : > { %3698 = vadd.xlane.f32.xlu0 %v3697_v53  ;;  %v3694_v60 = vadd.f32 %v6026_v61, %v6024_v4  ;;  %v3731_v37 = vpack.c.bf16 %v6022_v17, %v6026_v61  ;;  %v6028_v58 = vpop.eup %6027  ;;  %6039 = vrcp.f32 %v3624_v32 }
 0x8bd   : > { %v6030_v5 = vpop.eup %6029  ;;  %6041 = vrcp.f32 %v3627_v46  ;;  %v3633_v0 = vpop.xlane.xlu0 %3632 }
 0x8be   : > { %3695 = vadd.xlane.f32.xlu1 %v3694_v60  ;;  %3884 = vmatprep.mubr.bf16.mxu0 %v3731_v37  ;;  %v6032_v55 = vpop.eup %6031 }
 0x8bf   : > { %3885 = vmatmul.mubr.bf16.gmra.mrb[156].mxu0 %v3730_v51  ;;  %v6034_v57 = vpop.eup %6033  ;;  %v3630_v47 = vpop.xlane.xlu1 %3629 }
 0x8c0   : > { %6043 = vrcp.f32 %v3630_v47 }
 0x8c1   : > { %6045 = vrcp.f32 %v3633_v0 }
 0x8c2   : > { %v6036_v24 = vpop.eup %6035 }
 0x8c3   : > { %v6038_v2 = vpop.eup %6037  ;;  %v3636_v19 = vpop.xlane.xlu1 %3635 }
 0x8c4   : > { %6047 = vrcp.f32 %v3636_v19 }
 0x8c6   : > { %v6040_v53 = vpop.eup %6039 }
 0x8c7   : > { %v6042_v43 = vpop.eup %6041 }
 0x8dc   : > { %v5306_v54 = vpop.f32.mrb[96].mxu0 }
 0x8dd   : > { %v5307_v29 = vpop.f32.mrb[97].mxu0 }
 0x8de   : > { %v5308_v11 = vadd.f32 %v5307_v29, %v5306_v54  ;;  %v5309_v44 = vpop.f32.mrb[98].mxu0  ;;  %v3639_v54 = vpop.xlane.xlu0 %3638 }
 0x8df   : > { %v5310_v35 = vpop.f32.mrb[99].mxu0  ;;  %6049 = vrcp.f32 %v3639_v54 }
 0x8e0   : > { %v3925_v16 = vmul.f32 %v6028_v58, %v5308_v11  ;;  %v5311_v20 = vadd.f32 %v5310_v35, %v5309_v44 }
 0x8e2   : > { %v3963_v33 = vadd.f32 %v8410_v36, %v3925_v16  ;;  %v3926_v12 = vmul.f32 %v6030_v5, %v5311_v20  ;;  %v6044_v5 = vpop.eup %6043 }
 0x8e4   : > { %v3964_v7 = vadd.f32 %v8410_v36, %v3926_v12  ;;  %v5312_v34 = vpop.f32.mrb[100].mxu0  ;;  %v3995_v49 = vmax.f32 %v3963_v33, 0.0 }
 0x8e5   : > { %v5313_v25 = vpop.f32.mrb[101].mxu0 }
 0x8e6   : > { %v3996_v15 = vmax.f32 %v3964_v7, 0.0  ;;  %v5314_v18 = vadd.f32 %v5313_v25, %v5312_v34  ;;  %v5315_v56 = vpop.f32.mrb[102].mxu0  ;;  %v6046_v7 = vpop.eup %6045 }
 0x8e7   : > { %v5316_v41 = vpop.f32.mrb[103].mxu0 }
 0x8e8   : > { %v4027_v52 = vpack.c.bf16 %v3996_v15, %v3995_v49  ;;  %v3927_v28 = vmul.f32 %v6032_v55, %v5314_v18  ;;  %v5317_v1 = vadd.f32 %v5316_v41, %v5315_v56 }
 0x8ea   : > { %v3965_v14 = vadd.f32 %v8410_v36, %v3927_v28  ;;  %v3928_v3 = vmul.f32 %v6034_v57, %v5317_v1  ;;  %5584 = vmatprep.mubr.msk.bf16.mxu1 %vm808_vm1, %v4027_v52  ;;  %v6048_v28 = vpop.eup %6047 }
 0x8ec   : > { %v3966_v6 = vadd.f32 %v8410_v36, %v3928_v3  ;;  %v3997_v30 = vmax.f32 %v3965_v14, 0.0  ;;  %v6050_v3 = vpop.eup %6049 }
 0x8ee   : > { %v3998_v59 = vmax.f32 %v3966_v6, 0.0 }
 0x8ef   : > { %v5318_v63 = vpop.f32.mrb[104].mxu0 }
 0x8f0   : > { %v5319_v31 = vpop.f32.mrb[105].mxu0  ;;  %v4028_v21 = vpack.c.bf16 %v3998_v59, %v3997_v30 }
 0x8f1   : > { %v5320_v40 = vadd.f32 %v5319_v31, %v5318_v63  ;;  %v5321_v10 = vpop.f32.mrb[106].mxu0 }
 0x8f2   : > { %v5322_v39 = vpop.f32.mrb[107].mxu0  ;;  %5585 = vmatmul.mubr.msk.bf16.vlgmr.msra.gmra.mrb[96].mxu1 %vm808_vm1, %v4028_v21 }
 0x8f3   : > { %v3929_v45 = vmul.f32 %v6036_v24, %v5320_v40  ;;  %v5323_v50 = vadd.f32 %v5322_v39, %v5321_v10  ;;  %v3642_v40 = vpop.xlane.xlu1 %3641  ;;  %v3645_v10 = vpop.xlane.xlu0 %3644 }
 0x8f4   : > { %6051 = vrcp.f32 %v3642_v40 }
 0x8f5   : > { %v3967_v38 = vadd.f32 %v8410_v36, %v3929_v45  ;;  %v3930_v27 = vmul.f32 %v6038_v2, %v5323_v50  ;;  %6053 = vrcp.f32 %v3645_v10 }
 0x8f7   : > { %v3968_v48 = vadd.f32 %v8410_v36, %v3930_v27  ;;  %v5324_v13 = vpop.f32.mrb[108].mxu0  ;;  %v3999_v62 = vmax.f32 %v3967_v38, 0.0  ;;  %v3648_v24 = vpop.xlane.xlu1 %3647 }
 0x8f8   : > { %v5325_v26 = vpop.f32.mrb[109].mxu0  ;;  %v3651_v39 = vpop.xlane.xlu0 %3650  ;;  %6055 = vrcp.f32 %v3648_v24 }
 0x8f9   : > { %v4000_v22 = vmax.f32 %v3968_v48, 0.0  ;;  %v5326_v17 = vadd.f32 %v5325_v26, %v5324_v13  ;;  %v5327_v4 = vpop.f32.mrb[110].mxu0  ;;  %6057 = vrcp.f32 %v3651_v39 }
 0x8fa   : > { %v5328_v61 = vpop.f32.mrb[111].mxu0 }
 0x8fb   : > { %v4029_v51 = vpack.c.bf16 %v4000_v22, %v3999_v62  ;;  %v3931_v60 = vmul.f32 %v6040_v53, %v5326_v17  ;;  %v5329_v37 = vadd.f32 %v5328_v61, %v5327_v4  ;;  %v3654_v13 = vpop.xlane.xlu1 %3653 }
 0x8fc   : > { %v3657_v22 = vpop.xlane.xlu0 %3656  ;;  %6059 = vrcp.f32 %v3654_v13 }
 0x8fd   : > { %v3969_v23 = vadd.f32 %v8410_v36, %v3931_v60  ;;  %v3932_v9 = vmul.f32 %v6042_v43, %v5329_v37  ;;  %5588 = vmatprep.mubr.msk.bf16.mxu1 %vm808_vm1, %v4029_v51  ;;  %6061 = vrcp.f32 %v3657_v22 }
 0x8fe   : > { %v6052_v47 = vpop.eup %6051 }
 0x8ff   : > { %v3970_v29 = vadd.f32 %v8410_v36, %v3932_v9  ;;  %v5330_v11 = vpop.f32.mrb[112].mxu0  ;;  %v4001_v58 = vmax.f32 %v3969_v23, 0.0  ;;  %v6054_v48 = vpop.eup %6053 }
 0x900   : > { %v5331_v44 = vpop.f32.mrb[113].mxu0 }
 0x901   : > { %v4002_v35 = vmax.f32 %v3970_v29, 0.0  ;;  %v5332_v16 = vadd.f32 %v5331_v44, %v5330_v11  ;;  %v5333_v20 = vpop.f32.mrb[114].mxu0  ;;  %v3660_v11 = vpop.xlane.xlu1 %3659 }
 0x902   : > { %v5334_v42 = vpop.f32.mrb[115].mxu0  ;;  %v6056_v43 = vpop.eup %6055  ;;  %6063 = vrcp.f32 %v3660_v11 }
 0x903   : > { %v4030_v33 = vpack.c.bf16 %v4002_v35, %v4001_v58  ;;  %v3933_v12 = vmul.f32 %v6044_v5, %v5332_v16  ;;  %v5335_v8 = vadd.f32 %v5334_v42, %v5333_v20  ;;  %v6058_v29 = vpop.eup %6057  ;;  %v3663_v35 = vpop.xlane.xlu0 %3662 }
 0x904   : > { %6065 = vrcp.f32 %v3663_v35 }
 0x905   : > { %v3971_v34 = vadd.f32 %v8410_v36, %v3933_v12  ;;  %v3934_v25 = vmul.f32 %v6046_v7, %v5335_v8  ;;  %5589 = vmatmul.mubr.msk.bf16.gmra.mrb[100].mxu1 %vm808_vm1, %v4030_v33 }
 0x906   : > { %v6060_v7 = vpop.eup %6059 }
 0x907   : > { %v3972_v49 = vadd.f32 %v8410_v36, %v3934_v25  ;;  %v5336_v15 = vpop.f32.mrb[116].mxu0  ;;  %v4003_v56 = vmax.f32 %v3971_v34, 0.0 }
 0x908   : > { %v5337_v18 = vpop.f32.mrb[117].mxu0 }
 0x909   : > { %v4004_v55 = vmax.f32 %v3972_v49, 0.0  ;;  %v5338_v41 = vadd.f32 %v5337_v18, %v5336_v15  ;;  %v5339_v52 = vpop.f32.mrb[118].mxu0  ;;  %v6062_v18 = vpop.eup %6061 }
 0x90a   : > { %v5340_v1 = vpop.f32.mrb[119].mxu0 }
 0x90b   : > { %v4031_v57 = vpack.c.bf16 %v4004_v55, %v4003_v56  ;;  %v3935_v32 = vmul.f32 %v6048_v28, %v5338_v41  ;;  %v5341_v14 = vadd.f32 %v5340_v1, %v5339_v52  ;;  %v3666_v56 = vpop.xlane.xlu1 %3665  ;;  %v3669_v52 = vpop.xlane.xlu0 %3668 }
 0x90c   : > { %6067 = vrcp.f32 %v3666_v56 }
 0x90d   : > { %v3973_v46 = vadd.f32 %v8410_v36, %v3935_v32  ;;  %v3936_v6 = vmul.f32 %v6050_v3, %v5341_v14  ;;  %5592 = vmatprep.mubr.msk.bf16.mxu1 %vm808_vm1, %v4031_v57  ;;  %6069 = vrcp.f32 %v3669_v52 }
 0x90f   : > { %v3974_v63 = vadd.f32 %v8410_v36, %v3936_v6  ;;  %v4005_v31 = vmax.f32 %v3973_v46, 0.0  ;;  %v6064_v6 = vpop.eup %6063  ;;  %v3672_v10 = vpop.xlane.xlu1 %3671 }
 0x910   : > { %v6066_v40 = vpop.eup %6065  ;;  %6071 = vrcp.f32 %v3672_v10 }
 0x911   : > { %v4006_v30 = vmax.f32 %v3974_v63, 0.0 }
 0x913   : > { %v4032_v59 = vpack.c.bf16 %v4006_v30, %v4005_v31 }
 0x915   : > { %5593 = vmatmul.mubr.msk.bf16.gmra.mrb[104].mxu1 %vm808_vm1, %v4032_v59 }
 0x929   : > { %v5342_v21 = vpop.f32.mrb[120].mxu0 }
 0x92a   : > { %v5343_v45 = vpop.f32.mrb[121].mxu0 }
 0x92b   : > { %v5344_v50 = vadd.f32 %v5343_v45, %v5342_v21  ;;  %v5345_v2 = vpop.f32.mrb[122].mxu0  ;;  %v3675_v21 = vpop.xlane.xlu0 %3674 }
 0x92c   : > { %v5346_v38 = vpop.f32.mrb[123].mxu0  ;;  %6073 = vrcp.f32 %v3675_v21 }
 0x92d   : > { %v3937_v27 = vmul.f32 %v6052_v47, %v5344_v50  ;;  %v5347_v0 = vadd.f32 %v5346_v38, %v5345_v2 }
 0x92f   : > { %v3975_v26 = vadd.f32 %v8410_v36, %v3937_v27  ;;  %v3938_v62 = vmul.f32 %v6054_v48, %v5347_v0  ;;  %v6068_v48 = vpop.eup %6067 }
 0x931   : > { %v3976_v17 = vadd.f32 %v8410_v36, %v3938_v62  ;;  %v5348_v4 = vpop.f32.mrb[124].mxu0  ;;  %v4007_v61 = vmax.f32 %v3975_v26, 0.0 }
 0x932   : > { %v5349_v53 = vpop.f32.mrb[125].mxu0 }
 0x933   : > { %v4008_v51 = vmax.f32 %v3976_v17, 0.0  ;;  %v5350_v60 = vadd.f32 %v5349_v53, %v5348_v4  ;;  %v5351_v37 = vpop.f32.mrb[126].mxu0  ;;  %v6070_v17 = vpop.eup %6069 }
 0x934   : > { %v5352_v19 = vpop.f32.mrb[127].mxu0  ;;  %v3678_v4 = vpop.xlane.xlu1 %3677 }
 0x935   : > { %v4033_v23 = vpack.c.bf16 %v4008_v51, %v4007_v61  ;;  %v3939_v9 = vmul.f32 %v6056_v43, %v5350_v60  ;;  %v5353_v54 = vadd.f32 %v5352_v19, %v5351_v37  ;;  %v3681_v51 = vpop.xlane.xlu0 %3680  ;;  %v5705_v43 = vld [vmem:[%s8639_s10] sm:$0xff]   ;;  %v5706_v19 = vld [vmem:[%s8639_s10 + $0x8] sm:$0xff]   ;;  %6075 = vrcp.f32 %v3678_v4 }
 0x936   : > { %5616 = vmatprep.subr.bf16.mxu1 %v5705_v43  ;;  %6077 = vrcp.f32 %v3681_v51 }
 0x937   : > { %v3977_v44 = vadd.f32 %v8410_v36, %v3939_v9  ;;  %v3940_v58 = vmul.f32 %v6058_v29, %v5353_v54  ;;  %5596 = vmatprep.mubr.msk.bf16.mxu1 %vm808_vm1, %v4033_v23  ;;  %5617 = vmatpush3.bf16.msra.mxu1 %v5705_v43 }
 0x938   : > { %5618 = vmatprep.subr.bf16.mxu1 %v5706_v19 }
 0x939   : > { %v3978_v16 = vadd.f32 %v8410_v36, %v3940_v58  ;;  %v5354_v20 = vpop.f32.mrb[128].mxu0  ;;  %v4009_v42 = vmax.f32 %v3977_v44, 0.0  ;;  %v6072_v44 = vpop.eup %6071 }
 0x93a   : > { %v5355_v5 = vpop.f32.mrb[129].mxu0 }
 0x93b   : > { %v4010_v33 = vmax.f32 %v3978_v16, 0.0  ;;  %v5356_v12 = vadd.f32 %v5355_v5, %v5354_v20  ;;  %v5357_v8 = vpop.f32.mrb[130].mxu0  ;;  %v6074_v5 = vpop.eup %6073  ;;  %5619 = vmatpush3.bf16.msra.mxu1 %v5706_v19 }
 0x93c   : > { %v5358_v34 = vpop.f32.mrb[131].mxu0 }
 0x93d   : > { %v4034_v25 = vpack.c.bf16 %v4010_v33, %v4009_v42  ;;  %v3941_v49 = vmul.f32 %v6060_v7, %v5356_v12  ;;  %v5359_v15 = vadd.f32 %v5358_v34, %v5357_v8  ;;  %v3684_v42 = vpop.xlane.xlu1 %3683  ;;  %v3687_v8 = vpop.xlane.xlu0 %3686 }
 0x93e   : > { %6079 = vrcp.f32 %v3684_v42 }
 0x93f   : > { %v3979_v55 = vadd.f32 %v8410_v36, %v3941_v49  ;;  %v3942_v41 = vmul.f32 %v6062_v18, %v5359_v15  ;;  %5597 = vmatmul.mubr.msk.bf16.gmra.mrb[108].mxu1 %vm808_vm1, %v4034_v25  ;;  %6081 = vrcp.f32 %v3687_v8 }
 0x941   : > { %v3980_v28 = vadd.f32 %v8410_v36, %v3942_v41  ;;  %v5360_v1 = vpop.f32.mrb[132].mxu0  ;;  %v4011_v32 = vmax.f32 %v3979_v55, 0.0  ;;  %v6076_v55 = vpop.eup %6075 }
 0x942   : > { %v5361_v57 = vpop.f32.mrb[133].mxu0 }
 0x943   : > { %v4012_v14 = vmax.f32 %v3980_v28, 0.0  ;;  %v5362_v3 = vadd.f32 %v5361_v57, %v5360_v1  ;;  %v5363_v46 = vpop.f32.mrb[134].mxu0  ;;  %v6078_v57 = vpop.eup %6077 }
 0x944   : > { %v5364_v63 = vpop.f32.mrb[135].mxu0 }
 0x945   : > { %v4035_v31 = vpack.c.bf16 %v4012_v14, %v4011_v32  ;;  %v3943_v30 = vmul.f32 %v6064_v6, %v5362_v3  ;;  %v5365_v59 = vadd.f32 %v5364_v63, %v5363_v46  ;;  %v3690_v32 = vpop.xlane.xlu1 %3689  ;;  %v3693_v46 = vpop.xlane.xlu0 %3692 }
 0x946   : > { %6083 = vrcp.f32 %v3690_v32 }
 0x947   : > { %v3981_v24 = vadd.f32 %v8410_v36, %v3943_v30  ;;  %v3944_v39 = vmul.f32 %v6066_v40, %v5365_v59  ;;  %5600 = vmatprep.mubr.msk.bf16.mxu1 %vm808_vm1, %v4035_v31  ;;  %6085 = vrcp.f32 %v3693_v46 }
 0x949   : > { %v3982_v45 = vadd.f32 %v8410_v36, %v3944_v39  ;;  %v5366_v50 = vpop.f32.mrb[136].mxu0  ;;  %v4013_v47 = vmax.f32 %v3981_v24, 0.0  ;;  %v6080_v24 = vpop.eup %6079 }
 0x94a   : > { %v5367_v2 = vpop.f32.mrb[137].mxu0 }
 0x94b   : > { %v4014_v38 = vmax.f32 %v3982_v45, 0.0  ;;  %v5368_v27 = vadd.f32 %v5367_v2, %v5366_v50  ;;  %v5369_v0 = vpop.f32.mrb[138].mxu0  ;;  %v6082_v2 = vpop.eup %6081 }
 0x94c   : > { %v5370_v13 = vpop.f32.mrb[139].mxu0 }
 0x94d   : > { %v4036_v26 = vpack.c.bf16 %v4014_v38, %v4013_v47  ;;  %v3945_v62 = vmul.f32 %v6068_v48, %v5368_v27  ;;  %v5371_v22 = vadd.f32 %v5370_v13, %v5369_v0 }
 0x94f   : > { %v3983_v53 = vadd.f32 %v8410_v36, %v3945_v62  ;;  %v3946_v61 = vmul.f32 %v6070_v17, %v5371_v22  ;;  %5601 = vmatmul.mubr.msk.bf16.gmra.mrb[112].mxu1 %vm808_vm1, %v4036_v26 }
 0x950   : > { %v6084_v17 = vpop.eup %6083 }
 0x951   : > { %v3984_v60 = vadd.f32 %v8410_v36, %v3946_v61  ;;  %v5372_v37 = vpop.f32.mrb[140].mxu0  ;;  %v4015_v9 = vmax.f32 %v3983_v53, 0.0 }
 0x952   : > { %v5373_v23 = vpop.f32.mrb[141].mxu0 }
 0x953   : > { %v4016_v54 = vmax.f32 %v3984_v60, 0.0  ;;  %v5374_v29 = vadd.f32 %v5373_v23, %v5372_v37  ;;  %v5375_v11 = vpop.f32.mrb[142].mxu0  ;;  %v6086_v60 = vpop.eup %6085 }
 0x954   : > { %v5376_v58 = vpop.f32.mrb[143].mxu0 }
 0x955   : > { %v4037_v35 = vpack.c.bf16 %v4016_v54, %v4015_v9  ;;  %v3947_v16 = vmul.f32 %v6072_v44, %v5374_v29  ;;  %v5377_v20 = vadd.f32 %v5376_v58, %v5375_v11  ;;  %v3696_v29 = vpop.xlane.xlu1 %3695  ;;  %v3699_v11 = vpop.xlane.xlu0 %3698 }
 0x956   : > { %6087 = vrcp.f32 %v3696_v29 }
 0x957   : > { %v3985_v33 = vadd.f32 %v8410_v36, %v3947_v16  ;;  %v3948_v12 = vmul.f32 %v6074_v5, %v5377_v20  ;;  %5604 = vmatprep.mubr.msk.bf16.mxu1 %vm808_vm1, %v4037_v35  ;;  %6089 = vrcp.f32 %v3699_v11 }
 0x959   : > { %v3986_v7 = vadd.f32 %v8410_v36, %v3948_v12  ;;  %v5378_v34 = vpop.f32.mrb[144].mxu0  ;;  %v4017_v49 = vmax.f32 %v3985_v33, 0.0 }
 0x95a   : > { %v5379_v25 = vpop.f32.mrb[145].mxu0 }
 0x95b   : > { %v4018_v15 = vmax.f32 %v3986_v7, 0.0  ;;  %v5380_v18 = vadd.f32 %v5379_v25, %v5378_v34  ;;  %v5381_v56 = vpop.f32.mrb[146].mxu0 }
 0x95c   : > { %v5382_v41 = vpop.f32.mrb[147].mxu0 }
 0x95d   : > { %v4038_v52 = vpack.c.bf16 %v4018_v15, %v4017_v49  ;;  %v3949_v28 = vmul.f32 %v6076_v55, %v5380_v18  ;;  %v5383_v1 = vadd.f32 %v5382_v41, %v5381_v56  ;;  %v8469_v18 = vld [vmem:[%s8638_s9] ss:$0 sm:$0xff] }
 0x95f   : > { %v3987_v14 = vadd.f32 %v8410_v36, %v3949_v28  ;;  %v3950_v3 = vmul.f32 %v6078_v57, %v5383_v1  ;;  %5605 = vmatmul.mubr.msk.bf16.gmra.mrb[116].mxu1 %vm808_vm1, %v4038_v52 }
 0x960   : > { %v6088_v20 = vpop.eup %6087 }
 0x961   : > { %v3988_v6 = vadd.f32 %v8410_v36, %v3950_v3  ;;  %v5384_v63 = vpop.f32.mrb[148].mxu0  ;;  %v4019_v30 = vmax.f32 %v3987_v14, 0.0  ;;  %v6090_v12 = vpop.eup %6089 }
 0x962   : > { %v5385_v31 = vpop.f32.mrb[149].mxu0 }
 0x963   : > { %v4020_v59 = vmax.f32 %v3988_v6, 0.0  ;;  %v5386_v40 = vadd.f32 %v5385_v31, %v5384_v63  ;;  %v5387_v10 = vpop.f32.mrb[150].mxu0 }
 0x964   : > { %v5388_v39 = vpop.f32.mrb[151].mxu0 }
 0x965   : > { %v4039_v21 = vpack.c.bf16 %v4020_v59, %v4019_v30  ;;  %v3951_v45 = vmul.f32 %v6080_v24, %v5386_v40  ;;  %v5389_v50 = vadd.f32 %v5388_v39, %v5387_v10 }
 0x967   : > { %v3989_v47 = vadd.f32 %v8410_v36, %v3951_v45  ;;  %v3952_v38 = vmul.f32 %v6082_v2, %v5389_v50  ;;  %5608 = vmatprep.mubr.msk.bf16.mxu1 %vm808_vm1, %v4039_v21 }
 0x969   : > { %v3990_v27 = vadd.f32 %v8410_v36, %v3952_v38  ;;  %v5390_v0 = vpop.f32.mrb[152].mxu0  ;;  %v4021_v13 = vmax.f32 %v3989_v47, 0.0 }
 0x96a   : > { %v5391_v48 = vpop.f32.mrb[153].mxu0 }
 0x96b   : > { %v4022_v26 = vmax.f32 %v3990_v27, 0.0  ;;  %v5392_v62 = vadd.f32 %v5391_v48, %v5390_v0  ;;  %v5393_v22 = vpop.f32.mrb[154].mxu0 }
 0x96c   : > { %v5394_v4 = vpop.f32.mrb[155].mxu0 }
 0x96d   : > { %v4040_v53 = vpack.c.bf16 %v4022_v26, %v4021_v13  ;;  %v3953_v61 = vmul.f32 %v6084_v17, %v5392_v62  ;;  %v5395_v51 = vadd.f32 %v5394_v4, %v5393_v22 }
 0x96f   : > { %v3991_v37 = vadd.f32 %v8410_v36, %v3953_v61  ;;  %v3954_v43 = vmul.f32 %v6086_v60, %v5395_v51  ;;  %5609 = vmatmul.mubr.msk.bf16.gmra.mrb[120].mxu1 %vm808_vm1, %v4040_v53 }
 0x971   : > { %v3992_v19 = vadd.f32 %v8410_v36, %v3954_v43  ;;  %v4023_v23 = vmax.f32 %v3991_v37, 0.0 }
 0x973   : > { %v4024_v9 = vmax.f32 %v3992_v19, 0.0 }
 0x975   : > { %v4041_v54 = vpack.c.bf16 %v4024_v9, %v4023_v23 }
 0x977   : > { %5612 = vmatprep.mubr.msk.bf16.mxu1 %vm808_vm1, %v4041_v54 }
 0x992   : > { %v5396_v44 = vpop.f32.mrb[156].mxu0 }
 0x993   : > { %v5397_v58 = vpop.f32.mrb[157].mxu0 }
 0x994   : > { %v5398_v35 = vadd.f32 %v5397_v58, %v5396_v44  ;;  %v5399_v16 = vpop.f32.mrb[158].mxu0 }
 0x995   : > { %v5400_v5 = vpop.f32.mrb[159].mxu0 }
 0x996   : > { %v3955_v42 = vmul.f32 %v6088_v20, %v5398_v35  ;;  %v5401_v33 = vadd.f32 %v5400_v5, %v5399_v16 }
 0x998   : > { %v3993_v8 = vadd.f32 %v8410_v36, %v3955_v42  ;;  %v3956_v7 = vmul.f32 %v6090_v12, %v5401_v33 }
 0x99a   : > { %v3994_v34 = vadd.f32 %v8410_v36, %v3956_v7  ;;  %v4025_v25 = vmax.f32 %v3993_v8, 0.0 }
 0x99c   : > { %v4026_v49 = vmax.f32 %v3994_v34, 0.0 }
 0x99e   : > { %v4042_v15 = vpack.c.bf16 %v4026_v49, %v4025_v25 }
 0x9a0   : > { %5613 = vmatmul.mubr.msk.bf16.gmra.mrb[124].mxu1 %vm808_vm1, %v4042_v15 }
 0x9c5   : > { %v5586_v56 = vpop.f32.mrb[96].mxu1 }
 0x9c6   : > { %v4157_v55 = vadd.f32 %v5586_v56, %v8469_v18  ;;  %v4148_v41 = vpop.f32.mrb[97].mxu1 }
 0x9c7   : > { %v4149_v52 = vadd.f32 %v8469_v18, %v4148_v41  ;;  %v5587_v28 = vpop.f32.mrb[98].mxu1 }
 0x9c8   : > { %v4160_v1 = vadd.f32 %v5587_v28, %v8469_v18  ;;  %v4151_v36 = vpop.f32.mrb[99].mxu1  ;;  %v4277_v32 = vmax.f32 %v4157_v55, 0.0 }
 0x9c9   : > { %v4152_v57 = vadd.f32 %v8469_v18, %v4151_v36  ;;  %v4275_v3 = vmax.f32 %v4149_v52, 0.0 }
 0x9ca   : > { %v4278_v14 = vmax.f32 %v4160_v1, 0.0 }
 0x9cb   : > { %v4276_v46 = vmax.f32 %v4152_v57, 0.0 }
 0x9cc   : > { %v4308_v6 = vpack.c.bf16 %v4278_v14, %v4277_v32 }
 0x9cd   : > { %v4307_v63 = vpack.c.bf16 %v4276_v46, %v4275_v3 }
 0x9cf   : > { %5620 = vmatprep.mubr.msk.bf16.mxu1 %vm808_vm1, %v4307_v63 }
 0x9d0   : > { %5621 = vmatmul.mubr.msk.bf16.vlgmr.msra.gmra.mrb[128].mxu1 %vm808_vm1, %v4308_v6 }
 0x9d8   : > { %v5590_v31 = vpop.f32.mrb[100].mxu1 }
 0x9d9   : > { %v4173_v30 = vadd.f32 %v5590_v31, %v8469_v18  ;;  %v4164_v59 = vpop.f32.mrb[101].mxu1 }
 0x9da   : > { %v4165_v40 = vadd.f32 %v8469_v18, %v4164_v59  ;;  %v5591_v10 = vpop.f32.mrb[102].mxu1 }
 0x9db   : > { %v4176_v24 = vadd.f32 %v5591_v10, %v8469_v18  ;;  %v4167_v39 = vpop.f32.mrb[103].mxu1  ;;  %v4281_v45 = vmax.f32 %v4173_v30, 0.0 }
 0x9dc   : > { %v4168_v21 = vadd.f32 %v8469_v18, %v4167_v39  ;;  %v4279_v2 = vmax.f32 %v4165_v40, 0.0 }
 0x9dd   : > { %v4282_v50 = vmax.f32 %v4176_v24, 0.0 }
 0x9de   : > { %v4280_v47 = vmax.f32 %v4168_v21, 0.0 }
 0x9df   : > { %v4310_v38 = vpack.c.bf16 %v4282_v50, %v4281_v45 }
 0x9e0   : > { %v4309_v27 = vpack.c.bf16 %v4280_v47, %v4279_v2 }
 0x9e2   : > { %5624 = vmatprep.mubr.msk.bf16.mxu1 %vm808_vm1, %v4309_v27 }
 0x9e3   : > { %5625 = vmatmul.mubr.msk.bf16.gmra.mrb[132].mxu1 %vm808_vm1, %v4310_v38 }
 0x9e8   : > { %v5594_v0 = vpop.f32.mrb[104].mxu1 }
 0x9e9   : > { %v4189_v48 = vadd.f32 %v5594_v0, %v8469_v18  ;;  %v4180_v13 = vpop.f32.mrb[105].mxu1 }
 0x9ea   : > { %v4181_v26 = vadd.f32 %v8469_v18, %v4180_v13  ;;  %v5595_v62 = vpop.f32.mrb[106].mxu1 }
 0x9eb   : > { %v4192_v22 = vadd.f32 %v5595_v62, %v8469_v18  ;;  %v4183_v17 = vpop.f32.mrb[107].mxu1  ;;  %v4285_v53 = vmax.f32 %v4189_v48, 0.0 }
 0x9ec   : > { %v4184_v4 = vadd.f32 %v8469_v18, %v4183_v17  ;;  %v4283_v51 = vmax.f32 %v4181_v26, 0.0 }
 0x9ed   : > { %v4286_v61 = vmax.f32 %v4192_v22, 0.0 }
 0x9ee   : > { %v4284_v60 = vmax.f32 %v4184_v4, 0.0 }
 0x9ef   : > { %v4312_v37 = vpack.c.bf16 %v4286_v61, %v4285_v53 }
 0x9f0   : > { %v4311_v43 = vpack.c.bf16 %v4284_v60, %v4283_v51 }
 0x9f2   : > { %5628 = vmatprep.mubr.msk.bf16.mxu1 %vm808_vm1, %v4311_v43 }
 0x9f3   : > { %5629 = vmatmul.mubr.msk.bf16.gmra.mrb[136].mxu1 %vm808_vm1, %v4312_v37 }
 0xa12   : > { %v5598_v19 = vpop.f32.mrb[108].mxu1 }
 0xa13   : > { %v4205_v23 = vadd.f32 %v5598_v19, %v8469_v18  ;;  %v4196_v9 = vpop.f32.mrb[109].mxu1 }
 0xa14   : > { %v4197_v54 = vadd.f32 %v8469_v18, %v4196_v9  ;;  %v5599_v29 = vpop.f32.mrb[110].mxu1 }
 0xa15   : > { %v4208_v11 = vadd.f32 %v5599_v29, %v8469_v18  ;;  %v4199_v44 = vpop.f32.mrb[111].mxu1  ;;  %v4289_v35 = vmax.f32 %v4205_v23, 0.0 }
 0xa16   : > { %v4200_v58 = vadd.f32 %v8469_v18, %v4199_v44  ;;  %v4287_v20 = vmax.f32 %v4197_v54, 0.0 }
 0xa17   : > { %v4290_v16 = vmax.f32 %v4208_v11, 0.0 }
 0xa18   : > { %v4288_v5 = vmax.f32 %v4200_v58, 0.0  ;;  %v8522_v58 = vld [vmem:[%s8640_s11] ss:$0 sm:$0xff] }
 0xa19   : > { %v4314_v42 = vpack.c.bf16 %v4290_v16, %v4289_v35 }
 0xa1a   : > { %v4313_v33 = vpack.c.bf16 %v4288_v5, %v4287_v20 }
 0xa1c   : > { %5632 = vmatprep.mubr.msk.bf16.mxu1 %vm808_vm1, %v4313_v33 }
 0xa1d   : > { %5633 = vmatmul.mubr.msk.bf16.gmra.mrb[140].mxu1 %vm808_vm1, %v4314_v42 }
 0xa22   : > { %v5602_v12 = vpop.f32.mrb[112].mxu1 }
 0xa23   : > { %v4221_v8 = vadd.f32 %v5602_v12, %v8469_v18  ;;  %v4212_v7 = vpop.f32.mrb[113].mxu1 }
 0xa24   : > { %v4213_v34 = vadd.f32 %v8469_v18, %v4212_v7  ;;  %v5603_v25 = vpop.f32.mrb[114].mxu1 }
 0xa25   : > { %v4224_v49 = vadd.f32 %v5603_v25, %v8469_v18  ;;  %v4215_v15 = vpop.f32.mrb[115].mxu1  ;;  %v4293_v55 = vmax.f32 %v4221_v8, 0.0 }
 0xa26   : > { %v4216_v56 = vadd.f32 %v8469_v18, %v4215_v15  ;;  %v4291_v52 = vmax.f32 %v4213_v34, 0.0 }
 0xa27   : > { %v4294_v41 = vmax.f32 %v4224_v49, 0.0 }
 0xa28   : > { %v4292_v28 = vmax.f32 %v4216_v56, 0.0 }
 0xa29   : > { %v4316_v1 = vpack.c.bf16 %v4294_v41, %v4293_v55 }
 0xa2a   : > { %v4315_v36 = vpack.c.bf16 %v4292_v28, %v4291_v52 }
 0xa2c   : > { %5636 = vmatprep.mubr.msk.bf16.mxu1 %vm808_vm1, %v4315_v36 }
 0xa2d   : > { %5637 = vmatmul.mubr.msk.bf16.gmra.mrb[144].mxu1 %vm808_vm1, %v4316_v1 }
 0xa32   : > { %v5606_v57 = vpop.f32.mrb[116].mxu1 }
 0xa33   : > { %v4237_v32 = vadd.f32 %v5606_v57, %v8469_v18  ;;  %v4228_v14 = vpop.f32.mrb[117].mxu1 }
 0xa34   : > { %v4229_v3 = vadd.f32 %v8469_v18, %v4228_v14  ;;  %v5607_v46 = vpop.f32.mrb[118].mxu1 }
 0xa35   : > { %v4240_v6 = vadd.f32 %v5607_v46, %v8469_v18  ;;  %v4231_v63 = vpop.f32.mrb[119].mxu1  ;;  %v4297_v30 = vmax.f32 %v4237_v32, 0.0 }
 0xa36   : > { %v4232_v31 = vadd.f32 %v8469_v18, %v4231_v63  ;;  %v4295_v40 = vmax.f32 %v4229_v3, 0.0 }
 0xa37   : > { %v4298_v59 = vmax.f32 %v4240_v6, 0.0 }
 0xa38   : > { %v4296_v10 = vmax.f32 %v4232_v31, 0.0 }
 0xa39   : > { %v4318_v24 = vpack.c.bf16 %v4298_v59, %v4297_v30 }
 0xa3a   : > { %v4317_v39 = vpack.c.bf16 %v4296_v10, %v4295_v40 }
 0xa3c   : > { %5640 = vmatprep.mubr.msk.bf16.mxu1 %vm808_vm1, %v4317_v39 }
 0xa3d   : > { %5641 = vmatmul.mubr.msk.bf16.gmra.mrb[148].mxu1 %vm808_vm1, %v4318_v24 }
 0xa42   : > { %v5610_v21 = vpop.f32.mrb[120].mxu1 }
 0xa43   : > { %v4253_v45 = vadd.f32 %v5610_v21, %v8469_v18  ;;  %v4244_v50 = vpop.f32.mrb[121].mxu1 }
 0xa44   : > { %v4245_v2 = vadd.f32 %v8469_v18, %v4244_v50  ;;  %v5611_v47 = vpop.f32.mrb[122].mxu1 }
 0xa45   : > { %v4256_v38 = vadd.f32 %v5611_v47, %v8469_v18  ;;  %v4247_v27 = vpop.f32.mrb[123].mxu1  ;;  %v4301_v48 = vmax.f32 %v4253_v45, 0.0 }
 0xa46   : > { %v4248_v0 = vadd.f32 %v8469_v18, %v4247_v27  ;;  %v4299_v26 = vmax.f32 %v4245_v2, 0.0 }
 0xa47   : > { %v4302_v13 = vmax.f32 %v4256_v38, 0.0 }
 0xa48   : > { %v4300_v62 = vmax.f32 %v4248_v0, 0.0 }
 0xa49   : > { %v4320_v22 = vpack.c.bf16 %v4302_v13, %v4301_v48 }
 0xa4a   : > { %v4319_v17 = vpack.c.bf16 %v4300_v62, %v4299_v26 }
 0xa4c   : > { %5644 = vmatprep.mubr.msk.bf16.mxu1 %vm808_vm1, %v4319_v17 }
 0xa4d   : > { %5645 = vmatmul.mubr.msk.bf16.gmra.mrb[152].mxu1 %vm808_vm1, %v4320_v22 }
 0xa73   : > { %v5614_v4 = vpop.f32.mrb[124].mxu1 }
 0xa74   : > { %v4269_v53 = vadd.f32 %v5614_v4, %v8469_v18  ;;  %v4260_v61 = vpop.f32.mrb[125].mxu1 }
 0xa75   : > { %v4261_v51 = vadd.f32 %v8469_v18, %v4260_v61  ;;  %v5615_v60 = vpop.f32.mrb[126].mxu1 }
 0xa76   : > { %v4272_v37 = vadd.f32 %v5615_v60, %v8469_v18  ;;  %v4263_v43 = vpop.f32.mrb[127].mxu1  ;;  %v4305_v23 = vmax.f32 %v4269_v53, 0.0 }
 0xa77   : > { %v4264_v19 = vadd.f32 %v8469_v18, %v4263_v43  ;;  %v4303_v54 = vmax.f32 %v4261_v51, 0.0 }
 0xa78   : > { %v4306_v9 = vmax.f32 %v4272_v37, 0.0 }
 0xa79   : > { %v4304_v29 = vmax.f32 %v4264_v19, 0.0 }
 0xa7a   : > { %v4322_v11 = vpack.c.bf16 %v4306_v9, %v4305_v23 }
 0xa7b   : > { %v4321_v44 = vpack.c.bf16 %v4304_v29, %v4303_v54 }
 0xa7d   : > { %5648 = vmatprep.mubr.msk.bf16.mxu1 %vm808_vm1, %v4321_v44 }
 0xa7e   : > { %5649 = vmatmul.mubr.msk.bf16.gmra.mrb[156].mxu1 %vm808_vm1, %v4322_v11 }
 0xaa3   : > { %v5622_v35 = vpop.f32.mrb[128].mxu1 }
 0xaa4   : > { %v4437_v18 = vadd.f32 %v5622_v35, %v8522_v58  ;;  %v4428_v16 = vpop.f32.mrb[129].mxu1 }
 0xaa5   : > { %v4429_v20 = vadd.f32 %v8522_v58, %v4428_v16  ;;  %v5623_v5 = vpop.f32.mrb[130].mxu1 }
 0xaa6   : > { %6091 = vtanh.f32 %v4437_v18  ;;  %v4440_v42 = vadd.f32 %v5623_v5, %v8522_v58  ;;  %v4431_v33 = vpop.f32.mrb[131].mxu1 }
 0xaa7   : > { %6093 = vtanh.f32 %v4429_v20  ;;  %v4432_v12 = vadd.f32 %v8522_v58, %v4431_v33 }
 0xaa8   : > { %6095 = vtanh.f32 %v4440_v42 }
 0xaa9   : > { %6097 = vtanh.f32 %v4432_v12 }
 0xab0   : > { %v6092_v8 = vpop.eup %6091 }
 0xab1   : > { %v6094_v7 = vpop.eup %6093 }
 0xab2   : > { %v6096_v34 = vpop.eup %6095 }
 0xab3   : > { %v6098_v25 = vpop.eup %6097  ;;  %v5020_v49 = vpack.c.bf16 %v6096_v34, %v6092_v8 }
 0xab4   : > { %v5015_v56 = vpack.c.bf16 %v6098_v25, %v6094_v7 }
 0xab5   : > { %5092 = vst [vmem:[%s8532_s17 + $0x8] sm:$0xff] %v5020_v49  }
 0xab6   : > { %v5626_v15 = vpop.f32.mrb[132].mxu1  ;;  %5016 = vst [vmem:[%s8532_s17] sm:$0xff] %v5015_v56  }
 0xab7   : > { %v4453_v55 = vadd.f32 %v5626_v15, %v8522_v58  ;;  %v4444_v41 = vpop.f32.mrb[133].mxu1 }
 0xab8   : > { %v4445_v52 = vadd.f32 %v8522_v58, %v4444_v41  ;;  %v5627_v28 = vpop.f32.mrb[134].mxu1 }
 0xab9   : > { %6099 = vtanh.f32 %v4453_v55  ;;  %v4456_v1 = vadd.f32 %v5627_v28, %v8522_v58  ;;  %v4447_v36 = vpop.f32.mrb[135].mxu1 }
 0xaba   : > { %6101 = vtanh.f32 %v4445_v52  ;;  %v4448_v57 = vadd.f32 %v8522_v58, %v4447_v36 }
 0xabb   : > { %6103 = vtanh.f32 %v4456_v1 }
 0xabc   : > { %6105 = vtanh.f32 %v4448_v57 }
 0xac3   : > { %v6100_v32 = vpop.eup %6099 }
 0xac4   : > { %v6102_v14 = vpop.eup %6101 }
 0xac5   : > { %v6104_v3 = vpop.eup %6103 }
 0xac6   : > { %v6106_v46 = vpop.eup %6105  ;;  %v5030_v6 = vpack.c.bf16 %v6104_v3, %v6100_v32  ;;  %v5630_v63 = vpop.f32.mrb[136].mxu1 }
 0xac7   : > { %v5025_v31 = vpack.c.bf16 %v6106_v46, %v6102_v14  ;;  %v4469_v30 = vadd.f32 %v5630_v63, %v8522_v58  ;;  %v4460_v59 = vpop.f32.mrb[137].mxu1 }
 0xac8   : > { %5094 = vst [vmem:[%s8532_s17 + $0x18] sm:$0xff] %v5030_v6   ;;  %v4461_v40 = vadd.f32 %v8522_v58, %v4460_v59  ;;  %v5631_v10 = vpop.f32.mrb[138].mxu1 }
 0xac9   : > { %5093 = vst [vmem:[%s8532_s17 + $0x10] sm:$0xff] %v5025_v31   ;;  %6107 = vtanh.f32 %v4469_v30  ;;  %v4472_v24 = vadd.f32 %v5631_v10, %v8522_v58  ;;  %v4463_v39 = vpop.f32.mrb[139].mxu1 }
 0xaca   : > { %6109 = vtanh.f32 %v4461_v40  ;;  %v4464_v21 = vadd.f32 %v8522_v58, %v4463_v39 }
 0xacb   : > { %6111 = vtanh.f32 %v4472_v24 }
 0xacc   : > { %6113 = vtanh.f32 %v4464_v21 }
 0xad3   : > { %v6108_v45 = vpop.eup %6107 }
 0xad4   : > { %v6110_v50 = vpop.eup %6109 }
 0xad5   : > { %v6112_v2 = vpop.eup %6111 }
 0xad6   : > { %v6114_v47 = vpop.eup %6113  ;;  %v5040_v38 = vpack.c.bf16 %v6112_v2, %v6108_v45 }
 0xad7   : > { %v5035_v27 = vpack.c.bf16 %v6114_v47, %v6110_v50 }
 0xad8   : > { %5096 = vst [vmem:[%s8532_s17 + $0x28] sm:$0xff] %v5040_v38  }
 0xad9   : > { %5095 = vst [vmem:[%s8532_s17 + $0x20] sm:$0xff] %v5035_v27  }
 0xaf0   : > { %v5634_v0 = vpop.f32.mrb[140].mxu1 }
 0xaf1   : > { %v4485_v48 = vadd.f32 %v5634_v0, %v8522_v58  ;;  %v4476_v13 = vpop.f32.mrb[141].mxu1 }
 0xaf2   : > { %v4477_v26 = vadd.f32 %v8522_v58, %v4476_v13  ;;  %v5635_v62 = vpop.f32.mrb[142].mxu1 }
 0xaf3   : > { %6115 = vtanh.f32 %v4485_v48  ;;  %v4488_v22 = vadd.f32 %v5635_v62, %v8522_v58  ;;  %v4479_v17 = vpop.f32.mrb[143].mxu1 }
 0xaf4   : > { %6117 = vtanh.f32 %v4477_v26  ;;  %v4480_v4 = vadd.f32 %v8522_v58, %v4479_v17 }
 0xaf5   : > { %6119 = vtanh.f32 %v4488_v22 }
 0xaf6   : > { %6121 = vtanh.f32 %v4480_v4 }
 0xafd   : > { %v6116_v53 = vpop.eup %6115 }
 0xafe   : > { %v6118_v61 = vpop.eup %6117 }
 0xaff   : > { %v6120_v51 = vpop.eup %6119 }
 0xb00   : > { %v6122_v60 = vpop.eup %6121  ;;  %v5050_v37 = vpack.c.bf16 %v6120_v51, %v6116_v53  ;;  %v5638_v43 = vpop.f32.mrb[144].mxu1 }
 0xb01   : > { %v5045_v19 = vpack.c.bf16 %v6122_v60, %v6118_v61  ;;  %v4501_v23 = vadd.f32 %v5638_v43, %v8522_v58  ;;  %v4492_v9 = vpop.f32.mrb[145].mxu1 }
 0xb02   : > { %5098 = vst [vmem:[%s8532_s17 + $0x38] sm:$0xff] %v5050_v37   ;;  %v4493_v54 = vadd.f32 %v8522_v58, %v4492_v9  ;;  %v5639_v29 = vpop.f32.mrb[146].mxu1 }
 0xb03   : > { %5097 = vst [vmem:[%s8532_s17 + $0x30] sm:$0xff] %v5045_v19   ;;  %6123 = vtanh.f32 %v4501_v23  ;;  %v4504_v11 = vadd.f32 %v5639_v29, %v8522_v58  ;;  %v4495_v44 = vpop.f32.mrb[147].mxu1 }
 0xb04   : > { %6125 = vtanh.f32 %v4493_v54  ;;  %v4496_v35 = vadd.f32 %v8522_v58, %v4495_v44 }
 0xb05   : > { %6127 = vtanh.f32 %v4504_v11 }
 0xb06   : > { %6129 = vtanh.f32 %v4496_v35 }
 0xb0d   : > { %v6124_v18 = vpop.eup %6123 }
 0xb0e   : > { %v6126_v16 = vpop.eup %6125 }
 0xb0f   : > { %v6128_v20 = vpop.eup %6127 }
 0xb10   : > { %v6130_v5 = vpop.eup %6129  ;;  %v5060_v42 = vpack.c.bf16 %v6128_v20, %v6124_v18  ;;  %v5642_v33 = vpop.f32.mrb[148].mxu1 }
 0xb11   : > { %v5055_v12 = vpack.c.bf16 %v6130_v5, %v6126_v16  ;;  %v4517_v8 = vadd.f32 %v5642_v33, %v8522_v58  ;;  %v4508_v7 = vpop.f32.mrb[149].mxu1 }
 0xb12   : > { %5100 = vst [vmem:[%s8532_s17 + $0x48] sm:$0xff] %v5060_v42   ;;  %v4509_v34 = vadd.f32 %v8522_v58, %v4508_v7  ;;  %v5643_v25 = vpop.f32.mrb[150].mxu1 }
 0xb13   : > { %5099 = vst [vmem:[%s8532_s17 + $0x40] sm:$0xff] %v5055_v12   ;;  %6131 = vtanh.f32 %v4517_v8  ;;  %v4520_v49 = vadd.f32 %v5643_v25, %v8522_v58  ;;  %v4511_v15 = vpop.f32.mrb[151].mxu1 }
 0xb14   : > { %6133 = vtanh.f32 %v4509_v34  ;;  %v4512_v56 = vadd.f32 %v8522_v58, %v4511_v15 }
 0xb15   : > { %6135 = vtanh.f32 %v4520_v49 }
 0xb16   : > { %6137 = vtanh.f32 %v4512_v56 }
 0xb1d   : > { %v6132_v55 = vpop.eup %6131 }
 0xb1e   : > { %v6134_v41 = vpop.eup %6133 }
 0xb1f   : > { %v6136_v52 = vpop.eup %6135 }
 0xb20   : > { %v6138_v28 = vpop.eup %6137  ;;  %v5070_v1 = vpack.c.bf16 %v6136_v52, %v6132_v55  ;;  %v5646_v36 = vpop.f32.mrb[152].mxu1 }
 0xb21   : > { %v5065_v57 = vpack.c.bf16 %v6138_v28, %v6134_v41  ;;  %v4533_v32 = vadd.f32 %v5646_v36, %v8522_v58  ;;  %v4524_v14 = vpop.f32.mrb[153].mxu1 }
 0xb22   : > { %5102 = vst [vmem:[%s8532_s17 + $0x58] sm:$0xff] %v5070_v1   ;;  %v4525_v3 = vadd.f32 %v8522_v58, %v4524_v14  ;;  %v5647_v46 = vpop.f32.mrb[154].mxu1 }
 0xb23   : > { %5101 = vst [vmem:[%s8532_s17 + $0x50] sm:$0xff] %v5065_v57   ;;  %6139 = vtanh.f32 %v4533_v32  ;;  %v4536_v6 = vadd.f32 %v5647_v46, %v8522_v58  ;;  %v4527_v63 = vpop.f32.mrb[155].mxu1 }
 0xb24   : > { %6141 = vtanh.f32 %v4525_v3  ;;  %v4528_v31 = vadd.f32 %v8522_v58, %v4527_v63 }
 0xb25   : > { %6143 = vtanh.f32 %v4536_v6 }
 0xb26   : > { %6145 = vtanh.f32 %v4528_v31 }
 0xb2d   : > { %v6140_v30 = vpop.eup %6139 }
 0xb2e   : > { %v6142_v59 = vpop.eup %6141 }
 0xb2f   : > { %v6144_v40 = vpop.eup %6143 }
 0xb30   : > { %v6146_v10 = vpop.eup %6145  ;;  %v5080_v24 = vpack.c.bf16 %v6144_v40, %v6140_v30 }
 0xb31   : > { %v5075_v39 = vpack.c.bf16 %v6146_v10, %v6142_v59 }
 0xb32   : > { %5104 = vst [vmem:[%s8532_s17 + $0x68] sm:$0xff] %v5080_v24  }
 0xb33   : > { %5103 = vst [vmem:[%s8532_s17 + $0x60] sm:$0xff] %v5075_v39  }
 0xb51   : > { %v5650_v21 = vpop.f32.mrb[156].mxu1 }
 0xb52   : > { %v4549_v45 = vadd.f32 %v5650_v21, %v8522_v58  ;;  %v4540_v50 = vpop.f32.mrb[157].mxu1 }
 0xb53   : > { %v4541_v2 = vadd.f32 %v8522_v58, %v4540_v50  ;;  %v5651_v47 = vpop.f32.mrb[158].mxu1 }
 0xb54   : > { %6147 = vtanh.f32 %v4549_v45  ;;  %v4552_v38 = vadd.f32 %v5651_v47, %v8522_v58  ;;  %v4543_v27 = vpop.f32.mrb[159].mxu1 }
 0xb55   : > { %6149 = vtanh.f32 %v4541_v2  ;;  %v4544_v0 = vadd.f32 %v8522_v58, %v4543_v27 }
 0xb56   : > { %6151 = vtanh.f32 %v4552_v38 }
 0xb57   : > { %6153 = vtanh.f32 %v4544_v0 }
 0xb5e   : > { %v6148_v48 = vpop.eup %6147 }
 0xb5f   : > { %v6150_v13 = vpop.eup %6149 }
 0xb60   : > { %v6152_v26 = vpop.eup %6151 }
 0xb61   : > { %v6154_v62 = vpop.eup %6153  ;;  %v5090_v22 = vpack.c.bf16 %v6152_v26, %v6148_v48 }
 0xb62   : > { %v5085_v58 = vpack.c.bf16 %v6154_v62, %v6150_v13 }
 0xb63   : > { %5106 = vst [vmem:[%s8532_s17 + $0x78] sm:$0xff] %v5090_v22  }
 0xb64   : > { %5105 = vst [vmem:[%s8532_s17 + $0x70] sm:$0xff] %v5085_v58  }
 0xb65   : > { %6168 = shalt.err (!%p6165_p3)
}
 0xb66   : > { %s6169_s15 = scalar_lea.hbm %s8580_s28, 2048  ;;  %s6173_s26 = scalar_lea.hbm %s8641_s12, 4096 }
 0xb67   : > { %p6170_p4 = scmp.ne.s32.totalorder %s8580_s28, %s6169_s15  ;;  %p6174_p9 = scmp.lt.u32.totalorder %s8580_s28, %s8641_s12 }
 0xb68   : > { %p6175_p10 = scmp.lt.u32.totalorder %s6173_s26, %s6169_s15  ;;  %p6177_p12 = scmp.lt.u32.totalorder %s6169_s15, %s8580_s28 }
 0xb69   : > { %p6171_p7 = pnand %p6170_p4, %p6326_p5 }
 0xb6a   : > { %p6176_p11 = por %p6175_p10, %p6174_p9 }
 0xb6b   : > { %p6172_p8 = pneg %p6171_p7 }
 0xb6c   : > { %p6178_p13 = por %p6177_p12, %p6176_p11 }
 0xb6e   : > { %p6179_p0 = pnand %p6178_p13, %p6172_p8 }
 0xb70   : > { %6182 = shalt.err (!%p6179_p0)
}
 0xb71   : > { %s6221_s0 = smov 64   ;;  %s6222_s18 = smov 4  }
 0xb72   : > { %5652 = dma.vmem_to_hbm [thread:$0]  (%p6326_p5), %s8582_s19, 2048, %s8580_s28, %s8588_s25, %s6221_s0, %s6221_s0, %s6222_s18  }
 0xb73 PF: > { %p5658_p1 = scmp.ge.s32.totalorder %s6217_s24, 2  ;;  %s4776_s17 = sand.u32 1, %s6205_s21  }
 0xb74   : > { %s4777_s15 = scalar_lea.sflag [#allocation3], %s4776_s17 }
 0xb75   : > { %p5655_p2 = pnand %p5658_p1, %p6330_p6 }
 0xb77   : > { %6200 = dma.done.wait (!%p5655_p2), %s4777_s15, 2048  }
 0xb78   : > { %6202 = vsyncadd (!%p5655_p2), %s4777_s15, 4294965248  ;;  %p22_p3 = scmp.ge.s32.totalorder %s6313_s27, 4   ;;  %s9180_s21 = smov %s6209_s22 }
 0xb79   : > { %s9181_s22 = smov %s6213_s23  ;;  %s9182_s23 = smov %s6324_s30 }
 0xb7a   : > { %s9183_s24 = smov %s6313_s27  ;;  %24 = sbr.rel (!%p22_p3) target bundleno = 5 (0x5), region = 103 }
 0xb81   :  { %4782 = vsyncpa [#allocation3], 1 }
 0xb82   :  { %4784 = vsyncpa [#allocation3 + $0x1], 1 }

</bundles_post_ra>
